<compile_context>
chip_gen: v7x
topology: tpu7x:2x2x1
jax: 0.10.0
libtpu: 0.0.40
codegen_flags: <defaults>
</compile_context>

<pallas_src>
import functools

import jax
import jax.numpy as jnp
from jax.experimental import pallas as pl
from jax.experimental.pallas import tpu as pltpu


# ----------------------------------------------------------------------------
# small helpers
# ----------------------------------------------------------------------------
def _full_spec(shape):
    """Whole-array BlockSpec for a grid=(1,) pallas_call."""
    nd = len(shape)
    return pl.BlockSpec(tuple(shape), lambda *_: (0,) * nd)


def _nan_fix(x):
    """torch.nan_to_num(x, nan=0, posinf=1, neginf=-1), safe inside a kernel."""
    big = jnp.finfo(jnp.float32).max
    x = jnp.where(jnp.isnan(x), 0.0, x)
    x = jnp.where(x > big, 1.0, x)
    x = jnp.where(x < -big, -1.0, x)
    return x


# ----------------------------------------------------------------------------
# Pallas kernels
# ----------------------------------------------------------------------------
def conv_gemm_kernel(w_ref, x_ref, shift_ref, o_ref):
    """o = relu(W @ X + shift).  W:(Cout,K) bf16, X:(K,M) bf16, shift:(Cout,1) f32.

    Output (Cout, M) is lane-dense (M is the large dimension)."""
    acc = jnp.dot(w_ref[...], x_ref[...], preferred_element_type=jnp.float32)
    o_ref[...] = jnp.maximum(acc + shift_ref[...], 0.0)


def conv_gemm(w_mat, patches, shift):
    cout, kk = w_mat.shape
    m = patches.shape[1]
    return pl.pallas_call(
        conv_gemm_kernel,
        out_shape=jax.ShapeDtypeStruct((cout, m), jnp.float32),
        grid_spec=pltpu.PrefetchScalarGridSpec(
            num_scalar_prefetch=0,
            grid=(1,),
            in_specs=[_full_spec((cout, kk)),
                      _full_spec((kk, m)),
                      _full_spec((cout, 1))],
            out_specs=_full_spec((cout, m)),
        ),
        compiler_params=pltpu.CompilerParams(dimension_semantics=("arbitrary",)),
    )(w_mat, patches, shift)


def gru_fused_kernel(*refs, S, B, H, n_layers):
    """Fused: fc Linear+ReLU+nan_fix, z concat (via split weights), bidirectional
    multi-layer GRU (time loop unrolled in-kernel), decoder Linear, nan_fix."""
    it = iter(refs)
    pooled_ref = next(it)     # (S*B, 512)  time-major rows (t*B + b)
    z_ref = next(it)          # (B, latent)
    fcw_ref = next(it)        # (512, obs)
    fcb_ref = next(it)        # (1, obs)
    layers = [tuple(next(it) for _ in range(10)) for _ in range(n_layers)]
    decwf_ref = next(it)      # (H, A)
    decwb_ref = next(it)      # (H, A)
    decb_ref = next(it)       # (1, A)
    out_ref = next(it)        # (S*B, A)

    # ---- fc Linear + ReLU + nan_to_num (state_features) -----------------
    feat = jnp.dot(pooled_ref[...], fcw_ref[...],
                   preferred_element_type=jnp.float32) + fcb_ref[...]
    feat = _nan_fix(jnp.maximum(feat, 0.0))                    # (S*B, obs)
    zb = z_ref[...]                                            # (B, latent)

    # GRU input at step t is the pair (feat_t, z); the input weights arrive
    # pre-split so no concatenation is needed anywhere in the kernel.
    xs = [(feat[t * B:(t + 1) * B, :], zb) for t in range(S)]

    def cell(x_parts, h, wih_parts, whh, bih, bhh):
        gi = bih
        for xp, wp in zip(x_parts, wih_parts):
            gi = gi + jnp.dot(xp, wp, preferred_element_type=jnp.float32)
        gh = jnp.dot(h, whh, preferred_element_type=jnp.float32) + bhh
        r = jax.nn.sigmoid(gi[:, 0:H] + gh[:, 0:H])
        zg = jax.nn.sigmoid(gi[:, H:2 * H] + gh[:, H:2 * H])
        n = jnp.tanh(gi[:, 2 * H:3 * H] + r * gh[:, 2 * H:3 * H])
        return (1.0 - zg) * n + zg * h

    for (wf0, wf1, uf, bif, bhf, wb0, wb1, ub, bib, bhb) in layers:
        wfp = (wf0[...], wf1[...])
        ufv, bifv, bhfv = uf[...], bif[...], bhf[...]
        wbp = (wb0[...], wb1[...])
        ubv, bibv, bhbv = ub[...], bib[...], bhb[...]

        hf = jnp.zeros((B, H), jnp.float32)
        outs_f = []
        for t in range(S):                        # forward direction (unrolled)
            hf = cell(xs[t], hf, wfp, ufv, bifv, bhfv)
            outs_f.append(hf)

        hb = jnp.zeros((B, H), jnp.float32)
        outs_b = [None] * S
        for t in range(S - 1, -1, -1):            # backward direction (unrolled)
            hb = cell(xs[t], hb, wbp, ubv, bibv, bhbv)
            outs_b[t] = hb

        xs = [(outs_f[t], outs_b[t]) for t in range(S)]

    # ---- nan_to_num(gru_output), decoder Linear, nan_to_num(action) -----
    dwf, dwb, db = decwf_ref[...], decwb_ref[...], decb_ref[...]
    for t in range(S):
        hf_t = _nan_fix(xs[t][0])
        hb_t = _nan_fix(xs[t][1])
        act_t = (jnp.dot(hf_t, dwf, preferred_element_type=jnp.float32)
                 + jnp.dot(hb_t, dwb, preferred_element_type=jnp.float32) + db)
        out_ref[t * B:(t + 1) * B, :] = _nan_fix(act_t)


def gru_fused(inputs, *, S, B, H, n_layers, action_dim):
    kern = functools.partial(gru_fused_kernel, S=S, B=B, H=H, n_layers=n_layers)
    return pl.pallas_call(
        kern,
        out_shape=jax.ShapeDtypeStruct((S * B, action_dim), jnp.float32),
        grid_spec=pltpu.PrefetchScalarGridSpec(
            num_scalar_prefetch=0,
            grid=(1,),
            in_specs=[_full_spec(a.shape) for a in inputs],
            out_specs=_full_spec((S * B, action_dim)),
        ),
        compiler_params=pltpu.CompilerParams(dimension_semantics=("arbitrary",)),
    )(*inputs)


# ----------------------------------------------------------------------------
# plain-JAX glue (fused by jit around the Pallas calls)
# ----------------------------------------------------------------------------
def _patches_cnhw(x, k, s):
    """x: (C, N, H, W) -> (k*k*C, N*oh*ow); rows ordered (kh, kw, cin),
    columns ordered (n, oh, ow) to match the Pallas GEMM layout."""
    C, N, Hh, Ww = x.shape
    oh = (Hh - k) // s + 1
    ow = (Ww - k) // s + 1
    cols = []
    for kh in range(k):
        for kw in range(k):
            cols.append(x[:, :, kh:kh + s * (oh - 1) + 1:s,
                             kw:kw + s * (ow - 1) + 1:s])      # (C, N, oh, ow)
    p = jnp.stack(cols, axis=0)                                # (k*k, C, N, oh, ow)
    return p.reshape(k * k * C, N * oh * ow), oh, ow


def _adaptive_avg_pool_cnhw(x, out_hw):
    """PyTorch-style adaptive average pool on channel-major (C, N, H, W)."""
    C, N, Hh, Ww = x.shape
    oh, ow = out_hw
    rows = []
    for i in range(oh):
        hs = (i * Hh) // oh
        he = -(-((i + 1) * Hh) // oh)
        cols = []
        for j in range(ow):
            ws = (j * Ww) // ow
            we = -(-((j + 1) * Ww) // ow)
            cols.append(jnp.mean(x[:, :, hs:he, ws:we], axis=(2, 3)))
        rows.append(jnp.stack(cols, axis=-1))
    return jnp.stack(rows, axis=-2)   # (C, N, oh, ow)


# ----------------------------------------------------------------------------
# parameter init (deterministic, synthetic; PyTorch-equivalent shapes)
# ----------------------------------------------------------------------------
def init_params(key, cfg):
    keys = iter(jax.random.split(key, 128))

    def nrm(shape, scale=0.1):
        return scale * jax.random.normal(next(keys), shape, jnp.float32)

    p = {}
    # BatchNorm2d(3) on the input (inference form)
    p['bn0_gamma'] = 1.0 + nrm((3,))
    p['bn0_beta'] = nrm((3,))
    p['bn0_mean'] = nrm((3,))
    p['bn0_var'] = 1.0 + jnp.abs(nrm((3,)))

    conv_defs = [(3, 8, 4), (8, 16, 4), (16, 32, 4)]
    p['conv'] = []
    for cin, cout, k in conv_defs:
        p['conv'].append({
            'w': nrm((cout, cin, k, k)),
            'b': nrm((cout,)),
            'gamma': 1.0 + nrm((cout,)),
            'beta': nrm((cout,)),
            'mean': nrm((cout,)),
            'var': 1.0 + jnp.abs(nrm((cout,))),
        })

    p['fc_w'] = nrm((cfg['obs_feature_dim'], 32 * 4 * 4))   # Linear(512, obs_dim)
    p['fc_b'] = nrm((cfg['obs_feature_dim'],))

    H = cfg['gru_hidden_dim']
    p['gru'] = []
    for layer in range(cfg['gru_layers']):
        d_in = cfg['obs_feature_dim'] + cfg['latent_dim'] if layer == 0 else 2 * H
        layer_p = {}
        for direction in ('fwd', 'bwd'):
            wih = nrm((3 * H, d_in))
            whh = nrm((3 * H, H))
            bih = nrm((3 * H,))
            bhh = nrm((3 * H,))
            layer_p[direction] = (wih.T, whh.T,
                                  bih.reshape(1, -1), bhh.reshape(1, -1))
        p['gru'].append(layer_p)

    p['dec_w'] = nrm((cfg['action_dim'], 2 * H))
    p['dec_b'] = nrm((cfg['action_dim'],))
    return p


# ----------------------------------------------------------------------------
# forward pass
# ----------------------------------------------------------------------------
def decoder_forward(params, cfg, state, z):
    eps = 1e-5
    if state.ndim == 5 and state.shape[2] != 3 and state.shape[-1] == 3:
        state = jnp.transpose(state, (0, 1, 4, 2, 3))
    B, S, C, Hh, Ww = state.shape
    N = B * S
    # channel-major (C, N, H, W) for the whole conv stack
    x = jnp.transpose(state.reshape(N, C, Hh, Ww).astype(jnp.float32), (1, 0, 2, 3))

    # Fold the leading BatchNorm2d(3) into conv1's weights/bias.
    g0 = params['bn0_gamma'] / jnp.sqrt(params['bn0_var'] + eps)
    c0 = params['bn0_beta'] - g0 * params['bn0_mean']
    w1 = params['conv'][0]['w'] * g0[None, :, None, None]
    b1 = params['conv'][0]['b'] + jnp.sum(
        params['conv'][0]['w'] * c0[None, :, None, None], axis=(1, 2, 3))

    conv_stack = [
        (w1, b1, params['conv'][0], 4, 4),
        (params['conv'][1]['w'], params['conv'][1]['b'], params['conv'][1], 4, 4),
        (params['conv'][2]['w'], params['conv'][2]['b'], params['conv'][2], 4, 2),
    ]
    for (w, b, bn, k, s) in conv_stack:
        patches, oh, ow = _patches_cnhw(x, k, s)          # (k*k*Cin, N*oh*ow)
        cout = w.shape[0]
        g = bn['gamma'] / jnp.sqrt(bn['var'] + eps)
        # rows ordered to match patch rows (kh, kw, cin); BN scale folded in
        w_mat = w.transpose(0, 2, 3, 1).reshape(cout, -1) * g[:, None]
        shift = (g * (b - bn['mean']) + bn['beta'])[:, None]          # (Cout, 1)
        y = conv_gemm(w_mat.astype(jnp.bfloat16),
                      patches.astype(jnp.bfloat16),
                      shift.astype(jnp.float32))                      # (Cout, M) f32
        x = y.reshape(cout, N, oh, ow)                   # stay channel-major

    # AdaptiveAvgPool2d((4,4)): identity for 160x160 inputs, fallback otherwise.
    if x.shape[2:] != (4, 4):
        x = _adaptive_avg_pool_cnhw(x, (4, 4))
    feats = jnp.transpose(x, (1, 0, 2, 3)).reshape(N, -1)   # (N, 512) in (c,h,w) order

    # Time-major rows (t*B + b) for the fused GRU kernel.
    pooled_tm = feats.reshape(B, S, -1).transpose(1, 0, 2).reshape(S * B, -1)

    obs = cfg['obs_feature_dim']
    H = cfg['gru_hidden_dim']
    gru_inputs = [pooled_tm, z.astype(jnp.float32),
                  params['fc_w'].T, params['fc_b'][None, :]]
    for li, layer in enumerate(params['gru']):
        split = obs if li == 0 else H
        for direction in ('fwd', 'bwd'):
            wih_t, whh_t, bih, bhh = layer[direction]
            gru_inputs.extend([wih_t[:split, :], wih_t[split:, :], whh_t, bih, bhh])
    decw_t = params['dec_w'].T                               # (2H, A)
    gru_inputs.extend([decw_t[:H, :], decw_t[H:, :], params['dec_b'][None, :]])

    act_tm = gru_fused(gru_inputs, S=S, B=B, H=H,
                       n_layers=len(params['gru']),
                       action_dim=cfg['action_dim'])         # (S*B, A)
    return act_tm.reshape(S, B, -1).transpose(1, 0, 2)       # (B, S, A)


# ----------------------------------------------------------------------------
if __name__ == "__main__":
    cfg = dict(obs_feature_dim=32, latent_dim=8, gru_hidden_dim=32,
               gru_layers=1, action_dim=8)
    # Image size 160 -> conv stack produces exactly 4x4 before the adaptive pool.
    B, S, Himg, Wimg = 2, 4, 160, 160

    root = jax.random.PRNGKey(0)
    k_param, k_state, k_z = jax.random.split(root, 3)
    params = init_params(k_param, cfg)

    state = jax.random.normal(k_state, (B, S, 3, Himg, Wimg), jnp.float32)
    z = jax.random.normal(k_z, (B, cfg['latent_dim']), jnp.float32)

    fwd = jax.jit(lambda p, s, zz: decoder_forward(p, cfg, s, zz))
    action = fwd(params, state, z)
    jax.block_until_ready(action)
    assert action.shape == (B, S, cfg['action_dim'])
    assert bool(jnp.all(jnp.isfinite(action)))
    print("KERNEL_OK")
</pallas_src>

<mosaic_0001>
module attributes {stable_mosaic.version = 11 : i64} {
  func.func @conv_gemm_kernel(%arg0: i32, %arg1: memref<8x48xbf16, #tpu.memory_space<vmem>>, %arg2: memref<48x12800xbf16, #tpu.memory_space<vmem>>, %arg3: memref<8x1xf32, #tpu.memory_space<vmem>>, %arg4: memref<8x12800xf32, #tpu.memory_space<vmem>>) attributes {dimension_semantics = [#tpu.dimension_semantics<arbitrary>], iteration_bounds = array<i64: 1>, scalar_prefetch = 0 : i64, scratch_operands = 0 : i64, tpu.core_type = #tpu.core_type<tc>, window_params = [{pipeline_mode = #tpu.pipeline_mode<synchronous>, transform_indices = @transform_0, window_bounds = array<i64: 8, 48>}, {pipeline_mode = #tpu.pipeline_mode<synchronous>, transform_indices = @transform_1, window_bounds = array<i64: 48, 12800>}, {pipeline_mode = #tpu.pipeline_mode<synchronous>, transform_indices = @transform_2, window_bounds = array<i64: 8, 1>}, {pipeline_mode = #tpu.pipeline_mode<synchronous>, transform_indices = @transform_3, window_bounds = array<i64: 8, 12800>}]} {
    %c0 = arith.constant 0 : index
    %c0_0 = arith.constant 0 : index
    %0 = vector.load %arg1[%c0, %c0_0] : memref<8x48xbf16, #tpu.memory_space<vmem>>, vector<8x48xbf16>
    %c0_1 = arith.constant 0 : index
    %c0_2 = arith.constant 0 : index
    %1 = vector.load %arg2[%c0_1, %c0_2] : memref<48x12800xbf16, #tpu.memory_space<vmem>>, vector<48x12800xbf16>
    %cst = arith.constant dense<0.000000e+00> : vector<8x12800xf32>
    %2 = tpu.matmul %0, %1, %cst {dimension_numbers = #tpu.dot_dimension_numbers<[1], [0], [0], [1], [0, 0, 1, 1], [], []>} : vector<8x48xbf16>, vector<48x12800xbf16>, vector<8x12800xf32> -> vector<8x12800xf32>
    %c0_3 = arith.constant 0 : index
    %c0_4 = arith.constant 0 : index
    %3 = vector.load %arg3[%c0_3, %c0_4] : memref<8x1xf32, #tpu.memory_space<vmem>>, vector<8x1xf32>
    %4 = vector.broadcast %3 : vector<8x1xf32> to vector<8x12800xf32>
    %5 = arith.addf %2, %4 : vector<8x12800xf32>
    %cst_5 = arith.constant 0.000000e+00 : f32
    %6 = vector.broadcast %cst_5 : f32 to vector<8x12800xf32>
    %7 = arith.maximumf %5, %6 : vector<8x12800xf32>
    %c0_6 = arith.constant 0 : index
    %c0_7 = arith.constant 0 : index
    %8 = vector.load %arg4[%c0_6, %c0_7] : memref<8x12800xf32, #tpu.memory_space<vmem>>, vector<8x12800xf32>
    tpu.vector_store %arg4[%c0_6, %c0_7], %7 {strides = array<i32>} : memref<8x12800xf32, #tpu.memory_space<vmem>>, vector<8x12800xf32>,
    return
  }
  func.func @transform_0(%arg0: i32) -> (i32, i32) {
    %c0_i32 = arith.constant 0 : i32
    %c0_i32_0 = arith.constant 0 : i32
    %c0_i32_1 = arith.constant 0 : i32
    return %c0_i32, %c0_i32_0 : i32, i32
  }
  func.func @transform_1(%arg0: i32) -> (i32, i32) {
    %c0_i32 = arith.constant 0 : i32
    %c0_i32_0 = arith.constant 0 : i32
    %c0_i32_1 = arith.constant 0 : i32
    return %c0_i32, %c0_i32_0 : i32, i32
  }
  func.func @transform_2(%arg0: i32) -> (i32, i32) {
    %c0_i32 = arith.constant 0 : i32
    %c0_i32_0 = arith.constant 0 : i32
    %c0_i32_1 = arith.constant 0 : i32
    return %c0_i32, %c0_i32_0 : i32, i32
  }
  func.func @transform_3(%arg0: i32) -> (i32, i32) {
    %c0_i32 = arith.constant 0 : i32
    %c0_i32_0 = arith.constant 0 : i32
    %c0_i32_1 = arith.constant 0 : i32
    return %c0_i32, %c0_i32_0 : i32, i32
  }
}

module attributes {stable_mosaic.version = 11 : i64} {
  func.func @conv_gemm_kernel(%arg0: i32, %arg1: memref<16x128xbf16, #tpu.memory_space<vmem>>, %arg2: memref<128x800xbf16, #tpu.memory_space<vmem>>, %arg3: memref<16x1xf32, #tpu.memory_space<vmem>>, %arg4: memref<16x800xf32, #tpu.memory_space<vmem>>) attributes {dimension_semantics = [#tpu.dimension_semantics<arbitrary>], iteration_bounds = array<i64: 1>, scalar_prefetch = 0 : i64, scratch_operands = 0 : i64, tpu.core_type = #tpu.core_type<tc>, window_params = [{pipeline_mode = #tpu.pipeline_mode<synchronous>, transform_indices = @transform_0, window_bounds = array<i64: 16, 128>}, {pipeline_mode = #tpu.pipeline_mode<synchronous>, transform_indices = @transform_1, window_bounds = array<i64: 128, 800>}, {pipeline_mode = #tpu.pipeline_mode<synchronous>, transform_indices = @transform_2, window_bounds = array<i64: 16, 1>}, {pipeline_mode = #tpu.pipeline_mode<synchronous>, transform_indices = @transform_3, window_bounds = array<i64: 16, 800>}]} {
    %c0 = arith.constant 0 : index
    %c0_0 = arith.constant 0 : index
    %0 = vector.load %arg1[%c0, %c0_0] : memref<16x128xbf16, #tpu.memory_space<vmem>>, vector<16x128xbf16>
    %c0_1 = arith.constant 0 : index
    %c0_2 = arith.constant 0 : index
    %1 = vector.load %arg2[%c0_1, %c0_2] : memref<128x800xbf16, #tpu.memory_space<vmem>>, vector<128x800xbf16>
    %cst = arith.constant dense<0.000000e+00> : vector<16x800xf32>
    %2 = tpu.matmul %0, %1, %cst {dimension_numbers = #tpu.dot_dimension_numbers<[1], [0], [0], [1], [0, 0, 1, 1], [], []>} : vector<16x128xbf16>, vector<128x800xbf16>, vector<16x800xf32> -> vector<16x800xf32>
    %c0_3 = arith.constant 0 : index
    %c0_4 = arith.constant 0 : index
    %3 = vector.load %arg3[%c0_3, %c0_4] : memref<16x1xf32, #tpu.memory_space<vmem>>, vector<16x1xf32>
    %4 = vector.broadcast %3 : vector<16x1xf32> to vector<16x800xf32>
    %5 = arith.addf %2, %4 : vector<16x800xf32>
    %cst_5 = arith.constant 0.000000e+00 : f32
    %6 = vector.broadcast %cst_5 : f32 to vector<16x800xf32>
    %7 = arith.maximumf %5, %6 : vector<16x800xf32>
    %c0_6 = arith.constant 0 : index
    %c0_7 = arith.constant 0 : index
    %8 = vector.load %arg4[%c0_6, %c0_7] : memref<16x800xf32, #tpu.memory_space<vmem>>, vector<16x800xf32>
    tpu.vector_store %arg4[%c0_6, %c0_7], %7 {strides = array<i32>} : memref<16x800xf32, #tpu.memory_space<vmem>>, vector<16x800xf32>,
    return
  }
  func.func @transform_0(%arg0: i32) -> (i32, i32) {
    %c0_i32 = arith.constant 0 : i32
    %c0_i32_0 = arith.constant 0 : i32
    %c0_i32_1 = arith.constant 0 : i32
    return %c0_i32, %c0_i32_0 : i32, i32
  }
  func.func @transform_1(%arg0: i32) -> (i32, i32) {
    %c0_i32 = arith.constant 0 : i32
    %c0_i32_0 = arith.constant 0 : i32
    %c0_i32_1 = arith.constant 0 : i32
    return %c0_i32, %c0_i32_0 : i32, i32
  }
  func.func @transform_2(%arg0: i32) -> (i32, i32) {
    %c0_i32 = arith.constant 0 : i32
    %c0_i32_0 = arith.constant 0 : i32
    %c0_i32_1 = arith.constant 0 : i32
    return %c0_i32, %c0_i32_0 : i32, i32
  }
  func.func @transform_3(%arg0: i32) -> (i32, i32) {
    %c0_i32 = arith.constant 0 : i32
    %c0_i32_0 = arith.constant 0 : i32
    %c0_i32_1 = arith.constant 0 : i32
    return %c0_i32, %c0_i32_0 : i32, i32
  }
}

module attributes {stable_mosaic.version = 11 : i64} {
  func.func @conv_gemm_kernel(%arg0: i32, %arg1: memref<32x256xbf16, #tpu.memory_space<vmem>>, %arg2: memref<256x128xbf16, #tpu.memory_space<vmem>>, %arg3: memref<32x1xf32, #tpu.memory_space<vmem>>, %arg4: memref<32x128xf32, #tpu.memory_space<vmem>>) attributes {dimension_semantics = [#tpu.dimension_semantics<arbitrary>], iteration_bounds = array<i64: 1>, scalar_prefetch = 0 : i64, scratch_operands = 0 : i64, tpu.core_type = #tpu.core_type<tc>, window_params = [{pipeline_mode = #tpu.pipeline_mode<synchronous>, transform_indices = @transform_0, window_bounds = array<i64: 32, 256>}, {pipeline_mode = #tpu.pipeline_mode<synchronous>, transform_indices = @transform_1, window_bounds = array<i64: 256, 128>}, {pipeline_mode = #tpu.pipeline_mode<synchronous>, transform_indices = @transform_2, window_bounds = array<i64: 32, 1>}, {pipeline_mode = #tpu.pipeline_mode<synchronous>, transform_indices = @transform_3, window_bounds = array<i64: 32, 128>}]} {
    %c0 = arith.constant 0 : index
    %c0_0 = arith.constant 0 : index
    %0 = vector.load %arg1[%c0, %c0_0] : memref<32x256xbf16, #tpu.memory_space<vmem>>, vector<32x256xbf16>
    %c0_1 = arith.constant 0 : index
    %c0_2 = arith.constant 0 : index
    %1 = vector.load %arg2[%c0_1, %c0_2] : memref<256x128xbf16, #tpu.memory_space<vmem>>, vector<256x128xbf16>
    %cst = arith.constant dense<0.000000e+00> : vector<32x128xf32>
    %2 = tpu.matmul %0, %1, %cst {dimension_numbers = #tpu.dot_dimension_numbers<[1], [0], [0], [1], [0, 0, 1, 1], [], []>} : vector<32x256xbf16>, vector<256x128xbf16>, vector<32x128xf32> -> vector<32x128xf32>
    %c0_3 = arith.constant 0 : index
    %c0_4 = arith.constant 0 : index
    %3 = vector.load %arg3[%c0_3, %c0_4] : memref<32x1xf32, #tpu.memory_space<vmem>>, vector<32x1xf32>
    %4 = vector.broadcast %3 : vector<32x1xf32> to vector<32x128xf32>
    %5 = arith.addf %2, %4 : vector<32x128xf32>
    %cst_5 = arith.constant 0.000000e+00 : f32
    %6 = vector.broadcast %cst_5 : f32 to vector<32x128xf32>
    %7 = arith.maximumf %5, %6 : vector<32x128xf32>
    %c0_6 = arith.constant 0 : index
    %c0_7 = arith.constant 0 : index
    %8 = vector.load %arg4[%c0_6, %c0_7] : memref<32x128xf32, #tpu.memory_space<vmem>>, vector<32x128xf32>
    tpu.vector_store %arg4[%c0_6, %c0_7], %7 {strides = array<i32>} : memref<32x128xf32, #tpu.memory_space<vmem>>, vector<32x128xf32>,
    return
  }
  func.func @transform_0(%arg0: i32) -> (i32, i32) {
    %c0_i32 = arith.constant 0 : i32
    %c0_i32_0 = arith.constant 0 : i32
    %c0_i32_1 = arith.constant 0 : i32
    return %c0_i32, %c0_i32_0 : i32, i32
  }
  func.func @transform_1(%arg0: i32) -> (i32, i32) {
    %c0_i32 = arith.constant 0 : i32
    %c0_i32_0 = arith.constant 0 : i32
    %c0_i32_1 = arith.constant 0 : i32
    return %c0_i32, %c0_i32_0 : i32, i32
  }
  func.func @transform_2(%arg0: i32) -> (i32, i32) {
    %c0_i32 = arith.constant 0 : i32
    %c0_i32_0 = arith.constant 0 : i32
    %c0_i32_1 = arith.constant 0 : i32
    return %c0_i32, %c0_i32_0 : i32, i32
  }
  func.func @transform_3(%arg0: i32) -> (i32, i32) {
    %c0_i32 = arith.constant 0 : i32
    %c0_i32_0 = arith.constant 0 : i32
    %c0_i32_1 = arith.constant 0 : i32
    return %c0_i32, %c0_i32_0 : i32, i32
  }
}

module attributes {stable_mosaic.version = 11 : i64} {
  func.func @gru_fused_kernel(%arg0: i32, %arg1: memref<8x512xf32, #tpu.memory_space<vmem>>, %arg2: memref<2x8xf32, #tpu.memory_space<vmem>>, %arg3: memref<512x32xf32, #tpu.memory_space<vmem>>, %arg4: memref<1x32xf32, #tpu.memory_space<vmem>>, %arg5: memref<32x96xf32, #tpu.memory_space<vmem>>, %arg6: memref<8x96xf32, #tpu.memory_space<vmem>>, %arg7: memref<32x96xf32, #tpu.memory_space<vmem>>, %arg8: memref<1x96xf32, #tpu.memory_space<vmem>>, %arg9: memref<1x96xf32, #tpu.memory_space<vmem>>, %arg10: memref<32x96xf32, #tpu.memory_space<vmem>>, %arg11: memref<8x96xf32, #tpu.memory_space<vmem>>, %arg12: memref<32x96xf32, #tpu.memory_space<vmem>>, %arg13: memref<1x96xf32, #tpu.memory_space<vmem>>, %arg14: memref<1x96xf32, #tpu.memory_space<vmem>>, %arg15: memref<32x8xf32, #tpu.memory_space<vmem>>, %arg16: memref<32x8xf32, #tpu.memory_space<vmem>>, %arg17: memref<1x8xf32, #tpu.memory_space<vmem>>, %arg18: memref<8x8xf32, #tpu.memory_space<vmem>>) attributes {dimension_semantics = [#tpu.dimension_semantics<arbitrary>], iteration_bounds = array<i64: 1>, scalar_prefetch = 0 : i64, scratch_operands = 0 : i64, tpu.core_type = #tpu.core_type<tc>, window_params = [{pipeline_mode = #tpu.pipeline_mode<synchronous>, transform_indices = @transform_0, window_bounds = array<i64: 8, 512>}, {pipeline_mode = #tpu.pipeline_mode<synchronous>, transform_indices = @transform_1, window_bounds = array<i64: 2, 8>}, {pipeline_mode = #tpu.pipeline_mode<synchronous>, transform_indices = @transform_2, window_bounds = array<i64: 512, 32>}, {pipeline_mode = #tpu.pipeline_mode<synchronous>, transform_indices = @transform_3, window_bounds = array<i64: 1, 32>}, {pipeline_mode = #tpu.pipeline_mode<synchronous>, transform_indices = @transform_4, window_bounds = array<i64: 32, 96>}, {pipeline_mode = #tpu.pipeline_mode<synchronous>, transform_indices = @transform_5, window_bounds = array<i64: 8, 96>}, {pipeline_mode = #tpu.pipeline_mode<synchronous>, transform_indices = @transform_6, window_bounds = array<i64: 32, 96>}, {pipeline_mode = #tpu.pipeline_mode<synchronous>, transform_indices = @transform_7, window_bounds = array<i64: 1, 96>}, {pipeline_mode = #tpu.pipeline_mode<synchronous>, transform_indices = @transform_8, window_bounds = array<i64: 1, 96>}, {pipeline_mode = #tpu.pipeline_mode<synchronous>, transform_indices = @transform_9, window_bounds = array<i64: 32, 96>}, {pipeline_mode = #tpu.pipeline_mode<synchronous>, transform_indices = @transform_10, window_bounds = array<i64: 8, 96>}, {pipeline_mode = #tpu.pipeline_mode<synchronous>, transform_indices = @transform_11, window_bounds = array<i64: 32, 96>}, {pipeline_mode = #tpu.pipeline_mode<synchronous>, transform_indices = @transform_12, window_bounds = array<i64: 1, 96>}, {pipeline_mode = #tpu.pipeline_mode<synchronous>, transform_indices = @transform_13, window_bounds = array<i64: 1, 96>}, {pipeline_mode = #tpu.pipeline_mode<synchronous>, transform_indices = @transform_14, window_bounds = array<i64: 32, 8>}, {pipeline_mode = #tpu.pipeline_mode<synchronous>, transform_indices = @transform_15, window_bounds = array<i64: 32, 8>}, {pipeline_mode = #tpu.pipeline_mode<synchronous>, transform_indices = @transform_16, window_bounds = array<i64: 1, 8>}, {pipeline_mode = #tpu.pipeline_mode<synchronous>, transform_indices = @transform_17, window_bounds = array<i64: 8, 8>}]} {
    %c0 = arith.constant 0 : index
    %c0_0 = arith.constant 0 : index
    %0 = vector.load %arg1[%c0, %c0_0] : memref<8x512xf32, #tpu.memory_space<vmem>>, vector<8x512xf32>
    %c0_1 = arith.constant 0 : index
    %c0_2 = arith.constant 0 : index
    %1 = vector.load %arg3[%c0_1, %c0_2] : memref<512x32xf32, #tpu.memory_space<vmem>>, vector<512x32xf32>
    %cst = arith.constant dense<0.000000e+00> : vector<8x32xf32>
    %2 = tpu.matmul %0, %1, %cst {dimension_numbers = #tpu.dot_dimension_numbers<[1], [0], [0], [1], [0, 0, 1, 1], [], []>} : vector<8x512xf32>, vector<512x32xf32>, vector<8x32xf32> -> vector<8x32xf32>
    %c0_3 = arith.constant 0 : index
    %c0_4 = arith.constant 0 : index
    %3 = vector.load %arg4[%c0_3, %c0_4] : memref<1x32xf32, #tpu.memory_space<vmem>>, vector<1x32xf32>
    %4 = vector.broadcast %3 : vector<1x32xf32> to vector<8x32xf32>
    %5 = arith.addf %2, %4 : vector<8x32xf32>
    %cst_5 = arith.constant 0.000000e+00 : f32
    %6 = vector.broadcast %cst_5 : f32 to vector<8x32xf32>
    %7 = arith.maximumf %5, %6 : vector<8x32xf32>
    %8 = arith.cmpf one, %7, %7 : vector<8x32xf32>
    %cst_6 = arith.constant 0.000000e+00 : f32
    %9 = vector.broadcast %cst_6 : f32 to vector<8x32xf32>
    %10 = arith.select %8, %9, %7 : vector<8x32xi1>, vector<8x32xf32>
    %cst_7 = arith.constant 3.40282347E+38 : f32
    %11 = vector.broadcast %cst_7 : f32 to vector<8x32xf32>
    %12 = arith.cmpf ogt, %10, %11 : vector<8x32xf32>
    %cst_8 = arith.constant 1.000000e+00 : f32
    %13 = vector.broadcast %cst_8 : f32 to vector<8x32xf32>
    %14 = arith.select %12, %13, %10 : vector<8x32xi1>, vector<8x32xf32>
    %cst_9 = arith.constant -3.40282347E+38 : f32
    %15 = vector.broadcast %cst_9 : f32 to vector<8x32xf32>
    %16 = arith.cmpf olt, %14, %15 : vector<8x32xf32>
    %cst_10 = arith.constant -1.000000e+00 : f32
    %17 = vector.broadcast %cst_10 : f32 to vector<8x32xf32>
    %18 = arith.select %16, %17, %14 : vector<8x32xi1>, vector<8x32xf32>
    %c0_11 = arith.constant 0 : index
    %c0_12 = arith.constant 0 : index
    %19 = vector.load %arg2[%c0_11, %c0_12] : memref<2x8xf32, #tpu.memory_space<vmem>>, vector<2x8xf32>
    %20 = vector.extract_strided_slice %18 {offsets = [0, 0], sizes = [2, 32], strides = [1, 1]} : vector<8x32xf32> to vector<2x32xf32>
    %21 = vector.extract_strided_slice %18 {offsets = [2, 0], sizes = [2, 32], strides = [1, 1]} : vector<8x32xf32> to vector<2x32xf32>
    %22 = vector.extract_strided_slice %18 {offsets = [4, 0], sizes = [2, 32], strides = [1, 1]} : vector<8x32xf32> to vector<2x32xf32>
    %23 = vector.extract_strided_slice %18 {offsets = [6, 0], sizes = [2, 32], strides = [1, 1]} : vector<8x32xf32> to vector<2x32xf32>
    %c0_13 = arith.constant 0 : index
    %c0_14 = arith.constant 0 : index
    %24 = vector.load %arg5[%c0_13, %c0_14] : memref<32x96xf32, #tpu.memory_space<vmem>>, vector<32x96xf32>
    %c0_15 = arith.constant 0 : index
    %c0_16 = arith.constant 0 : index
    %25 = vector.load %arg6[%c0_15, %c0_16] : memref<8x96xf32, #tpu.memory_space<vmem>>, vector<8x96xf32>
    %c0_17 = arith.constant 0 : index
    %c0_18 = arith.constant 0 : index
    %26 = vector.load %arg7[%c0_17, %c0_18] : memref<32x96xf32, #tpu.memory_space<vmem>>, vector<32x96xf32>
    %c0_19 = arith.constant 0 : index
    %c0_20 = arith.constant 0 : index
    %27 = vector.load %arg8[%c0_19, %c0_20] : memref<1x96xf32, #tpu.memory_space<vmem>>, vector<1x96xf32>
    %c0_21 = arith.constant 0 : index
    %c0_22 = arith.constant 0 : index
    %28 = vector.load %arg9[%c0_21, %c0_22] : memref<1x96xf32, #tpu.memory_space<vmem>>, vector<1x96xf32>
    %c0_23 = arith.constant 0 : index
    %c0_24 = arith.constant 0 : index
    %29 = vector.load %arg10[%c0_23, %c0_24] : memref<32x96xf32, #tpu.memory_space<vmem>>, vector<32x96xf32>
    %c0_25 = arith.constant 0 : index
    %c0_26 = arith.constant 0 : index
    %30 = vector.load %arg11[%c0_25, %c0_26] : memref<8x96xf32, #tpu.memory_space<vmem>>, vector<8x96xf32>
    %c0_27 = arith.constant 0 : index
    %c0_28 = arith.constant 0 : index
    %31 = vector.load %arg12[%c0_27, %c0_28] : memref<32x96xf32, #tpu.memory_space<vmem>>, vector<32x96xf32>
    %c0_29 = arith.constant 0 : index
    %c0_30 = arith.constant 0 : index
    %32 = vector.load %arg13[%c0_29, %c0_30] : memref<1x96xf32, #tpu.memory_space<vmem>>, vector<1x96xf32>
    %c0_31 = arith.constant 0 : index
    %c0_32 = arith.constant 0 : index
    %33 = vector.load %arg14[%c0_31, %c0_32] : memref<1x96xf32, #tpu.memory_space<vmem>>, vector<1x96xf32>
    %cst_33 = arith.constant 0.000000e+00 : f32
    %34 = vector.broadcast %cst_33 : f32 to vector<2x32xf32>
    %cst_34 = arith.constant dense<0.000000e+00> : vector<2x96xf32>
    %35 = tpu.matmul %20, %24, %cst_34 {dimension_numbers = #tpu.dot_dimension_numbers<[1], [0], [0], [1], [0, 0, 1, 1], [], []>} : vector<2x32xf32>, vector<32x96xf32>, vector<2x96xf32> -> vector<2x96xf32>
    %36 = vector.broadcast %27 : vector<1x96xf32> to vector<2x96xf32>
    %37 = arith.addf %36, %35 : vector<2x96xf32>
    %cst_35 = arith.constant dense<0.000000e+00> : vector<2x96xf32>
    %38 = tpu.matmul %19, %25, %cst_35 {dimension_numbers = #tpu.dot_dimension_numbers<[1], [0], [0], [1], [0, 0, 1, 1], [], []>} : vector<2x8xf32>, vector<8x96xf32>, vector<2x96xf32> -> vector<2x96xf32>
    %39 = arith.addf %37, %38 : vector<2x96xf32>
    %cst_36 = arith.constant dense<0.000000e+00> : vector<2x96xf32>
    %40 = tpu.matmul %34, %26, %cst_36 {dimension_numbers = #tpu.dot_dimension_numbers<[1], [0], [0], [1], [0, 0, 1, 1], [], []>} : vector<2x32xf32>, vector<32x96xf32>, vector<2x96xf32> -> vector<2x96xf32>
    %41 = vector.broadcast %28 : vector<1x96xf32> to vector<2x96xf32>
    %42 = arith.addf %40, %41 : vector<2x96xf32>
    %43 = vector.extract_strided_slice %39 {offsets = [0, 0], sizes = [2, 32], strides = [1, 1]} : vector<2x96xf32> to vector<2x32xf32>
    %44 = vector.extract_strided_slice %42 {offsets = [0, 0], sizes = [2, 32], strides = [1, 1]} : vector<2x96xf32> to vector<2x32xf32>
    %45 = arith.addf %43, %44 : vector<2x32xf32>
    %46 = arith.negf %45 : vector<2x32xf32>
    %47 = math.exp %46 : vector<2x32xf32>
    %cst_37 = arith.constant 1.000000e+00 : f32
    %48 = vector.broadcast %cst_37 : f32 to vector<2x32xf32>
    %49 = arith.addf %48, %47 : vector<2x32xf32>
    %50 = arith.divf %48, %49 : vector<2x32xf32>
    %51 = vector.extract_strided_slice %39 {offsets = [0, 32], sizes = [2, 32], strides = [1, 1]} : vector<2x96xf32> to vector<2x32xf32>
    %52 = vector.extract_strided_slice %42 {offsets = [0, 32], sizes = [2, 32], strides = [1, 1]} : vector<2x96xf32> to vector<2x32xf32>
    %53 = arith.addf %51, %52 : vector<2x32xf32>
    %54 = arith.negf %53 : vector<2x32xf32>
    %55 = math.exp %54 : vector<2x32xf32>
    %cst_38 = arith.constant 1.000000e+00 : f32
    %56 = vector.broadcast %cst_38 : f32 to vector<2x32xf32>
    %57 = arith.addf %56, %55 : vector<2x32xf32>
    %58 = arith.divf %56, %57 : vector<2x32xf32>
    %59 = vector.extract_strided_slice %39 {offsets = [0, 64], sizes = [2, 32], strides = [1, 1]} : vector<2x96xf32> to vector<2x32xf32>
    %60 = vector.extract_strided_slice %42 {offsets = [0, 64], sizes = [2, 32], strides = [1, 1]} : vector<2x96xf32> to vector<2x32xf32>
    %61 = arith.mulf %50, %60 : vector<2x32xf32>
    %62 = arith.addf %59, %61 : vector<2x32xf32>
    %63 = math.tanh %62 : vector<2x32xf32>
    %cst_39 = arith.constant 1.000000e+00 : f32
    %64 = vector.broadcast %cst_39 : f32 to vector<2x32xf32>
    %65 = arith.subf %64, %58 : vector<2x32xf32>
    %66 = arith.mulf %65, %63 : vector<2x32xf32>
    %67 = arith.mulf %58, %34 : vector<2x32xf32>
    %68 = arith.addf %66, %67 : vector<2x32xf32>
    %cst_40 = arith.constant dense<0.000000e+00> : vector<2x96xf32>
    %69 = tpu.matmul %21, %24, %cst_40 {dimension_numbers = #tpu.dot_dimension_numbers<[1], [0], [0], [1], [0, 0, 1, 1], [], []>} : vector<2x32xf32>, vector<32x96xf32>, vector<2x96xf32> -> vector<2x96xf32>
    %70 = vector.broadcast %27 : vector<1x96xf32> to vector<2x96xf32>
    %71 = arith.addf %70, %69 : vector<2x96xf32>
    %cst_41 = arith.constant dense<0.000000e+00> : vector<2x96xf32>
    %72 = tpu.matmul %19, %25, %cst_41 {dimension_numbers = #tpu.dot_dimension_numbers<[1], [0], [0], [1], [0, 0, 1, 1], [], []>} : vector<2x8xf32>, vector<8x96xf32>, vector<2x96xf32> -> vector<2x96xf32>
    %73 = arith.addf %71, %72 : vector<2x96xf32>
    %cst_42 = arith.constant dense<0.000000e+00> : vector<2x96xf32>
    %74 = tpu.matmul %68, %26, %cst_42 {dimension_numbers = #tpu.dot_dimension_numbers<[1], [0], [0], [1], [0, 0, 1, 1], [], []>} : vector<2x32xf32>, vector<32x96xf32>, vector<2x96xf32> -> vector<2x96xf32>
    %75 = vector.broadcast %28 : vector<1x96xf32> to vector<2x96xf32>
    %76 = arith.addf %74, %75 : vector<2x96xf32>
    %77 = vector.extract_strided_slice %73 {offsets = [0, 0], sizes = [2, 32], strides = [1, 1]} : vector<2x96xf32> to vector<2x32xf32>
    %78 = vector.extract_strided_slice %76 {offsets = [0, 0], sizes = [2, 32], strides = [1, 1]} : vector<2x96xf32> to vector<2x32xf32>
    %79 = arith.addf %77, %78 : vector<2x32xf32>
    %80 = arith.negf %79 : vector<2x32xf32>
    %81 = math.exp %80 : vector<2x32xf32>
    %cst_43 = arith.constant 1.000000e+00 : f32
    %82 = vector.broadcast %cst_43 : f32 to vector<2x32xf32>
    %83 = arith.addf %82, %81 : vector<2x32xf32>
    %84 = arith.divf %82, %83 : vector<2x32xf32>
    %85 = vector.extract_strided_slice %73 {offsets = [0, 32], sizes = [2, 32], strides = [1, 1]} : vector<2x96xf32> to vector<2x32xf32>
    %86 = vector.extract_strided_slice %76 {offsets = [0, 32], sizes = [2, 32], strides = [1, 1]} : vector<2x96xf32> to vector<2x32xf32>
    %87 = arith.addf %85, %86 : vector<2x32xf32>
    %88 = arith.negf %87 : vector<2x32xf32>
    %89 = math.exp %88 : vector<2x32xf32>
    %cst_44 = arith.constant 1.000000e+00 : f32
    %90 = vector.broadcast %cst_44 : f32 to vector<2x32xf32>
    %91 = arith.addf %90, %89 : vector<2x32xf32>
    %92 = arith.divf %90, %91 : vector<2x32xf32>
    %93 = vector.extract_strided_slice %73 {offsets = [0, 64], sizes = [2, 32], strides = [1, 1]} : vector<2x96xf32> to vector<2x32xf32>
    %94 = vector.extract_strided_slice %76 {offsets = [0, 64], sizes = [2, 32], strides = [1, 1]} : vector<2x96xf32> to vector<2x32xf32>
    %95 = arith.mulf %84, %94 : vector<2x32xf32>
    %96 = arith.addf %93, %95 : vector<2x32xf32>
    %97 = math.tanh %96 : vector<2x32xf32>
    %cst_45 = arith.constant 1.000000e+00 : f32
    %98 = vector.broadcast %cst_45 : f32 to vector<2x32xf32>
    %99 = arith.subf %98, %92 : vector<2x32xf32>
    %100 = arith.mulf %99, %97 : vector<2x32xf32>
    %101 = arith.mulf %92, %68 : vector<2x32xf32>
    %102 = arith.addf %100, %101 : vector<2x32xf32>
    %cst_46 = arith.constant dense<0.000000e+00> : vector<2x96xf32>
    %103 = tpu.matmul %22, %24, %cst_46 {dimension_numbers = #tpu.dot_dimension_numbers<[1], [0], [0], [1], [0, 0, 1, 1], [], []>} : vector<2x32xf32>, vector<32x96xf32>, vector<2x96xf32> -> vector<2x96xf32>
    %104 = vector.broadcast %27 : vector<1x96xf32> to vector<2x96xf32>
    %105 = arith.addf %104, %103 : vector<2x96xf32>
    %cst_47 = arith.constant dense<0.000000e+00> : vector<2x96xf32>
    %106 = tpu.matmul %19, %25, %cst_47 {dimension_numbers = #tpu.dot_dimension_numbers<[1], [0], [0], [1], [0, 0, 1, 1], [], []>} : vector<2x8xf32>, vector<8x96xf32>, vector<2x96xf32> -> vector<2x96xf32>
    %107 = arith.addf %105, %106 : vector<2x96xf32>
    %cst_48 = arith.constant dense<0.000000e+00> : vector<2x96xf32>
    %108 = tpu.matmul %102, %26, %cst_48 {dimension_numbers = #tpu.dot_dimension_numbers<[1], [0], [0], [1], [0, 0, 1, 1], [], []>} : vector<2x32xf32>, vector<32x96xf32>, vector<2x96xf32> -> vector<2x96xf32>
    %109 = vector.broadcast %28 : vector<1x96xf32> to vector<2x96xf32>
    %110 = arith.addf %108, %109 : vector<2x96xf32>
    %111 = vector.extract_strided_slice %107 {offsets = [0, 0], sizes = [2, 32], strides = [1, 1]} : vector<2x96xf32> to vector<2x32xf32>
    %112 = vector.extract_strided_slice %110 {offsets = [0, 0], sizes = [2, 32], strides = [1, 1]} : vector<2x96xf32> to vector<2x32xf32>
    %113 = arith.addf %111, %112 : vector<2x32xf32>
    %114 = arith.negf %113 : vector<2x32xf32>
    %115 = math.exp %114 : vector<2x32xf32>
    %cst_49 = arith.constant 1.000000e+00 : f32
    %116 = vector.broadcast %cst_49 : f32 to vector<2x32xf32>
    %117 = arith.addf %116, %115 : vector<2x32xf32>
    %118 = arith.divf %116, %117 : vector<2x32xf32>
    %119 = vector.extract_strided_slice %107 {offsets = [0, 32], sizes = [2, 32], strides = [1, 1]} : vector<2x96xf32> to vector<2x32xf32>
    %120 = vector.extract_strided_slice %110 {offsets = [0, 32], sizes = [2, 32], strides = [1, 1]} : vector<2x96xf32> to vector<2x32xf32>
    %121 = arith.addf %119, %120 : vector<2x32xf32>
    %122 = arith.negf %121 : vector<2x32xf32>
    %123 = math.exp %122 : vector<2x32xf32>
    %cst_50 = arith.constant 1.000000e+00 : f32
    %124 = vector.broadcast %cst_50 : f32 to vector<2x32xf32>
    %125 = arith.addf %124, %123 : vector<2x32xf32>
    %126 = arith.divf %124, %125 : vector<2x32xf32>
    %127 = vector.extract_strided_slice %107 {offsets = [0, 64], sizes = [2, 32], strides = [1, 1]} : vector<2x96xf32> to vector<2x32xf32>
    %128 = vector.extract_strided_slice %110 {offsets = [0, 64], sizes = [2, 32], strides = [1, 1]} : vector<2x96xf32> to vector<2x32xf32>
    %129 = arith.mulf %118, %128 : vector<2x32xf32>
    %130 = arith.addf %127, %129 : vector<2x32xf32>
    %131 = math.tanh %130 : vector<2x32xf32>
    %cst_51 = arith.constant 1.000000e+00 : f32
    %132 = vector.broadcast %cst_51 : f32 to vector<2x32xf32>
    %133 = arith.subf %132, %126 : vector<2x32xf32>
    %134 = arith.mulf %133, %131 : vector<2x32xf32>
    %135 = arith.mulf %126, %102 : vector<2x32xf32>
    %136 = arith.addf %134, %135 : vector<2x32xf32>
    %cst_52 = arith.constant dense<0.000000e+00> : vector<2x96xf32>
    %137 = tpu.matmul %23, %24, %cst_52 {dimension_numbers = #tpu.dot_dimension_numbers<[1], [0], [0], [1], [0, 0, 1, 1], [], []>} : vector<2x32xf32>, vector<32x96xf32>, vector<2x96xf32> -> vector<2x96xf32>
    %138 = vector.broadcast %27 : vector<1x96xf32> to vector<2x96xf32>
    %139 = arith.addf %138, %137 : vector<2x96xf32>
    %cst_53 = arith.constant dense<0.000000e+00> : vector<2x96xf32>
    %140 = tpu.matmul %19, %25, %cst_53 {dimension_numbers = #tpu.dot_dimension_numbers<[1], [0], [0], [1], [0, 0, 1, 1], [], []>} : vector<2x8xf32>, vector<8x96xf32>, vector<2x96xf32> -> vector<2x96xf32>
    %141 = arith.addf %139, %140 : vector<2x96xf32>
    %cst_54 = arith.constant dense<0.000000e+00> : vector<2x96xf32>
    %142 = tpu.matmul %136, %26, %cst_54 {dimension_numbers = #tpu.dot_dimension_numbers<[1], [0], [0], [1], [0, 0, 1, 1], [], []>} : vector<2x32xf32>, vector<32x96xf32>, vector<2x96xf32> -> vector<2x96xf32>
    %143 = vector.broadcast %28 : vector<1x96xf32> to vector<2x96xf32>
    %144 = arith.addf %142, %143 : vector<2x96xf32>
    %145 = vector.extract_strided_slice %141 {offsets = [0, 0], sizes = [2, 32], strides = [1, 1]} : vector<2x96xf32> to vector<2x32xf32>
    %146 = vector.extract_strided_slice %144 {offsets = [0, 0], sizes = [2, 32], strides = [1, 1]} : vector<2x96xf32> to vector<2x32xf32>
    %147 = arith.addf %145, %146 : vector<2x32xf32>
    %148 = arith.negf %147 : vector<2x32xf32>
    %149 = math.exp %148 : vector<2x32xf32>
    %cst_55 = arith.constant 1.000000e+00 : f32
    %150 = vector.broadcast %cst_55 : f32 to vector<2x32xf32>
    %151 = arith.addf %150, %149 : vector<2x32xf32>
    %152 = arith.divf %150, %151 : vector<2x32xf32>
    %153 = vector.extract_strided_slice %141 {offsets = [0, 32], sizes = [2, 32], strides = [1, 1]} : vector<2x96xf32> to vector<2x32xf32>
    %154 = vector.extract_strided_slice %144 {offsets = [0, 32], sizes = [2, 32], strides = [1, 1]} : vector<2x96xf32> to vector<2x32xf32>
    %155 = arith.addf %153, %154 : vector<2x32xf32>
    %156 = arith.negf %155 : vector<2x32xf32>
    %157 = math.exp %156 : vector<2x32xf32>
    %cst_56 = arith.constant 1.000000e+00 : f32
    %158 = vector.broadcast %cst_56 : f32 to vector<2x32xf32>
    %159 = arith.addf %158, %157 : vector<2x32xf32>
    %160 = arith.divf %158, %159 : vector<2x32xf32>
    %161 = vector.extract_strided_slice %141 {offsets = [0, 64], sizes = [2, 32], strides = [1, 1]} : vector<2x96xf32> to vector<2x32xf32>
    %162 = vector.extract_strided_slice %144 {offsets = [0, 64], sizes = [2, 32], strides = [1, 1]} : vector<2x96xf32> to vector<2x32xf32>
    %163 = arith.mulf %152, %162 : vector<2x32xf32>
    %164 = arith.addf %161, %163 : vector<2x32xf32>
    %165 = math.tanh %164 : vector<2x32xf32>
    %cst_57 = arith.constant 1.000000e+00 : f32
    %166 = vector.broadcast %cst_57 : f32 to vector<2x32xf32>
    %167 = arith.subf %166, %160 : vector<2x32xf32>
    %168 = arith.mulf %167, %165 : vector<2x32xf32>
    %169 = arith.mulf %160, %136 : vector<2x32xf32>
    %170 = arith.addf %168, %169 : vector<2x32xf32>
    %cst_58 = arith.constant 0.000000e+00 : f32
    %171 = vector.broadcast %cst_58 : f32 to vector<2x32xf32>
    %cst_59 = arith.constant dense<0.000000e+00> : vector<2x96xf32>
    %172 = tpu.matmul %23, %29, %cst_59 {dimension_numbers = #tpu.dot_dimension_numbers<[1], [0], [0], [1], [0, 0, 1, 1], [], []>} : vector<2x32xf32>, vector<32x96xf32>, vector<2x96xf32> -> vector<2x96xf32>
    %173 = vector.broadcast %32 : vector<1x96xf32> to vector<2x96xf32>
    %174 = arith.addf %173, %172 : vector<2x96xf32>
    %cst_60 = arith.constant dense<0.000000e+00> : vector<2x96xf32>
    %175 = tpu.matmul %19, %30, %cst_60 {dimension_numbers = #tpu.dot_dimension_numbers<[1], [0], [0], [1], [0, 0, 1, 1], [], []>} : vector<2x8xf32>, vector<8x96xf32>, vector<2x96xf32> -> vector<2x96xf32>
    %176 = arith.addf %174, %175 : vector<2x96xf32>
    %cst_61 = arith.constant dense<0.000000e+00> : vector<2x96xf32>
    %177 = tpu.matmul %171, %31, %cst_61 {dimension_numbers = #tpu.dot_dimension_numbers<[1], [0], [0], [1], [0, 0, 1, 1], [], []>} : vector<2x32xf32>, vector<32x96xf32>, vector<2x96xf32> -> vector<2x96xf32>
    %178 = vector.broadcast %33 : vector<1x96xf32> to vector<2x96xf32>
    %179 = arith.addf %177, %178 : vector<2x96xf32>
    %180 = vector.extract_strided_slice %176 {offsets = [0, 0], sizes = [2, 32], strides = [1, 1]} : vector<2x96xf32> to vector<2x32xf32>
    %181 = vector.extract_strided_slice %179 {offsets = [0, 0], sizes = [2, 32], strides = [1, 1]} : vector<2x96xf32> to vector<2x32xf32>
    %182 = arith.addf %180, %181 : vector<2x32xf32>
    %183 = arith.negf %182 : vector<2x32xf32>
    %184 = math.exp %183 : vector<2x32xf32>
    %cst_62 = arith.constant 1.000000e+00 : f32
    %185 = vector.broadcast %cst_62 : f32 to vector<2x32xf32>
    %186 = arith.addf %185, %184 : vector<2x32xf32>
    %187 = arith.divf %185, %186 : vector<2x32xf32>
    %188 = vector.extract_strided_slice %176 {offsets = [0, 32], sizes = [2, 32], strides = [1, 1]} : vector<2x96xf32> to vector<2x32xf32>
    %189 = vector.extract_strided_slice %179 {offsets = [0, 32], sizes = [2, 32], strides = [1, 1]} : vector<2x96xf32> to vector<2x32xf32>
    %190 = arith.addf %188, %189 : vector<2x32xf32>
    %191 = arith.negf %190 : vector<2x32xf32>
    %192 = math.exp %191 : vector<2x32xf32>
    %cst_63 = arith.constant 1.000000e+00 : f32
    %193 = vector.broadcast %cst_63 : f32 to vector<2x32xf32>
    %194 = arith.addf %193, %192 : vector<2x32xf32>
    %195 = arith.divf %193, %194 : vector<2x32xf32>
    %196 = vector.extract_strided_slice %176 {offsets = [0, 64], sizes = [2, 32], strides = [1, 1]} : vector<2x96xf32> to vector<2x32xf32>
    %197 = vector.extract_strided_slice %179 {offsets = [0, 64], sizes = [2, 32], strides = [1, 1]} : vector<2x96xf32> to vector<2x32xf32>
    %198 = arith.mulf %187, %197 : vector<2x32xf32>
    %199 = arith.addf %196, %198 : vector<2x32xf32>
    %200 = math.tanh %199 : vector<2x32xf32>
    %cst_64 = arith.constant 1.000000e+00 : f32
    %201 = vector.broadcast %cst_64 : f32 to vector<2x32xf32>
    %202 = arith.subf %201, %195 : vector<2x32xf32>
    %203 = arith.mulf %202, %200 : vector<2x32xf32>
    %204 = arith.mulf %195, %171 : vector<2x32xf32>
    %205 = arith.addf %203, %204 : vector<2x32xf32>
    %cst_65 = arith.constant dense<0.000000e+00> : vector<2x96xf32>
    %206 = tpu.matmul %22, %29, %cst_65 {dimension_numbers = #tpu.dot_dimension_numbers<[1], [0], [0], [1], [0, 0, 1, 1], [], []>} : vector<2x32xf32>, vector<32x96xf32>, vector<2x96xf32> -> vector<2x96xf32>
    %207 = vector.broadcast %32 : vector<1x96xf32> to vector<2x96xf32>
    %208 = arith.addf %207, %206 : vector<2x96xf32>
    %cst_66 = arith.constant dense<0.000000e+00> : vector<2x96xf32>
    %209 = tpu.matmul %19, %30, %cst_66 {dimension_numbers = #tpu.dot_dimension_numbers<[1], [0], [0], [1], [0, 0, 1, 1], [], []>} : vector<2x8xf32>, vector<8x96xf32>, vector<2x96xf32> -> vector<2x96xf32>
    %210 = arith.addf %208, %209 : vector<2x96xf32>
    %cst_67 = arith.constant dense<0.000000e+00> : vector<2x96xf32>
    %211 = tpu.matmul %205, %31, %cst_67 {dimension_numbers = #tpu.dot_dimension_numbers<[1], [0], [0], [1], [0, 0, 1, 1], [], []>} : vector<2x32xf32>, vector<32x96xf32>, vector<2x96xf32> -> vector<2x96xf32>
    %212 = vector.broadcast %33 : vector<1x96xf32> to vector<2x96xf32>
    %213 = arith.addf %211, %212 : vector<2x96xf32>
    %214 = vector.extract_strided_slice %210 {offsets = [0, 0], sizes = [2, 32], strides = [1, 1]} : vector<2x96xf32> to vector<2x32xf32>
    %215 = vector.extract_strided_slice %213 {offsets = [0, 0], sizes = [2, 32], strides = [1, 1]} : vector<2x96xf32> to vector<2x32xf32>
    %216 = arith.addf %214, %215 : vector<2x32xf32>
    %217 = arith.negf %216 : vector<2x32xf32>
    %218 = math.exp %217 : vector<2x32xf32>
    %cst_68 = arith.constant 1.000000e+00 : f32
    %219 = vector.broadcast %cst_68 : f32 to vector<2x32xf32>
    %220 = arith.addf %219, %218 : vector<2x32xf32>
    %221 = arith.divf %219, %220 : vector<2x32xf32>
    %222 = vector.extract_strided_slice %210 {offsets = [0, 32], sizes = [2, 32], strides = [1, 1]} : vector<2x96xf32> to vector<2x32xf32>
    %223 = vector.extract_strided_slice %213 {offsets = [0, 32], sizes = [2, 32], strides = [1, 1]} : vector<2x96xf32> to vector<2x32xf32>
    %224 = arith.addf %222, %223 : vector<2x32xf32>
    %225 = arith.negf %224 : vector<2x32xf32>
    %226 = math.exp %225 : vector<2x32xf32>
    %cst_69 = arith.constant 1.000000e+00 : f32
    %227 = vector.broadcast %cst_69 : f32 to vector<2x32xf32>
    %228 = arith.addf %227, %226 : vector<2x32xf32>
    %229 = arith.divf %227, %228 : vector<2x32xf32>
    %230 = vector.extract_strided_slice %210 {offsets = [0, 64], sizes = [2, 32], strides = [1, 1]} : vector<2x96xf32> to vector<2x32xf32>
    %231 = vector.extract_strided_slice %213 {offsets = [0, 64], sizes = [2, 32], strides = [1, 1]} : vector<2x96xf32> to vector<2x32xf32>
    %232 = arith.mulf %221, %231 : vector<2x32xf32>
    %233 = arith.addf %230, %232 : vector<2x32xf32>
    %234 = math.tanh %233 : vector<2x32xf32>
    %cst_70 = arith.constant 1.000000e+00 : f32
    %235 = vector.broadcast %cst_70 : f32 to vector<2x32xf32>
    %236 = arith.subf %235, %229 : vector<2x32xf32>
    %237 = arith.mulf %236, %234 : vector<2x32xf32>
    %238 = arith.mulf %229, %205 : vector<2x32xf32>
    %239 = arith.addf %237, %238 : vector<2x32xf32>
    %cst_71 = arith.constant dense<0.000000e+00> : vector<2x96xf32>
    %240 = tpu.matmul %21, %29, %cst_71 {dimension_numbers = #tpu.dot_dimension_numbers<[1], [0], [0], [1], [0, 0, 1, 1], [], []>} : vector<2x32xf32>, vector<32x96xf32>, vector<2x96xf32> -> vector<2x96xf32>
    %241 = vector.broadcast %32 : vector<1x96xf32> to vector<2x96xf32>
    %242 = arith.addf %241, %240 : vector<2x96xf32>
    %cst_72 = arith.constant dense<0.000000e+00> : vector<2x96xf32>
    %243 = tpu.matmul %19, %30, %cst_72 {dimension_numbers = #tpu.dot_dimension_numbers<[1], [0], [0], [1], [0, 0, 1, 1], [], []>} : vector<2x8xf32>, vector<8x96xf32>, vector<2x96xf32> -> vector<2x96xf32>
    %244 = arith.addf %242, %243 : vector<2x96xf32>
    %cst_73 = arith.constant dense<0.000000e+00> : vector<2x96xf32>
    %245 = tpu.matmul %239, %31, %cst_73 {dimension_numbers = #tpu.dot_dimension_numbers<[1], [0], [0], [1], [0, 0, 1, 1], [], []>} : vector<2x32xf32>, vector<32x96xf32>, vector<2x96xf32> -> vector<2x96xf32>
    %246 = vector.broadcast %33 : vector<1x96xf32> to vector<2x96xf32>
    %247 = arith.addf %245, %246 : vector<2x96xf32>
    %248 = vector.extract_strided_slice %244 {offsets = [0, 0], sizes = [2, 32], strides = [1, 1]} : vector<2x96xf32> to vector<2x32xf32>
    %249 = vector.extract_strided_slice %247 {offsets = [0, 0], sizes = [2, 32], strides = [1, 1]} : vector<2x96xf32> to vector<2x32xf32>
    %250 = arith.addf %248, %249 : vector<2x32xf32>
    %251 = arith.negf %250 : vector<2x32xf32>
    %252 = math.exp %251 : vector<2x32xf32>
    %cst_74 = arith.constant 1.000000e+00 : f32
    %253 = vector.broadcast %cst_74 : f32 to vector<2x32xf32>
    %254 = arith.addf %253, %252 : vector<2x32xf32>
    %255 = arith.divf %253, %254 : vector<2x32xf32>
    %256 = vector.extract_strided_slice %244 {offsets = [0, 32], sizes = [2, 32], strides = [1, 1]} : vector<2x96xf32> to vector<2x32xf32>
    %257 = vector.extract_strided_slice %247 {offsets = [0, 32], sizes = [2, 32], strides = [1, 1]} : vector<2x96xf32> to vector<2x32xf32>
    %258 = arith.addf %256, %257 : vector<2x32xf32>
    %259 = arith.negf %258 : vector<2x32xf32>
    %260 = math.exp %259 : vector<2x32xf32>
    %cst_75 = arith.constant 1.000000e+00 : f32
    %261 = vector.broadcast %cst_75 : f32 to vector<2x32xf32>
    %262 = arith.addf %261, %260 : vector<2x32xf32>
    %263 = arith.divf %261, %262 : vector<2x32xf32>
    %264 = vector.extract_strided_slice %244 {offsets = [0, 64], sizes = [2, 32], strides = [1, 1]} : vector<2x96xf32> to vector<2x32xf32>
    %265 = vector.extract_strided_slice %247 {offsets = [0, 64], sizes = [2, 32], strides = [1, 1]} : vector<2x96xf32> to vector<2x32xf32>
    %266 = arith.mulf %255, %265 : vector<2x32xf32>
    %267 = arith.addf %264, %266 : vector<2x32xf32>
    %268 = math.tanh %267 : vector<2x32xf32>
    %cst_76 = arith.constant 1.000000e+00 : f32
    %269 = vector.broadcast %cst_76 : f32 to vector<2x32xf32>
    %270 = arith.subf %269, %263 : vector<2x32xf32>
    %271 = arith.mulf %270, %268 : vector<2x32xf32>
    %272 = arith.mulf %263, %239 : vector<2x32xf32>
    %273 = arith.addf %271, %272 : vector<2x32xf32>
    %cst_77 = arith.constant dense<0.000000e+00> : vector<2x96xf32>
    %274 = tpu.matmul %20, %29, %cst_77 {dimension_numbers = #tpu.dot_dimension_numbers<[1], [0], [0], [1], [0, 0, 1, 1], [], []>} : vector<2x32xf32>, vector<32x96xf32>, vector<2x96xf32> -> vector<2x96xf32>
    %275 = vector.broadcast %32 : vector<1x96xf32> to vector<2x96xf32>
    %276 = arith.addf %275, %274 : vector<2x96xf32>
    %cst_78 = arith.constant dense<0.000000e+00> : vector<2x96xf32>
    %277 = tpu.matmul %19, %30, %cst_78 {dimension_numbers = #tpu.dot_dimension_numbers<[1], [0], [0], [1], [0, 0, 1, 1], [], []>} : vector<2x8xf32>, vector<8x96xf32>, vector<2x96xf32> -> vector<2x96xf32>
    %278 = arith.addf %276, %277 : vector<2x96xf32>
    %cst_79 = arith.constant dense<0.000000e+00> : vector<2x96xf32>
    %279 = tpu.matmul %273, %31, %cst_79 {dimension_numbers = #tpu.dot_dimension_numbers<[1], [0], [0], [1], [0, 0, 1, 1], [], []>} : vector<2x32xf32>, vector<32x96xf32>, vector<2x96xf32> -> vector<2x96xf32>
    %280 = vector.broadcast %33 : vector<1x96xf32> to vector<2x96xf32>
    %281 = arith.addf %279, %280 : vector<2x96xf32>
    %282 = vector.extract_strided_slice %278 {offsets = [0, 0], sizes = [2, 32], strides = [1, 1]} : vector<2x96xf32> to vector<2x32xf32>
    %283 = vector.extract_strided_slice %281 {offsets = [0, 0], sizes = [2, 32], strides = [1, 1]} : vector<2x96xf32> to vector<2x32xf32>
    %284 = arith.addf %282, %283 : vector<2x32xf32>
    %285 = arith.negf %284 : vector<2x32xf32>
    %286 = math.exp %285 : vector<2x32xf32>
    %cst_80 = arith.constant 1.000000e+00 : f32
    %287 = vector.broadcast %cst_80 : f32 to vector<2x32xf32>
    %288 = arith.addf %287, %286 : vector<2x32xf32>
    %289 = arith.divf %287, %288 : vector<2x32xf32>
    %290 = vector.extract_strided_slice %278 {offsets = [0, 32], sizes = [2, 32], strides = [1, 1]} : vector<2x96xf32> to vector<2x32xf32>
    %291 = vector.extract_strided_slice %281 {offsets = [0, 32], sizes = [2, 32], strides = [1, 1]} : vector<2x96xf32> to vector<2x32xf32>
    %292 = arith.addf %290, %291 : vector<2x32xf32>
    %293 = arith.negf %292 : vector<2x32xf32>
    %294 = math.exp %293 : vector<2x32xf32>
    %cst_81 = arith.constant 1.000000e+00 : f32
    %295 = vector.broadcast %cst_81 : f32 to vector<2x32xf32>
    %296 = arith.addf %295, %294 : vector<2x32xf32>
    %297 = arith.divf %295, %296 : vector<2x32xf32>
    %298 = vector.extract_strided_slice %278 {offsets = [0, 64], sizes = [2, 32], strides = [1, 1]} : vector<2x96xf32> to vector<2x32xf32>
    %299 = vector.extract_strided_slice %281 {offsets = [0, 64], sizes = [2, 32], strides = [1, 1]} : vector<2x96xf32> to vector<2x32xf32>
    %300 = arith.mulf %289, %299 : vector<2x32xf32>
    %301 = arith.addf %298, %300 : vector<2x32xf32>
    %302 = math.tanh %301 : vector<2x32xf32>
    %cst_82 = arith.constant 1.000000e+00 : f32
    %303 = vector.broadcast %cst_82 : f32 to vector<2x32xf32>
    %304 = arith.subf %303, %297 : vector<2x32xf32>
    %305 = arith.mulf %304, %302 : vector<2x32xf32>
    %306 = arith.mulf %297, %273 : vector<2x32xf32>
    %307 = arith.addf %305, %306 : vector<2x32xf32>
    %c0_83 = arith.constant 0 : index
    %c0_84 = arith.constant 0 : index
    %308 = vector.load %arg15[%c0_83, %c0_84] : memref<32x8xf32, #tpu.memory_space<vmem>>, vector<32x8xf32>
    %c0_85 = arith.constant 0 : index
    %c0_86 = arith.constant 0 : index
    %309 = vector.load %arg16[%c0_85, %c0_86] : memref<32x8xf32, #tpu.memory_space<vmem>>, vector<32x8xf32>
    %c0_87 = arith.constant 0 : index
    %c0_88 = arith.constant 0 : index
    %310 = vector.load %arg17[%c0_87, %c0_88] : memref<1x8xf32, #tpu.memory_space<vmem>>, vector<1x8xf32>
    %311 = arith.cmpf one, %68, %68 : vector<2x32xf32>
    %cst_89 = arith.constant 0.000000e+00 : f32
    %312 = vector.broadcast %cst_89 : f32 to vector<2x32xf32>
    %313 = arith.select %311, %312, %68 : vector<2x32xi1>, vector<2x32xf32>
    %cst_90 = arith.constant 3.40282347E+38 : f32
    %314 = vector.broadcast %cst_90 : f32 to vector<2x32xf32>
    %315 = arith.cmpf ogt, %313, %314 : vector<2x32xf32>
    %cst_91 = arith.constant 1.000000e+00 : f32
    %316 = vector.broadcast %cst_91 : f32 to vector<2x32xf32>
    %317 = arith.select %315, %316, %313 : vector<2x32xi1>, vector<2x32xf32>
    %cst_92 = arith.constant -3.40282347E+38 : f32
    %318 = vector.broadcast %cst_92 : f32 to vector<2x32xf32>
    %319 = arith.cmpf olt, %317, %318 : vector<2x32xf32>
    %cst_93 = arith.constant -1.000000e+00 : f32
    %320 = vector.broadcast %cst_93 : f32 to vector<2x32xf32>
    %321 = arith.select %319, %320, %317 : vector<2x32xi1>, vector<2x32xf32>
    %322 = arith.cmpf one, %307, %307 : vector<2x32xf32>
    %cst_94 = arith.constant 0.000000e+00 : f32
    %323 = vector.broadcast %cst_94 : f32 to vector<2x32xf32>
    %324 = arith.select %322, %323, %307 : vector<2x32xi1>, vector<2x32xf32>
    %cst_95 = arith.constant 3.40282347E+38 : f32
    %325 = vector.broadcast %cst_95 : f32 to vector<2x32xf32>
    %326 = arith.cmpf ogt, %324, %325 : vector<2x32xf32>
    %cst_96 = arith.constant 1.000000e+00 : f32
    %327 = vector.broadcast %cst_96 : f32 to vector<2x32xf32>
    %328 = arith.select %326, %327, %324 : vector<2x32xi1>, vector<2x32xf32>
    %cst_97 = arith.constant -3.40282347E+38 : f32
    %329 = vector.broadcast %cst_97 : f32 to vector<2x32xf32>
    %330 = arith.cmpf olt, %328, %329 : vector<2x32xf32>
    %cst_98 = arith.constant -1.000000e+00 : f32
    %331 = vector.broadcast %cst_98 : f32 to vector<2x32xf32>
    %332 = arith.select %330, %331, %328 : vector<2x32xi1>, vector<2x32xf32>
    %cst_99 = arith.constant dense<0.000000e+00> : vector<2x8xf32>
    %333 = tpu.matmul %321, %308, %cst_99 {dimension_numbers = #tpu.dot_dimension_numbers<[1], [0], [0], [1], [0, 0, 1, 1], [], []>} : vector<2x32xf32>, vector<32x8xf32>, vector<2x8xf32> -> vector<2x8xf32>
    %cst_100 = arith.constant dense<0.000000e+00> : vector<2x8xf32>
    %334 = tpu.matmul %332, %309, %cst_100 {dimension_numbers = #tpu.dot_dimension_numbers<[1], [0], [0], [1], [0, 0, 1, 1], [], []>} : vector<2x32xf32>, vector<32x8xf32>, vector<2x8xf32> -> vector<2x8xf32>
    %335 = arith.addf %333, %334 : vector<2x8xf32>
    %336 = vector.broadcast %310 : vector<1x8xf32> to vector<2x8xf32>
    %337 = arith.addf %335, %336 : vector<2x8xf32>
    %338 = arith.cmpf one, %337, %337 : vector<2x8xf32>
    %cst_101 = arith.constant 0.000000e+00 : f32
    %339 = vector.broadcast %cst_101 : f32 to vector<2x8xf32>
    %340 = arith.select %338, %339, %337 : vector<2x8xi1>, vector<2x8xf32>
    %cst_102 = arith.constant 3.40282347E+38 : f32
    %341 = vector.broadcast %cst_102 : f32 to vector<2x8xf32>
    %342 = arith.cmpf ogt, %340, %341 : vector<2x8xf32>
    %cst_103 = arith.constant 1.000000e+00 : f32
    %343 = vector.broadcast %cst_103 : f32 to vector<2x8xf32>
    %344 = arith.select %342, %343, %340 : vector<2x8xi1>, vector<2x8xf32>
    %cst_104 = arith.constant -3.40282347E+38 : f32
    %345 = vector.broadcast %cst_104 : f32 to vector<2x8xf32>
    %346 = arith.cmpf olt, %344, %345 : vector<2x8xf32>
    %cst_105 = arith.constant -1.000000e+00 : f32
    %347 = vector.broadcast %cst_105 : f32 to vector<2x8xf32>
    %348 = arith.select %346, %347, %344 : vector<2x8xi1>, vector<2x8xf32>
    %c0_106 = arith.constant 0 : index
    %c0_107 = arith.constant 0 : index
    %349 = vector.load %arg18[%c0_106, %c0_107] : memref<8x8xf32, #tpu.memory_space<vmem>>, vector<2x8xf32>
    tpu.vector_store %arg18[%c0_106, %c0_107], %348 {strides = array<i32>} : memref<8x8xf32, #tpu.memory_space<vmem>>, vector<2x8xf32>,
    %350 = arith.cmpf one, %102, %102 : vector<2x32xf32>
    %cst_108 = arith.constant 0.000000e+00 : f32
    %351 = vector.broadcast %cst_108 : f32 to vector<2x32xf32>
    %352 = arith.select %350, %351, %102 : vector<2x32xi1>, vector<2x32xf32>
    %cst_109 = arith.constant 3.40282347E+38 : f32
    %353 = vector.broadcast %cst_109 : f32 to vector<2x32xf32>
    %354 = arith.cmpf ogt, %352, %353 : vector<2x32xf32>
    %cst_110 = arith.constant 1.000000e+00 : f32
    %355 = vector.broadcast %cst_110 : f32 to vector<2x32xf32>
    %356 = arith.select %354, %355, %352 : vector<2x32xi1>, vector<2x32xf32>
    %cst_111 = arith.constant -3.40282347E+38 : f32
    %357 = vector.broadcast %cst_111 : f32 to vector<2x32xf32>
    %358 = arith.cmpf olt, %356, %357 : vector<2x32xf32>
    %cst_112 = arith.constant -1.000000e+00 : f32
    %359 = vector.broadcast %cst_112 : f32 to vector<2x32xf32>
    %360 = arith.select %358, %359, %356 : vector<2x32xi1>, vector<2x32xf32>
    %361 = arith.cmpf one, %273, %273 : vector<2x32xf32>
    %cst_113 = arith.constant 0.000000e+00 : f32
    %362 = vector.broadcast %cst_113 : f32 to vector<2x32xf32>
    %363 = arith.select %361, %362, %273 : vector<2x32xi1>, vector<2x32xf32>
    %cst_114 = arith.constant 3.40282347E+38 : f32
    %364 = vector.broadcast %cst_114 : f32 to vector<2x32xf32>
    %365 = arith.cmpf ogt, %363, %364 : vector<2x32xf32>
    %cst_115 = arith.constant 1.000000e+00 : f32
    %366 = vector.broadcast %cst_115 : f32 to vector<2x32xf32>
    %367 = arith.select %365, %366, %363 : vector<2x32xi1>, vector<2x32xf32>
    %cst_116 = arith.constant -3.40282347E+38 : f32
    %368 = vector.broadcast %cst_116 : f32 to vector<2x32xf32>
    %369 = arith.cmpf olt, %367, %368 : vector<2x32xf32>
    %cst_117 = arith.constant -1.000000e+00 : f32
    %370 = vector.broadcast %cst_117 : f32 to vector<2x32xf32>
    %371 = arith.select %369, %370, %367 : vector<2x32xi1>, vector<2x32xf32>
    %cst_118 = arith.constant dense<0.000000e+00> : vector<2x8xf32>
    %372 = tpu.matmul %360, %308, %cst_118 {dimension_numbers = #tpu.dot_dimension_numbers<[1], [0], [0], [1], [0, 0, 1, 1], [], []>} : vector<2x32xf32>, vector<32x8xf32>, vector<2x8xf32> -> vector<2x8xf32>
    %cst_119 = arith.constant dense<0.000000e+00> : vector<2x8xf32>
    %373 = tpu.matmul %371, %309, %cst_119 {dimension_numbers = #tpu.dot_dimension_numbers<[1], [0], [0], [1], [0, 0, 1, 1], [], []>} : vector<2x32xf32>, vector<32x8xf32>, vector<2x8xf32> -> vector<2x8xf32>
    %374 = arith.addf %372, %373 : vector<2x8xf32>
    %375 = vector.broadcast %310 : vector<1x8xf32> to vector<2x8xf32>
    %376 = arith.addf %374, %375 : vector<2x8xf32>
    %377 = arith.cmpf one, %376, %376 : vector<2x8xf32>
    %cst_120 = arith.constant 0.000000e+00 : f32
    %378 = vector.broadcast %cst_120 : f32 to vector<2x8xf32>
    %379 = arith.select %377, %378, %376 : vector<2x8xi1>, vector<2x8xf32>
    %cst_121 = arith.constant 3.40282347E+38 : f32
    %380 = vector.broadcast %cst_121 : f32 to vector<2x8xf32>
    %381 = arith.cmpf ogt, %379, %380 : vector<2x8xf32>
    %cst_122 = arith.constant 1.000000e+00 : f32
    %382 = vector.broadcast %cst_122 : f32 to vector<2x8xf32>
    %383 = arith.select %381, %382, %379 : vector<2x8xi1>, vector<2x8xf32>
    %cst_123 = arith.constant -3.40282347E+38 : f32
    %384 = vector.broadcast %cst_123 : f32 to vector<2x8xf32>
    %385 = arith.cmpf olt, %383, %384 : vector<2x8xf32>
    %cst_124 = arith.constant -1.000000e+00 : f32
    %386 = vector.broadcast %cst_124 : f32 to vector<2x8xf32>
    %387 = arith.select %385, %386, %383 : vector<2x8xi1>, vector<2x8xf32>
    %c2 = arith.constant 2 : index
    %c0_125 = arith.constant 0 : index
    %388 = vector.load %arg18[%c2, %c0_125] : memref<8x8xf32, #tpu.memory_space<vmem>>, vector<2x8xf32>
    tpu.vector_store %arg18[%c2, %c0_125], %387 {strides = array<i32>} : memref<8x8xf32, #tpu.memory_space<vmem>>, vector<2x8xf32>,
    %389 = arith.cmpf one, %136, %136 : vector<2x32xf32>
    %cst_126 = arith.constant 0.000000e+00 : f32
    %390 = vector.broadcast %cst_126 : f32 to vector<2x32xf32>
    %391 = arith.select %389, %390, %136 : vector<2x32xi1>, vector<2x32xf32>
    %cst_127 = arith.constant 3.40282347E+38 : f32
    %392 = vector.broadcast %cst_127 : f32 to vector<2x32xf32>
    %393 = arith.cmpf ogt, %391, %392 : vector<2x32xf32>
    %cst_128 = arith.constant 1.000000e+00 : f32
    %394 = vector.broadcast %cst_128 : f32 to vector<2x32xf32>
    %395 = arith.select %393, %394, %391 : vector<2x32xi1>, vector<2x32xf32>
    %cst_129 = arith.constant -3.40282347E+38 : f32
    %396 = vector.broadcast %cst_129 : f32 to vector<2x32xf32>
    %397 = arith.cmpf olt, %395, %396 : vector<2x32xf32>
    %cst_130 = arith.constant -1.000000e+00 : f32
    %398 = vector.broadcast %cst_130 : f32 to vector<2x32xf32>
    %399 = arith.select %397, %398, %395 : vector<2x32xi1>, vector<2x32xf32>
    %400 = arith.cmpf one, %239, %239 : vector<2x32xf32>
    %cst_131 = arith.constant 0.000000e+00 : f32
    %401 = vector.broadcast %cst_131 : f32 to vector<2x32xf32>
    %402 = arith.select %400, %401, %239 : vector<2x32xi1>, vector<2x32xf32>
    %cst_132 = arith.constant 3.40282347E+38 : f32
    %403 = vector.broadcast %cst_132 : f32 to vector<2x32xf32>
    %404 = arith.cmpf ogt, %402, %403 : vector<2x32xf32>
    %cst_133 = arith.constant 1.000000e+00 : f32
    %405 = vector.broadcast %cst_133 : f32 to vector<2x32xf32>
    %406 = arith.select %404, %405, %402 : vector<2x32xi1>, vector<2x32xf32>
    %cst_134 = arith.constant -3.40282347E+38 : f32
    %407 = vector.broadcast %cst_134 : f32 to vector<2x32xf32>
    %408 = arith.cmpf olt, %406, %407 : vector<2x32xf32>
    %cst_135 = arith.constant -1.000000e+00 : f32
    %409 = vector.broadcast %cst_135 : f32 to vector<2x32xf32>
    %410 = arith.select %408, %409, %406 : vector<2x32xi1>, vector<2x32xf32>
    %cst_136 = arith.constant dense<0.000000e+00> : vector<2x8xf32>
    %411 = tpu.matmul %399, %308, %cst_136 {dimension_numbers = #tpu.dot_dimension_numbers<[1], [0], [0], [1], [0, 0, 1, 1], [], []>} : vector<2x32xf32>, vector<32x8xf32>, vector<2x8xf32> -> vector<2x8xf32>
    %cst_137 = arith.constant dense<0.000000e+00> : vector<2x8xf32>
    %412 = tpu.matmul %410, %309, %cst_137 {dimension_numbers = #tpu.dot_dimension_numbers<[1], [0], [0], [1], [0, 0, 1, 1], [], []>} : vector<2x32xf32>, vector<32x8xf32>, vector<2x8xf32> -> vector<2x8xf32>
    %413 = arith.addf %411, %412 : vector<2x8xf32>
    %414 = vector.broadcast %310 : vector<1x8xf32> to vector<2x8xf32>
    %415 = arith.addf %413, %414 : vector<2x8xf32>
    %416 = arith.cmpf one, %415, %415 : vector<2x8xf32>
    %cst_138 = arith.constant 0.000000e+00 : f32
    %417 = vector.broadcast %cst_138 : f32 to vector<2x8xf32>
    %418 = arith.select %416, %417, %415 : vector<2x8xi1>, vector<2x8xf32>
    %cst_139 = arith.constant 3.40282347E+38 : f32
    %419 = vector.broadcast %cst_139 : f32 to vector<2x8xf32>
    %420 = arith.cmpf ogt, %418, %419 : vector<2x8xf32>
    %cst_140 = arith.constant 1.000000e+00 : f32
    %421 = vector.broadcast %cst_140 : f32 to vector<2x8xf32>
    %422 = arith.select %420, %421, %418 : vector<2x8xi1>, vector<2x8xf32>
    %cst_141 = arith.constant -3.40282347E+38 : f32
    %423 = vector.broadcast %cst_141 : f32 to vector<2x8xf32>
    %424 = arith.cmpf olt, %422, %423 : vector<2x8xf32>
    %cst_142 = arith.constant -1.000000e+00 : f32
    %425 = vector.broadcast %cst_142 : f32 to vector<2x8xf32>
    %426 = arith.select %424, %425, %422 : vector<2x8xi1>, vector<2x8xf32>
    %c4 = arith.constant 4 : index
    %c0_143 = arith.constant 0 : index
    %427 = vector.load %arg18[%c4, %c0_143] : memref<8x8xf32, #tpu.memory_space<vmem>>, vector<2x8xf32>
    tpu.vector_store %arg18[%c4, %c0_143], %426 {strides = array<i32>} : memref<8x8xf32, #tpu.memory_space<vmem>>, vector<2x8xf32>,
    %428 = arith.cmpf one, %170, %170 : vector<2x32xf32>
    %cst_144 = arith.constant 0.000000e+00 : f32
    %429 = vector.broadcast %cst_144 : f32 to vector<2x32xf32>
    %430 = arith.select %428, %429, %170 : vector<2x32xi1>, vector<2x32xf32>
    %cst_145 = arith.constant 3.40282347E+38 : f32
    %431 = vector.broadcast %cst_145 : f32 to vector<2x32xf32>
    %432 = arith.cmpf ogt, %430, %431 : vector<2x32xf32>
    %cst_146 = arith.constant 1.000000e+00 : f32
    %433 = vector.broadcast %cst_146 : f32 to vector<2x32xf32>
    %434 = arith.select %432, %433, %430 : vector<2x32xi1>, vector<2x32xf32>
    %cst_147 = arith.constant -3.40282347E+38 : f32
    %435 = vector.broadcast %cst_147 : f32 to vector<2x32xf32>
    %436 = arith.cmpf olt, %434, %435 : vector<2x32xf32>
    %cst_148 = arith.constant -1.000000e+00 : f32
    %437 = vector.broadcast %cst_148 : f32 to vector<2x32xf32>
    %438 = arith.select %436, %437, %434 : vector<2x32xi1>, vector<2x32xf32>
    %439 = arith.cmpf one, %205, %205 : vector<2x32xf32>
    %cst_149 = arith.constant 0.000000e+00 : f32
    %440 = vector.broadcast %cst_149 : f32 to vector<2x32xf32>
    %441 = arith.select %439, %440, %205 : vector<2x32xi1>, vector<2x32xf32>
    %cst_150 = arith.constant 3.40282347E+38 : f32
    %442 = vector.broadcast %cst_150 : f32 to vector<2x32xf32>
    %443 = arith.cmpf ogt, %441, %442 : vector<2x32xf32>
    %cst_151 = arith.constant 1.000000e+00 : f32
    %444 = vector.broadcast %cst_151 : f32 to vector<2x32xf32>
    %445 = arith.select %443, %444, %441 : vector<2x32xi1>, vector<2x32xf32>
    %cst_152 = arith.constant -3.40282347E+38 : f32
    %446 = vector.broadcast %cst_152 : f32 to vector<2x32xf32>
    %447 = arith.cmpf olt, %445, %446 : vector<2x32xf32>
    %cst_153 = arith.constant -1.000000e+00 : f32
    %448 = vector.broadcast %cst_153 : f32 to vector<2x32xf32>
    %449 = arith.select %447, %448, %445 : vector<2x32xi1>, vector<2x32xf32>
    %cst_154 = arith.constant dense<0.000000e+00> : vector<2x8xf32>
    %450 = tpu.matmul %438, %308, %cst_154 {dimension_numbers = #tpu.dot_dimension_numbers<[1], [0], [0], [1], [0, 0, 1, 1], [], []>} : vector<2x32xf32>, vector<32x8xf32>, vector<2x8xf32> -> vector<2x8xf32>
    %cst_155 = arith.constant dense<0.000000e+00> : vector<2x8xf32>
    %451 = tpu.matmul %449, %309, %cst_155 {dimension_numbers = #tpu.dot_dimension_numbers<[1], [0], [0], [1], [0, 0, 1, 1], [], []>} : vector<2x32xf32>, vector<32x8xf32>, vector<2x8xf32> -> vector<2x8xf32>
    %452 = arith.addf %450, %451 : vector<2x8xf32>
    %453 = vector.broadcast %310 : vector<1x8xf32> to vector<2x8xf32>
    %454 = arith.addf %452, %453 : vector<2x8xf32>
    %455 = arith.cmpf one, %454, %454 : vector<2x8xf32>
    %cst_156 = arith.constant 0.000000e+00 : f32
    %456 = vector.broadcast %cst_156 : f32 to vector<2x8xf32>
    %457 = arith.select %455, %456, %454 : vector<2x8xi1>, vector<2x8xf32>
    %cst_157 = arith.constant 3.40282347E+38 : f32
    %458 = vector.broadcast %cst_157 : f32 to vector<2x8xf32>
    %459 = arith.cmpf ogt, %457, %458 : vector<2x8xf32>
    %cst_158 = arith.constant 1.000000e+00 : f32
    %460 = vector.broadcast %cst_158 : f32 to vector<2x8xf32>
    %461 = arith.select %459, %460, %457 : vector<2x8xi1>, vector<2x8xf32>
    %cst_159 = arith.constant -3.40282347E+38 : f32
    %462 = vector.broadcast %cst_159 : f32 to vector<2x8xf32>
    %463 = arith.cmpf olt, %461, %462 : vector<2x8xf32>
    %cst_160 = arith.constant -1.000000e+00 : f32
    %464 = vector.broadcast %cst_160 : f32 to vector<2x8xf32>
    %465 = arith.select %463, %464, %461 : vector<2x8xi1>, vector<2x8xf32>
    %c6 = arith.constant 6 : index
    %c0_161 = arith.constant 0 : index
    %466 = vector.load %arg18[%c6, %c0_161] : memref<8x8xf32, #tpu.memory_space<vmem>>, vector<2x8xf32>
    tpu.vector_store %arg18[%c6, %c0_161], %465 {strides = array<i32>} : memref<8x8xf32, #tpu.memory_space<vmem>>, vector<2x8xf32>,
    return
  }
  func.func @transform_0(%arg0: i32) -> (i32, i32) {
    %c0_i32 = arith.constant 0 : i32
    %c0_i32_0 = arith.constant 0 : i32
    %c0_i32_1 = arith.constant 0 : i32
    return %c0_i32, %c0_i32_0 : i32, i32
  }
  func.func @transform_1(%arg0: i32) -> (i32, i32) {
    %c0_i32 = arith.constant 0 : i32
    %c0_i32_0 = arith.constant 0 : i32
    %c0_i32_1 = arith.constant 0 : i32
    return %c0_i32, %c0_i32_0 : i32, i32
  }
  func.func @transform_2(%arg0: i32) -> (i32, i32) {
    %c0_i32 = arith.constant 0 : i32
    %c0_i32_0 = arith.constant 0 : i32
    %c0_i32_1 = arith.constant 0 : i32
    return %c0_i32, %c0_i32_0 : i32, i32
  }
  func.func @transform_3(%arg0: i32) -> (i32, i32) {
    %c0_i32 = arith.constant 0 : i32
    %c0_i32_0 = arith.constant 0 : i32
    %c0_i32_1 = arith.constant 0 : i32
    return %c0_i32, %c0_i32_0 : i32, i32
  }
  func.func @transform_4(%arg0: i32) -> (i32, i32) {
    %c0_i32 = arith.constant 0 : i32
    %c0_i32_0 = arith.constant 0 : i32
    %c0_i32_1 = arith.constant 0 : i32
    return %c0_i32, %c0_i32_0 : i32, i32
  }
  func.func @transform_5(%arg0: i32) -> (i32, i32) {
    %c0_i32 = arith.constant 0 : i32
    %c0_i32_0 = arith.constant 0 : i32
    %c0_i32_1 = arith.constant 0 : i32
    return %c0_i32, %c0_i32_0 : i32, i32
  }
  func.func @transform_6(%arg0: i32) -> (i32, i32) {
    %c0_i32 = arith.constant 0 : i32
    %c0_i32_0 = arith.constant 0 : i32
    %c0_i32_1 = arith.constant 0 : i32
    return %c0_i32, %c0_i32_0 : i32, i32
  }
  func.func @transform_7(%arg0: i32) -> (i32, i32) {
    %c0_i32 = arith.constant 0 : i32
    %c0_i32_0 = arith.constant 0 : i32
    %c0_i32_1 = arith.constant 0 : i32
    return %c0_i32, %c0_i32_0 : i32, i32
  }
  func.func @transform_8(%arg0: i32) -> (i32, i32) {
    %c0_i32 = arith.constant 0 : i32
    %c0_i32_0 = arith.constant 0 : i32
    %c0_i32_1 = arith.constant 0 : i32
    return %c0_i32, %c0_i32_0 : i32, i32
  }
  func.func @transform_9(%arg0: i32) -> (i32, i32) {
    %c0_i32 = arith.constant 0 : i32
    %c0_i32_0 = arith.constant 0 : i32
    %c0_i32_1 = arith.constant 0 : i32
    return %c0_i32, %c0_i32_0 : i32, i32
  }
  func.func @transform_10(%arg0: i32) -> (i32, i32) {
    %c0_i32 = arith.constant 0 : i32
    %c0_i32_0 = arith.constant 0 : i32
    %c0_i32_1 = arith.constant 0 : i32
    return %c0_i32, %c0_i32_0 : i32, i32
  }
  func.func @transform_11(%arg0: i32) -> (i32, i32) {
    %c0_i32 = arith.constant 0 : i32
    %c0_i32_0 = arith.constant 0 : i32
    %c0_i32_1 = arith.constant 0 : i32
    return %c0_i32, %c0_i32_0 : i32, i32
  }
  func.func @transform_12(%arg0: i32) -> (i32, i32) {
    %c0_i32 = arith.constant 0 : i32
    %c0_i32_0 = arith.constant 0 : i32
    %c0_i32_1 = arith.constant 0 : i32
    return %c0_i32, %c0_i32_0 : i32, i32
  }
  func.func @transform_13(%arg0: i32) -> (i32, i32) {
    %c0_i32 = arith.constant 0 : i32
    %c0_i32_0 = arith.constant 0 : i32
    %c0_i32_1 = arith.constant 0 : i32
    return %c0_i32, %c0_i32_0 : i32, i32
  }
  func.func @transform_14(%arg0: i32) -> (i32, i32) {
    %c0_i32 = arith.constant 0 : i32
    %c0_i32_0 = arith.constant 0 : i32
    %c0_i32_1 = arith.constant 0 : i32
    return %c0_i32, %c0_i32_0 : i32, i32
  }
  func.func @transform_15(%arg0: i32) -> (i32, i32) {
    %c0_i32 = arith.constant 0 : i32
    %c0_i32_0 = arith.constant 0 : i32
    %c0_i32_1 = arith.constant 0 : i32
    return %c0_i32, %c0_i32_0 : i32, i32
  }
  func.func @transform_16(%arg0: i32) -> (i32, i32) {
    %c0_i32 = arith.constant 0 : i32
    %c0_i32_0 = arith.constant 0 : i32
    %c0_i32_1 = arith.constant 0 : i32
    return %c0_i32, %c0_i32_0 : i32, i32
  }
  func.func @transform_17(%arg0: i32) -> (i32, i32) {
    %c0_i32 = arith.constant 0 : i32
    %c0_i32_0 = arith.constant 0 : i32
    %c0_i32_1 = arith.constant 0 : i32
    return %c0_i32, %c0_i32_0 : i32, i32
  }
}

</mosaic_0001>

<bundles_post_ra>
// kernel: _lambda_.4
= control target key start
LH: loop header
LB: loop body
LE: loop exit
PB: predicated region body
PF: predicated region fallthrough
CT: control target
= control target key end

     0   :  { %v4884_v1 = vmov 0   ;;  %vm1822_vm0 = vcmask 392192   ;;  %s6370_s1 = inlined_call_operand.vmem [shape: bf16[48,12800], index: 1, kind: input, shape index: {}]   ;;  %s6371_s0 = inlined_call_operand.vmem [shape: bf16[8,48], index: 0, kind: input, shape index: {}]   ;;  %s6372_s2 = inlined_call_operand.vmem [shape: f32[8,1], index: 2, kind: input, shape index: {}]   ;;  %s6373_s3 = inlined_call_operand.vmem [shape: f32[8,12800], index: 3, kind: output, shape index: {}]  }
   0x1   :  { %v4432_v0 = vld [vmem:[%s6370_s1 + $0x4] ss:$400 sps:$4 sm:$0xff]   ;;  %1858 = vmatprep.mubr.bf16.mxu0 %v4884_v1  ;;  %1899 = vmatprep.mubr.bf16.mxu1 %v4884_v1  ;;  %v4434_v2 = vld [vmem:[%s6370_s1 + $0xc] ss:$400 sps:$4 sm:$0xff]   ;;  %v4436_v3 = vld [vmem:[%s6370_s1] ss:$400 sps:$4 sm:$0xff]  }
   0x2   :  { %4431 = vset.pattern.permute.xlu0 %v4884_v1  ;;  %1826 = vmatprep.subr.bf16.mxu0 %v4432_v0  ;;  %v4437_v4 = vld [vmem:[%s6370_s1 + $0x8] ss:$400 sps:$4 sm:$0xff]   ;;  %v4438_v5 = vld [vmem:[%s6370_s1 + $0x324] ss:$400 sps:$4 sm:$0xff]   ;;  %v4440_v6 = vld [vmem:[%s6370_s1 + $0x32c] ss:$400 sps:$4 sm:$0xff]  }
   0x3   :  { %1867 = vmatprep.subr.bf16.mxu1 %v4434_v2  ;;  %1827 = vmatpush1.bf16.msra.mxu0 %v4436_v3  ;;  %v4442_v7 = vld [vmem:[%s6370_s1 + $0x320] ss:$400 sps:$4 sm:$0xff]   ;;  %v4443_v8 = vld [vmem:[%s6370_s1 + $0x328] ss:$400 sps:$4 sm:$0xff]   ;;  %v4444_v9 = vld [vmem:[%s6370_s1 + $0x644] ss:$400 sps:$4 sm:$0xff]  }
   0x4   :  { %1868 = vmatpush1.bf16.msra.mxu1 %v4437_v4  ;;  %1828 = vmatprep.subr.bf16.mxu0 %v4438_v5  ;;  %v4446_v10 = vld [vmem:[%s6370_s1 + $0x64c] ss:$400 sps:$4 sm:$0xff]   ;;  %v4448_v11 = vld [vmem:[%s6370_s1 + $0x640] ss:$400 sps:$4 sm:$0xff]   ;;  %v4449_v12 = vld [vmem:[%s6370_s1 + $0x648] ss:$400 sps:$4 sm:$0xff]  }
   0x5   :  { %1869 = vmatprep.subr.bf16.mxu1 %v4440_v6  ;;  %v4452_v13 = vld [vmem:[%s6370_s1 + $0x14] ss:$400 sps:$4 sm:$0xff]   ;;  %v4950_v14 = vld [vmem:[%s6371_s0] sm:$0xf]  ;;  %v4455_v15 = vld [vmem:[%s6370_s1 + $0x1c] ss:$400 sps:$4 sm:$0xff]  }
   0x6   :  { %v4450_v16 = vld [vmem:[%s6370_s1 + $0x10] ss:$400 sps:$4 sm:$0xff]   ;;  %v4453_v17 = vld [vmem:[%s6370_s1 + $0x18] ss:$400 sps:$4 sm:$0xff]   ;;  %v4458_v18 = vld [vmem:[%s6370_s1 + $0x334] ss:$400 sps:$4 sm:$0xff]  }
   0x7   :  { %1829 = vmatpush1.bf16.msra.mxu0 %v4442_v7  ;;  %v4461_v19 = vld [vmem:[%s6370_s1 + $0x33c] ss:$400 sps:$4 sm:$0xff]   ;;  %v4456_v20 = vld [vmem:[%s6370_s1 + $0x330] ss:$400 sps:$4 sm:$0xff]   ;;  %v4459_v21 = vld [vmem:[%s6370_s1 + $0x338] ss:$400 sps:$4 sm:$0xff]  }
   0x8   :  { %1870 = vmatpush1.bf16.msra.mxu1 %v4443_v8  ;;  %1830 = vmatprep.subr.bf16.mxu0 %v4444_v9  ;;  %v4464_v22 = vld [vmem:[%s6370_s1 + $0x654] ss:$400 sps:$4 sm:$0xff]   ;;  %v4467_v23 = vld [vmem:[%s6370_s1 + $0x65c] ss:$400 sps:$4 sm:$0xff]   ;;  %v4462_v24 = vld [vmem:[%s6370_s1 + $0x650] ss:$400 sps:$4 sm:$0xff]  }
   0x9   :  { %1871 = vmatprep.subr.bf16.mxu1 %v4446_v10  ;;  %v4465_v25 = vld [vmem:[%s6370_s1 + $0x658] ss:$400 sps:$4 sm:$0xff]   ;;  %v4470_v26 = vld [vmem:[%s6370_s1 + $0x24] ss:$400 sps:$4 sm:$0xff]   ;;  %v4473_v27 = vld [vmem:[%s6370_s1 + $0x2c] ss:$400 sps:$4 sm:$0xff]  }
   0xa   :  { %v4468_v28 = vld [vmem:[%s6370_s1 + $0x20] ss:$400 sps:$4 sm:$0xff]   ;;  %v4471_v29 = vld [vmem:[%s6370_s1 + $0x28] ss:$400 sps:$4 sm:$0xff]   ;;  %v4476_v30 = vld [vmem:[%s6370_s1 + $0x344] ss:$400 sps:$4 sm:$0xff]  }
   0xb   :  { %1831 = vmatpush1.bf16.msra.mxu0 %v4448_v11  ;;  %v4479_v31 = vld [vmem:[%s6370_s1 + $0x34c] ss:$400 sps:$4 sm:$0xff]   ;;  %v4474_v32 = vld [vmem:[%s6370_s1 + $0x340] ss:$400 sps:$4 sm:$0xff]   ;;  %v4477_v33 = vld [vmem:[%s6370_s1 + $0x348] ss:$400 sps:$4 sm:$0xff]  }
   0xc   :  { %1872 = vmatpush1.bf16.msra.mxu1 %v4449_v12  ;;  %1908 = vmatprep.subr.bf16.mxu0 %v4452_v13  ;;  %v4482_v34 = vld [vmem:[%s6370_s1 + $0x664] ss:$400 sps:$4 sm:$0xff]   ;;  %v4485_v35 = vld [vmem:[%s6370_s1 + $0x66c] ss:$400 sps:$4 sm:$0xff]   ;;  %v4480_v36 = vld [vmem:[%s6370_s1 + $0x660] ss:$400 sps:$4 sm:$0xff]  }
   0xd   :  { %1949 = vmatprep.subr.bf16.mxu1 %v4455_v15  ;;  %v4483_v37 = vld [vmem:[%s6370_s1 + $0x668] ss:$400 sps:$4 sm:$0xff]   ;;  %v4488_v38 = vld [vmem:[%s6370_s1 + $0x34] ss:$400 sps:$4 sm:$0xff]   ;;  %v4491_v39 = vld [vmem:[%s6370_s1 + $0x3c] ss:$400 sps:$4 sm:$0xff]  }
   0xe   :  { %4380 = vmatmul.mubr.msk.bf16.vlgmr.msra.gmra.mrb[0].mxu0 %vm1822_vm0, %v4950_v14  ;;  %v4486_v40 = vld [vmem:[%s6370_s1 + $0x30] ss:$400 sps:$4 sm:$0xff]   ;;  %v4489_v41 = vld [vmem:[%s6370_s1 + $0x38] ss:$400 sps:$4 sm:$0xff]   ;;  %v4494_v42 = vld [vmem:[%s6370_s1 + $0x354] ss:$400 sps:$4 sm:$0xff]  }
   0xf   :  { %4381 = vmatmul.mubr.msk.bf16.vlgmr.msra.gmra.mrb[0].mxu1 %vm1822_vm0, %v4950_v14  ;;  %1909 = vmatpush1.bf16.msra.mxu0 %v4450_v16  ;;  %v4497_v43 = vld [vmem:[%s6370_s1 + $0x35c] ss:$400 sps:$4 sm:$0xff]   ;;  %v4492_v44 = vld [vmem:[%s6370_s1 + $0x350] ss:$400 sps:$4 sm:$0xff]   ;;  %v4495_v45 = vld [vmem:[%s6370_s1 + $0x358] ss:$400 sps:$4 sm:$0xff]  }
  0x10   :  { %1950 = vmatpush1.bf16.msra.mxu1 %v4453_v17  ;;  %1910 = vmatprep.subr.bf16.mxu0 %v4458_v18  ;;  %v4500_v46 = vld [vmem:[%s6370_s1 + $0x674] ss:$400 sps:$4 sm:$0xff]   ;;  %v4503_v47 = vld [vmem:[%s6370_s1 + $0x67c] ss:$400 sps:$4 sm:$0xff]   ;;  %v4498_v48 = vld [vmem:[%s6370_s1 + $0x670] ss:$400 sps:$4 sm:$0xff]  }
  0x11   :  { %1951 = vmatprep.subr.bf16.mxu1 %v4461_v19  ;;  %1940 = vmatprep.mubr.bf16.mxu0 %v4884_v1  ;;  %v4501_v49 = vld [vmem:[%s6370_s1 + $0x678] ss:$400 sps:$4 sm:$0xff]   ;;  %v4506_v50 = vld [vmem:[%s6370_s1 + $0x44] ss:$400 sps:$4 sm:$0xff]   ;;  %v4509_v51 = vld [vmem:[%s6370_s1 + $0x4c] ss:$400 sps:$4 sm:$0xff]  }
  0x12   :  { %1981 = vmatprep.mubr.bf16.mxu1 %v4884_v1  ;;  %v4504_v52 = vld [vmem:[%s6370_s1 + $0x40] ss:$400 sps:$4 sm:$0xff]   ;;  %v4507_v53 = vld [vmem:[%s6370_s1 + $0x48] ss:$400 sps:$4 sm:$0xff]   ;;  %v4512_v54 = vld [vmem:[%s6370_s1 + $0x364] ss:$400 sps:$4 sm:$0xff]  }
  0x13   :  { %1911 = vmatpush1.bf16.msra.mxu0 %v4456_v20  ;;  %v4515_v55 = vld [vmem:[%s6370_s1 + $0x36c] ss:$400 sps:$4 sm:$0xff]   ;;  %v4510_v56 = vld [vmem:[%s6370_s1 + $0x360] ss:$400 sps:$4 sm:$0xff]   ;;  %v4513_v57 = vld [vmem:[%s6370_s1 + $0x368] ss:$400 sps:$4 sm:$0xff]  }
  0x14   :  { %1952 = vmatpush1.bf16.msra.mxu1 %v4459_v21  ;;  %1912 = vmatprep.subr.bf16.mxu0 %v4464_v22  ;;  %v4518_v58 = vld [vmem:[%s6370_s1 + $0x684] ss:$400 sps:$4 sm:$0xff]   ;;  %v4521_v59 = vld [vmem:[%s6370_s1 + $0x68c] ss:$400 sps:$4 sm:$0xff]   ;;  %v4516_v60 = vld [vmem:[%s6370_s1 + $0x680] ss:$400 sps:$4 sm:$0xff]  }
  0x15   :  { %1953 = vmatprep.subr.bf16.mxu1 %v4467_v23  ;;  %v4519_v61 = vld [vmem:[%s6370_s1 + $0x688] ss:$400 sps:$4 sm:$0xff]   ;;  %v4524_v62 = vld [vmem:[%s6370_s1 + $0x54] ss:$400 sps:$4 sm:$0xff]   ;;  %v4527_v63 = vld [vmem:[%s6370_s1 + $0x5c] ss:$400 sps:$4 sm:$0xff]  }
  0x16   :  { %v4522_v0 = vld [vmem:[%s6370_s1 + $0x50] ss:$400 sps:$4 sm:$0xff]   ;;  %v4525_v2 = vld [vmem:[%s6370_s1 + $0x58] ss:$400 sps:$4 sm:$0xff]   ;;  %v4530_v3 = vld [vmem:[%s6370_s1 + $0x374] ss:$400 sps:$4 sm:$0xff]  }
  0x17   :  { %1913 = vmatpush1.bf16.msra.mxu0 %v4462_v24  ;;  %v4533_v4 = vld [vmem:[%s6370_s1 + $0x37c] ss:$400 sps:$4 sm:$0xff]   ;;  %v4528_v5 = vld [vmem:[%s6370_s1 + $0x370] ss:$400 sps:$4 sm:$0xff]   ;;  %v4531_v6 = vld [vmem:[%s6370_s1 + $0x378] ss:$400 sps:$4 sm:$0xff]  }
  0x18   :  { %1954 = vmatpush1.bf16.msra.mxu1 %v4465_v25  ;;  %1990 = vmatprep.subr.bf16.mxu0 %v4470_v26  ;;  %v4536_v7 = vld [vmem:[%s6370_s1 + $0x694] ss:$400 sps:$4 sm:$0xff]   ;;  %v4539_v8 = vld [vmem:[%s6370_s1 + $0x69c] ss:$400 sps:$4 sm:$0xff]   ;;  %v4534_v10 = vld [vmem:[%s6370_s1 + $0x690] ss:$400 sps:$4 sm:$0xff]  }
  0x19   :  { %2031 = vmatprep.subr.bf16.mxu1 %v4473_v27  ;;  %v316_v9 = vld [vmem:[%s6372_s2] sm:$0xff]  ;;  %v4537_v11 = vld [vmem:[%s6370_s1 + $0x698] ss:$400 sps:$4 sm:$0xff]   ;;  %v4545_v13 = vld [vmem:[%s6370_s1 + $0x6c] ss:$400 sps:$4 sm:$0xff]  }
  0x1a   :  { %4382 = vmatmul.mubr.msk.bf16.vlgmr.msra.gmra.mrb[4].mxu0 %vm1822_vm0, %v4950_v14  ;;  %v4542_v12 = vld [vmem:[%s6370_s1 + $0x64] ss:$400 sps:$4 sm:$0xff]   ;;  %319 = vperm.xlu0 %4431, %v316_v9   ;;  %v4540_v15 = vld [vmem:[%s6370_s1 + $0x60] ss:$400 sps:$4 sm:$0xff]   ;;  %v4543_v16 = vld [vmem:[%s6370_s1 + $0x68] ss:$400 sps:$4 sm:$0xff]  }
  0x1b   :  { %4383 = vmatmul.mubr.msk.bf16.vlgmr.msra.gmra.mrb[4].mxu1 %vm1822_vm0, %v4950_v14  ;;  %1991 = vmatpush1.bf16.msra.mxu0 %v4468_v28  ;;  %v4548_v17 = vld [vmem:[%s6370_s1 + $0x384] ss:$400 sps:$4 sm:$0xff]   ;;  %v4551_v18 = vld [vmem:[%s6370_s1 + $0x38c] ss:$400 sps:$4 sm:$0xff]   ;;  %v4546_v19 = vld [vmem:[%s6370_s1 + $0x380] ss:$400 sps:$4 sm:$0xff]  }
  0x1c   :  { %2032 = vmatpush1.bf16.msra.mxu1 %v4471_v29  ;;  %1992 = vmatprep.subr.bf16.mxu0 %v4476_v30  ;;  %v4549_v20 = vld [vmem:[%s6370_s1 + $0x388] ss:$400 sps:$4 sm:$0xff]   ;;  %v4554_v21 = vld [vmem:[%s6370_s1 + $0x6a4] ss:$400 sps:$4 sm:$0xff]   ;;  %v4557_v22 = vld [vmem:[%s6370_s1 + $0x6ac] ss:$400 sps:$4 sm:$0xff]  }
  0x1d   :  { %2033 = vmatprep.subr.bf16.mxu1 %v4479_v31  ;;  %2022 = vmatprep.mubr.bf16.mxu0 %v4884_v1  ;;  %v4552_v23 = vld [vmem:[%s6370_s1 + $0x6a0] ss:$400 sps:$4 sm:$0xff]   ;;  %v4555_v24 = vld [vmem:[%s6370_s1 + $0x6a8] ss:$400 sps:$4 sm:$0xff]   ;;  %v4560_v25 = vld [vmem:[%s6370_s1 + $0x74] ss:$400 sps:$4 sm:$0xff]  }
  0x1e   :  { %2063 = vmatprep.mubr.bf16.mxu1 %v4884_v1  ;;  %v4563_v26 = vld [vmem:[%s6370_s1 + $0x7c] ss:$400 sps:$4 sm:$0xff]   ;;  %v4558_v27 = vld [vmem:[%s6370_s1 + $0x70] ss:$400 sps:$4 sm:$0xff]   ;;  %v4561_v28 = vld [vmem:[%s6370_s1 + $0x78] ss:$400 sps:$4 sm:$0xff]  }
  0x1f   :  { %1993 = vmatpush1.bf16.msra.mxu0 %v4474_v32  ;;  %v4566_v29 = vld [vmem:[%s6370_s1 + $0x394] ss:$400 sps:$4 sm:$0xff]   ;;  %v4569_v30 = vld [vmem:[%s6370_s1 + $0x39c] ss:$400 sps:$4 sm:$0xff]   ;;  %v4564_v31 = vld [vmem:[%s6370_s1 + $0x390] ss:$400 sps:$4 sm:$0xff]  }
  0x20   :  { %2034 = vmatpush1.bf16.msra.mxu1 %v4477_v33  ;;  %1994 = vmatprep.subr.bf16.mxu0 %v4482_v34  ;;  %v4567_v32 = vld [vmem:[%s6370_s1 + $0x398] ss:$400 sps:$4 sm:$0xff]   ;;  %v4572_v33 = vld [vmem:[%s6370_s1 + $0x6b4] ss:$400 sps:$4 sm:$0xff]   ;;  %v4575_v34 = vld [vmem:[%s6370_s1 + $0x6bc] ss:$400 sps:$4 sm:$0xff]  }
  0x21   :  { %2035 = vmatprep.subr.bf16.mxu1 %v4485_v35  ;;  %v4570_v35 = vld [vmem:[%s6370_s1 + $0x6b0] ss:$400 sps:$4 sm:$0xff]   ;;  %v4627_v9 = vld [vmem:[%s6370_s1 + $0x6e8] ss:$400 sps:$4 sm:$0xff]  }
  0x23   :  { %1995 = vmatpush1.bf16.msra.mxu0 %v4480_v36  ;;  %v4573_v36 = vld [vmem:[%s6370_s1 + $0x6b8] ss:$400 sps:$4 sm:$0xff]  }
  0x24   :  { %2036 = vmatpush1.bf16.msra.mxu1 %v4483_v37  ;;  %2072 = vmatprep.subr.bf16.mxu0 %v4488_v38  ;;  %v4578_v37 = vld [vmem:[%s6370_s1 + $0x84] ss:$400 sps:$4 sm:$0xff]   ;;  %v4581_v38 = vld [vmem:[%s6370_s1 + $0x8c] ss:$400 sps:$4 sm:$0xff]  }
  0x25   :  { %2113 = vmatprep.subr.bf16.mxu1 %v4491_v39  ;;  %v4576_v39 = vld [vmem:[%s6370_s1 + $0x80] ss:$400 sps:$4 sm:$0xff]  }
  0x26   :  { %4384 = vmatmul.mubr.msk.bf16.vlgmr.msra.gmra.mrb[8].mxu0 %vm1822_vm0, %v4950_v14 }
  0x27   :  { %4385 = vmatmul.mubr.msk.bf16.vlgmr.msra.gmra.mrb[8].mxu1 %vm1822_vm0, %v4950_v14  ;;  %2073 = vmatpush1.bf16.msra.mxu0 %v4486_v40  ;;  %v4579_v40 = vld [vmem:[%s6370_s1 + $0x88] ss:$400 sps:$4 sm:$0xff]  }
  0x28   :  { %2114 = vmatpush1.bf16.msra.mxu1 %v4489_v41  ;;  %2074 = vmatprep.subr.bf16.mxu0 %v4494_v42  ;;  %v4584_v41 = vld [vmem:[%s6370_s1 + $0x3a4] ss:$400 sps:$4 sm:$0xff]   ;;  %v4587_v42 = vld [vmem:[%s6370_s1 + $0x3ac] ss:$400 sps:$4 sm:$0xff]  }
  0x29   :  { %2115 = vmatprep.subr.bf16.mxu1 %v4497_v43  ;;  %2104 = vmatprep.mubr.bf16.mxu0 %v4884_v1  ;;  %v4582_v43 = vld [vmem:[%s6370_s1 + $0x3a0] ss:$400 sps:$4 sm:$0xff]  }
  0x2a   :  { %2145 = vmatprep.mubr.bf16.mxu1 %v4884_v1 }
  0x2b   :  { %2075 = vmatpush1.bf16.msra.mxu0 %v4492_v44  ;;  %v4585_v44 = vld [vmem:[%s6370_s1 + $0x3a8] ss:$400 sps:$4 sm:$0xff]  }
  0x2c   :  { %2116 = vmatpush1.bf16.msra.mxu1 %v4495_v45  ;;  %2076 = vmatprep.subr.bf16.mxu0 %v4500_v46  ;;  %v4590_v45 = vld [vmem:[%s6370_s1 + $0x6c4] ss:$400 sps:$4 sm:$0xff]   ;;  %v4593_v46 = vld [vmem:[%s6370_s1 + $0x6cc] ss:$400 sps:$4 sm:$0xff]  }
  0x2d   :  { %2117 = vmatprep.subr.bf16.mxu1 %v4503_v47  ;;  %v4588_v47 = vld [vmem:[%s6370_s1 + $0x6c0] ss:$400 sps:$4 sm:$0xff]  }
  0x2f   :  { %2077 = vmatpush1.bf16.msra.mxu0 %v4498_v48  ;;  %v4591_v48 = vld [vmem:[%s6370_s1 + $0x6c8] ss:$400 sps:$4 sm:$0xff]  }
  0x30   :  { %2118 = vmatpush1.bf16.msra.mxu1 %v4501_v49  ;;  %2154 = vmatprep.subr.bf16.mxu0 %v4506_v50  ;;  %v4596_v49 = vld [vmem:[%s6370_s1 + $0x94] ss:$400 sps:$4 sm:$0xff]   ;;  %v4599_v50 = vld [vmem:[%s6370_s1 + $0x9c] ss:$400 sps:$4 sm:$0xff]  }
  0x31   :  { %2195 = vmatprep.subr.bf16.mxu1 %v4509_v51  ;;  %v4594_v51 = vld [vmem:[%s6370_s1 + $0x90] ss:$400 sps:$4 sm:$0xff]  }
  0x32   :  { %4386 = vmatmul.mubr.msk.bf16.vlgmr.msra.gmra.mrb[12].mxu0 %vm1822_vm0, %v4950_v14 }
  0x33   :  { %4387 = vmatmul.mubr.msk.bf16.vlgmr.msra.gmra.mrb[12].mxu1 %vm1822_vm0, %v4950_v14  ;;  %2155 = vmatpush1.bf16.msra.mxu0 %v4504_v52  ;;  %v4597_v52 = vld [vmem:[%s6370_s1 + $0x98] ss:$400 sps:$4 sm:$0xff]  }
  0x34   :  { %2196 = vmatpush1.bf16.msra.mxu1 %v4507_v53  ;;  %2156 = vmatprep.subr.bf16.mxu0 %v4512_v54  ;;  %v4602_v53 = vld [vmem:[%s6370_s1 + $0x3b4] ss:$400 sps:$4 sm:$0xff]   ;;  %v4605_v54 = vld [vmem:[%s6370_s1 + $0x3bc] ss:$400 sps:$4 sm:$0xff]  }
  0x35   :  { %2197 = vmatprep.subr.bf16.mxu1 %v4515_v55  ;;  %2186 = vmatprep.mubr.bf16.mxu0 %v4884_v1  ;;  %v4600_v55 = vld [vmem:[%s6370_s1 + $0x3b0] ss:$400 sps:$4 sm:$0xff]  }
  0x36   :  { %2227 = vmatprep.mubr.bf16.mxu1 %v4884_v1 }
  0x37   :  { %2157 = vmatpush1.bf16.msra.mxu0 %v4510_v56  ;;  %v4603_v56 = vld [vmem:[%s6370_s1 + $0x3b8] ss:$400 sps:$4 sm:$0xff]  }
  0x38   :  { %2198 = vmatpush1.bf16.msra.mxu1 %v4513_v57  ;;  %2158 = vmatprep.subr.bf16.mxu0 %v4518_v58  ;;  %v4608_v57 = vld [vmem:[%s6370_s1 + $0x6d4] ss:$400 sps:$4 sm:$0xff]   ;;  %v4611_v58 = vld [vmem:[%s6370_s1 + $0x6dc] ss:$400 sps:$4 sm:$0xff]  }
  0x39   :  { %2199 = vmatprep.subr.bf16.mxu1 %v4521_v59  ;;  %v4606_v59 = vld [vmem:[%s6370_s1 + $0x6d0] ss:$400 sps:$4 sm:$0xff]  }
  0x3b   :  { %2159 = vmatpush1.bf16.msra.mxu0 %v4516_v60  ;;  %v4609_v60 = vld [vmem:[%s6370_s1 + $0x6d8] ss:$400 sps:$4 sm:$0xff]  }
  0x3c   :  { %2200 = vmatpush1.bf16.msra.mxu1 %v4519_v61  ;;  %2236 = vmatprep.subr.bf16.mxu0 %v4524_v62  ;;  %v4614_v61 = vld [vmem:[%s6370_s1 + $0xa4] ss:$400 sps:$4 sm:$0xff]   ;;  %v4617_v62 = vld [vmem:[%s6370_s1 + $0xac] ss:$400 sps:$4 sm:$0xff]  }
  0x3d   :  { %2277 = vmatprep.subr.bf16.mxu1 %v4527_v63  ;;  %v4612_v63 = vld [vmem:[%s6370_s1 + $0xa0] ss:$400 sps:$4 sm:$0xff]  }
  0x3e   :  { %4388 = vmatmul.mubr.msk.bf16.vlgmr.msra.gmra.mrb[16].mxu0 %vm1822_vm0, %v4950_v14 }
  0x3f   :  { %4389 = vmatmul.mubr.msk.bf16.vlgmr.msra.gmra.mrb[16].mxu1 %vm1822_vm0, %v4950_v14  ;;  %2237 = vmatpush1.bf16.msra.mxu0 %v4522_v0  ;;  %v4615_v0 = vld [vmem:[%s6370_s1 + $0xa8] ss:$400 sps:$4 sm:$0xff]  }
  0x40   :  { %2278 = vmatpush1.bf16.msra.mxu1 %v4525_v2  ;;  %2238 = vmatprep.subr.bf16.mxu0 %v4530_v3  ;;  %v4620_v2 = vld [vmem:[%s6370_s1 + $0x3c4] ss:$400 sps:$4 sm:$0xff]   ;;  %v4623_v3 = vld [vmem:[%s6370_s1 + $0x3cc] ss:$400 sps:$4 sm:$0xff]  }
  0x41   :  { %2279 = vmatprep.subr.bf16.mxu1 %v4533_v4  ;;  %2268 = vmatprep.mubr.bf16.mxu0 %v4884_v1  ;;  %v4618_v4 = vld [vmem:[%s6370_s1 + $0x3c0] ss:$400 sps:$4 sm:$0xff]  }
  0x42   :  { %2309 = vmatprep.mubr.bf16.mxu1 %v4884_v1 }
  0x43   :  { %2239 = vmatpush1.bf16.msra.mxu0 %v4528_v5  ;;  %v4621_v5 = vld [vmem:[%s6370_s1 + $0x3c8] ss:$400 sps:$4 sm:$0xff]  }
  0x44   :  { %2280 = vmatpush1.bf16.msra.mxu1 %v4531_v6  ;;  %2240 = vmatprep.subr.bf16.mxu0 %v4536_v7  ;;  %v4626_v6 = vld [vmem:[%s6370_s1 + $0x6e4] ss:$400 sps:$4 sm:$0xff]   ;;  %v4629_v7 = vld [vmem:[%s6370_s1 + $0x6ec] ss:$400 sps:$4 sm:$0xff]  }
  0x45   :  { %2281 = vmatprep.subr.bf16.mxu1 %v4539_v8  ;;  %v4624_v8 = vld [vmem:[%s6370_s1 + $0x6e0] ss:$400 sps:$4 sm:$0xff]  }
  0x47   :  { %2241 = vmatpush1.bf16.msra.mxu0 %v4534_v10  ;;  %v4632_v10 = vld [vmem:[%s6370_s1 + $0xb4] ss:$400 sps:$4 sm:$0xff]  }
  0x48   :  { %2282 = vmatpush1.bf16.msra.mxu1 %v4537_v11  ;;  %2318 = vmatprep.subr.bf16.mxu0 %v4542_v12  ;;  %v4635_v11 = vld [vmem:[%s6370_s1 + $0xbc] ss:$400 sps:$4 sm:$0xff]   ;;  %v4630_v12 = vld [vmem:[%s6370_s1 + $0xb0] ss:$400 sps:$4 sm:$0xff]  }
  0x49   :  { %2359 = vmatprep.subr.bf16.mxu1 %v4545_v13  ;;  %v4633_v13 = vld [vmem:[%s6370_s1 + $0xb8] ss:$400 sps:$4 sm:$0xff]  }
  0x4a   :  { %4390 = vmatmul.mubr.msk.bf16.vlgmr.msra.gmra.mrb[20].mxu0 %vm1822_vm0, %v4950_v14 }
  0x4b   :  { %4391 = vmatmul.mubr.msk.bf16.vlgmr.msra.gmra.mrb[20].mxu1 %vm1822_vm0, %v4950_v14  ;;  %2319 = vmatpush1.bf16.msra.mxu0 %v4540_v15  ;;  %v4638_v15 = vld [vmem:[%s6370_s1 + $0x3d4] ss:$400 sps:$4 sm:$0xff]  }
  0x4c   :  { %2360 = vmatpush1.bf16.msra.mxu1 %v4543_v16  ;;  %2320 = vmatprep.subr.bf16.mxu0 %v4548_v17  ;;  %v4641_v16 = vld [vmem:[%s6370_s1 + $0x3dc] ss:$400 sps:$4 sm:$0xff]   ;;  %v4636_v17 = vld [vmem:[%s6370_s1 + $0x3d0] ss:$400 sps:$4 sm:$0xff]  }
  0x4d   :  { %2361 = vmatprep.subr.bf16.mxu1 %v4551_v18  ;;  %2350 = vmatprep.mubr.bf16.mxu0 %v4884_v1  ;;  %v4639_v18 = vld [vmem:[%s6370_s1 + $0x3d8] ss:$400 sps:$4 sm:$0xff]  }
  0x4e   :  { %2391 = vmatprep.mubr.bf16.mxu1 %v4884_v1 }
  0x4f   :  { %2321 = vmatpush1.bf16.msra.mxu0 %v4546_v19  ;;  %v4644_v19 = vld [vmem:[%s6370_s1 + $0x6f4] ss:$400 sps:$4 sm:$0xff]  }
  0x50   :  { %2362 = vmatpush1.bf16.msra.mxu1 %v4549_v20  ;;  %2322 = vmatprep.subr.bf16.mxu0 %v4554_v21  ;;  %v4642_v20 = vld [vmem:[%s6370_s1 + $0x6f0] ss:$400 sps:$4 sm:$0xff]   ;;  %v4645_v21 = vld [vmem:[%s6370_s1 + $0x6f8] ss:$400 sps:$4 sm:$0xff]  }
  0x51   :  { %2363 = vmatprep.subr.bf16.mxu1 %v4557_v22  ;;  %v4650_v22 = vld [vmem:[%s6370_s1 + $0xc4] ss:$400 sps:$4 sm:$0xff]  }
  0x53   :  { %2323 = vmatpush1.bf16.msra.mxu0 %v4552_v23  ;;  %v4653_v23 = vld [vmem:[%s6370_s1 + $0xcc] ss:$400 sps:$4 sm:$0xff]  }
  0x54   :  { %2364 = vmatpush1.bf16.msra.mxu1 %v4555_v24  ;;  %2400 = vmatprep.subr.bf16.mxu0 %v4560_v25  ;;  %v4648_v24 = vld [vmem:[%s6370_s1 + $0xc0] ss:$400 sps:$4 sm:$0xff]   ;;  %v4651_v25 = vld [vmem:[%s6370_s1 + $0xc8] ss:$400 sps:$4 sm:$0xff]  }
  0x55   :  { %2441 = vmatprep.subr.bf16.mxu1 %v4563_v26  ;;  %v4656_v26 = vld [vmem:[%s6370_s1 + $0x3e4] ss:$400 sps:$4 sm:$0xff]  }
  0x56   :  { %4392 = vmatmul.mubr.msk.bf16.vlgmr.msra.gmra.mrb[24].mxu0 %vm1822_vm0, %v4950_v14 }
  0x57   :  { %4393 = vmatmul.mubr.msk.bf16.vlgmr.msra.gmra.mrb[24].mxu1 %vm1822_vm0, %v4950_v14  ;;  %2401 = vmatpush1.bf16.msra.mxu0 %v4558_v27  ;;  %v4659_v27 = vld [vmem:[%s6370_s1 + $0x3ec] ss:$400 sps:$4 sm:$0xff]  }
  0x58   :  { %2442 = vmatpush1.bf16.msra.mxu1 %v4561_v28  ;;  %2402 = vmatprep.subr.bf16.mxu0 %v4566_v29  ;;  %v5435_v28 = vld [vmem:[%s6371_s0] sm:$0xf] }
  0x59   :  { %2443 = vmatprep.subr.bf16.mxu1 %v4569_v30  ;;  %2432 = vmatprep.mubr.bf16.mxu0 %v4884_v1  ;;  %v4654_v29 = vld [vmem:[%s6370_s1 + $0x3e0] ss:$400 sps:$4 sm:$0xff]   ;;  %v4657_v30 = vld [vmem:[%s6370_s1 + $0x3e8] ss:$400 sps:$4 sm:$0xff]  }
  0x5a   :  { %2473 = vmatprep.mubr.bf16.mxu1 %v4884_v1 }
  0x5b   :  { %2403 = vmatpush1.bf16.msra.mxu0 %v4564_v31  ;;  %v4662_v31 = vld [vmem:[%s6370_s1 + $0x704] ss:$400 sps:$4 sm:$0xff]  }
  0x5c   :  { %2444 = vmatpush1.bf16.msra.mxu1 %v4567_v32  ;;  %2404 = vmatprep.subr.bf16.mxu0 %v4572_v33  ;;  %v4665_v32 = vld [vmem:[%s6370_s1 + $0x70c] ss:$400 sps:$4 sm:$0xff]   ;;  %v4660_v33 = vld [vmem:[%s6370_s1 + $0x700] ss:$400 sps:$4 sm:$0xff]  }
  0x5d   :  { %2445 = vmatprep.subr.bf16.mxu1 %v4575_v34  ;;  %v4663_v34 = vld [vmem:[%s6370_s1 + $0x708] ss:$400 sps:$4 sm:$0xff]  }
  0x5f   :  { %2405 = vmatpush1.bf16.msra.mxu0 %v4570_v35  ;;  %v4668_v35 = vld [vmem:[%s6370_s1 + $0xd4] ss:$400 sps:$4 sm:$0xff]  }
  0x60   :  { %2446 = vmatpush1.bf16.msra.mxu1 %v4573_v36  ;;  %2482 = vmatprep.subr.bf16.mxu0 %v4578_v37  ;;  %v4671_v36 = vld [vmem:[%s6370_s1 + $0xdc] ss:$400 sps:$4 sm:$0xff]   ;;  %v4666_v37 = vld [vmem:[%s6370_s1 + $0xd0] ss:$400 sps:$4 sm:$0xff]  }
  0x61   :  { %2523 = vmatprep.subr.bf16.mxu1 %v4581_v38  ;;  %v4669_v38 = vld [vmem:[%s6370_s1 + $0xd8] ss:$400 sps:$4 sm:$0xff]  }
  0x62   :  { %4394 = vmatmul.mubr.msk.bf16.vlgmr.msra.gmra.mrb[28].mxu0 %vm1822_vm0, %v4950_v14 }
  0x63   :  { %4395 = vmatmul.mubr.msk.bf16.vlgmr.msra.gmra.mrb[28].mxu1 %vm1822_vm0, %v4950_v14  ;;  %2483 = vmatpush1.bf16.msra.mxu0 %v4576_v39  ;;  %v4674_v39 = vld [vmem:[%s6370_s1 + $0x3f4] ss:$400 sps:$4 sm:$0xff]  }
  0x64   :  { %2524 = vmatpush1.bf16.msra.mxu1 %v4579_v40  ;;  %2484 = vmatprep.subr.bf16.mxu0 %v4584_v41  ;;  %v4677_v40 = vld [vmem:[%s6370_s1 + $0x3fc] ss:$400 sps:$4 sm:$0xff]   ;;  %v4672_v41 = vld [vmem:[%s6370_s1 + $0x3f0] ss:$400 sps:$4 sm:$0xff]  }
  0x65   :  { %2525 = vmatprep.subr.bf16.mxu1 %v4587_v42  ;;  %2514 = vmatprep.mubr.bf16.mxu0 %v4884_v1  ;;  %v4675_v42 = vld [vmem:[%s6370_s1 + $0x3f8] ss:$400 sps:$4 sm:$0xff]  }
  0x66   :  { %2555 = vmatprep.mubr.bf16.mxu1 %v4884_v1 }
  0x67   :  { %2485 = vmatpush1.bf16.msra.mxu0 %v4582_v43  ;;  %v4680_v43 = vld [vmem:[%s6370_s1 + $0x714] ss:$400 sps:$4 sm:$0xff]  }
  0x68   :  { %2526 = vmatpush1.bf16.msra.mxu1 %v4585_v44  ;;  %2486 = vmatprep.subr.bf16.mxu0 %v4590_v45  ;;  %v4683_v44 = vld [vmem:[%s6370_s1 + $0x71c] ss:$400 sps:$4 sm:$0xff]   ;;  %v4678_v45 = vld [vmem:[%s6370_s1 + $0x710] ss:$400 sps:$4 sm:$0xff]  }
  0x69   :  { %2527 = vmatprep.subr.bf16.mxu1 %v4593_v46  ;;  %v4681_v46 = vld [vmem:[%s6370_s1 + $0x718] ss:$400 sps:$4 sm:$0xff]  }
  0x6b   :  { %2487 = vmatpush1.bf16.msra.mxu0 %v4588_v47  ;;  %v4686_v47 = vld [vmem:[%s6370_s1 + $0xe4] ss:$400 sps:$4 sm:$0xff]  }
  0x6c   :  { %2528 = vmatpush1.bf16.msra.mxu1 %v4591_v48  ;;  %2564 = vmatprep.subr.bf16.mxu0 %v4596_v49  ;;  %v4689_v48 = vld [vmem:[%s6370_s1 + $0xec] ss:$400 sps:$4 sm:$0xff]   ;;  %v4684_v49 = vld [vmem:[%s6370_s1 + $0xe0] ss:$400 sps:$4 sm:$0xff]  }
  0x6d   :  { %2605 = vmatprep.subr.bf16.mxu1 %v4599_v50  ;;  %v4687_v50 = vld [vmem:[%s6370_s1 + $0xe8] ss:$400 sps:$4 sm:$0xff]  }
  0x6e   :  { %4396 = vmatmul.mubr.msk.bf16.vlgmr.msra.gmra.mrb[32].mxu0 %vm1822_vm0, %v4950_v14 }
  0x6f   :  { %4397 = vmatmul.mubr.msk.bf16.vlgmr.msra.gmra.mrb[32].mxu1 %vm1822_vm0, %v4950_v14  ;;  %2565 = vmatpush1.bf16.msra.mxu0 %v4594_v51  ;;  %v4692_v51 = vld [vmem:[%s6370_s1 + $0x404] ss:$400 sps:$4 sm:$0xff]  }
  0x70   :  { %2606 = vmatpush1.bf16.msra.mxu1 %v4597_v52  ;;  %2566 = vmatprep.subr.bf16.mxu0 %v4602_v53  ;;  %v4695_v52 = vld [vmem:[%s6370_s1 + $0x40c] ss:$400 sps:$4 sm:$0xff]   ;;  %v4690_v53 = vld [vmem:[%s6370_s1 + $0x400] ss:$400 sps:$4 sm:$0xff]  }
  0x71   :  { %2607 = vmatprep.subr.bf16.mxu1 %v4605_v54  ;;  %2596 = vmatprep.mubr.bf16.mxu0 %v4884_v1  ;;  %v4693_v54 = vld [vmem:[%s6370_s1 + $0x408] ss:$400 sps:$4 sm:$0xff]  }
  0x72   :  { %2637 = vmatprep.mubr.bf16.mxu1 %v4884_v1 }
  0x73   :  { %2567 = vmatpush1.bf16.msra.mxu0 %v4600_v55  ;;  %v4698_v55 = vld [vmem:[%s6370_s1 + $0x724] ss:$400 sps:$4 sm:$0xff]  }
  0x74   :  { %2608 = vmatpush1.bf16.msra.mxu1 %v4603_v56  ;;  %2568 = vmatprep.subr.bf16.mxu0 %v4608_v57  ;;  %v4701_v56 = vld [vmem:[%s6370_s1 + $0x72c] ss:$400 sps:$4 sm:$0xff]   ;;  %v4696_v57 = vld [vmem:[%s6370_s1 + $0x720] ss:$400 sps:$4 sm:$0xff]  }
  0x75   :  { %2609 = vmatprep.subr.bf16.mxu1 %v4611_v58  ;;  %v4699_v58 = vld [vmem:[%s6370_s1 + $0x728] ss:$400 sps:$4 sm:$0xff]  }
  0x77   :  { %2569 = vmatpush1.bf16.msra.mxu0 %v4606_v59  ;;  %v4704_v59 = vld [vmem:[%s6370_s1 + $0xf4] ss:$400 sps:$4 sm:$0xff]  }
  0x78   :  { %2610 = vmatpush1.bf16.msra.mxu1 %v4609_v60  ;;  %2646 = vmatprep.subr.bf16.mxu0 %v4614_v61  ;;  %v4707_v60 = vld [vmem:[%s6370_s1 + $0xfc] ss:$400 sps:$4 sm:$0xff]   ;;  %v4702_v61 = vld [vmem:[%s6370_s1 + $0xf0] ss:$400 sps:$4 sm:$0xff]  }
  0x79   :  { %2687 = vmatprep.subr.bf16.mxu1 %v4617_v62  ;;  %v4705_v62 = vld [vmem:[%s6370_s1 + $0xf8] ss:$400 sps:$4 sm:$0xff]  }
  0x7a   :  { %4398 = vmatmul.mubr.msk.bf16.vlgmr.msra.gmra.mrb[36].mxu0 %vm1822_vm0, %v4950_v14 }
  0x7b   :  { %4399 = vmatmul.mubr.msk.bf16.vlgmr.msra.gmra.mrb[36].mxu1 %vm1822_vm0, %v4950_v14  ;;  %2647 = vmatpush1.bf16.msra.mxu0 %v4612_v63  ;;  %v4710_v63 = vld [vmem:[%s6370_s1 + $0x414] ss:$400 sps:$4 sm:$0xff]  }
  0x7c   :  { %2688 = vmatpush1.bf16.msra.mxu1 %v4615_v0  ;;  %2648 = vmatprep.subr.bf16.mxu0 %v4620_v2  ;;  %v4713_v0 = vld [vmem:[%s6370_s1 + $0x41c] ss:$400 sps:$4 sm:$0xff]   ;;  %v4708_v2 = vld [vmem:[%s6370_s1 + $0x410] ss:$400 sps:$4 sm:$0xff]  }
  0x7d   :  { %2689 = vmatprep.subr.bf16.mxu1 %v4623_v3  ;;  %2678 = vmatprep.mubr.bf16.mxu0 %v4884_v1  ;;  %v4711_v3 = vld [vmem:[%s6370_s1 + $0x418] ss:$400 sps:$4 sm:$0xff]  }
  0x7e   :  { %2719 = vmatprep.mubr.bf16.mxu1 %v4884_v1 }
  0x7f   :  { %2649 = vmatpush1.bf16.msra.mxu0 %v4618_v4  ;;  %v4716_v4 = vld [vmem:[%s6370_s1 + $0x734] ss:$400 sps:$4 sm:$0xff]  }
  0x80   :  { %2690 = vmatpush1.bf16.msra.mxu1 %v4621_v5  ;;  %2650 = vmatprep.subr.bf16.mxu0 %v4626_v6  ;;  %v4719_v5 = vld [vmem:[%s6370_s1 + $0x73c] ss:$400 sps:$4 sm:$0xff]   ;;  %v4714_v6 = vld [vmem:[%s6370_s1 + $0x730] ss:$400 sps:$4 sm:$0xff]  }
  0x81   :  { %2691 = vmatprep.subr.bf16.mxu1 %v4629_v7  ;;  %v4717_v7 = vld [vmem:[%s6370_s1 + $0x738] ss:$400 sps:$4 sm:$0xff]  }
  0x83   :  { %2651 = vmatpush1.bf16.msra.mxu0 %v4624_v8  ;;  %v4722_v8 = vld [vmem:[%s6370_s1 + $0x104] ss:$400 sps:$4 sm:$0xff]  }
  0x84   :  { %2692 = vmatpush1.bf16.msra.mxu1 %v4627_v9  ;;  %2728 = vmatprep.subr.bf16.mxu0 %v4632_v10  ;;  %v4725_v9 = vld [vmem:[%s6370_s1 + $0x10c] ss:$400 sps:$4 sm:$0xff]   ;;  %v4720_v10 = vld [vmem:[%s6370_s1 + $0x100] ss:$400 sps:$4 sm:$0xff]  }
  0x85   :  { %2769 = vmatprep.subr.bf16.mxu1 %v4635_v11  ;;  %v4723_v11 = vld [vmem:[%s6370_s1 + $0x108] ss:$400 sps:$4 sm:$0xff]  }
  0x86   :  { %4400 = vmatmul.mubr.msk.bf16.vlgmr.msra.gmra.mrb[40].mxu0 %vm1822_vm0, %v4950_v14 }
  0x87   :  { %4401 = vmatmul.mubr.msk.bf16.vlgmr.msra.gmra.mrb[40].mxu1 %vm1822_vm0, %v4950_v14  ;;  %2729 = vmatpush1.bf16.msra.mxu0 %v4630_v12  ;;  %v4647_v14 = vld [vmem:[%s6370_s1 + $0x6fc] ss:$400 sps:$4 sm:$0xff]   ;;  %v4728_v12 = vld [vmem:[%s6370_s1 + $0x424] ss:$400 sps:$4 sm:$0xff]  }
  0x88   :  { %2770 = vmatpush1.bf16.msra.mxu1 %v4633_v13  ;;  %2730 = vmatprep.subr.bf16.mxu0 %v4638_v15  ;;  %v4731_v13 = vld [vmem:[%s6370_s1 + $0x42c] ss:$400 sps:$4 sm:$0xff]   ;;  %v4726_v15 = vld [vmem:[%s6370_s1 + $0x420] ss:$400 sps:$4 sm:$0xff]  }
  0x89   :  { %2771 = vmatprep.subr.bf16.mxu1 %v4641_v16  ;;  %2760 = vmatprep.mubr.bf16.mxu0 %v4884_v1  ;;  %v4729_v16 = vld [vmem:[%s6370_s1 + $0x428] ss:$400 sps:$4 sm:$0xff]  }
  0x8a   :  { %2801 = vmatprep.mubr.bf16.mxu1 %v4884_v1 }
  0x8b   :  { %2731 = vmatpush1.bf16.msra.mxu0 %v4636_v17  ;;  %v4734_v17 = vld [vmem:[%s6370_s1 + $0x744] ss:$400 sps:$4 sm:$0xff]  }
  0x8c   :  { %2772 = vmatpush1.bf16.msra.mxu1 %v4639_v18  ;;  %2732 = vmatprep.subr.bf16.mxu0 %v4644_v19  ;;  %v4737_v18 = vld [vmem:[%s6370_s1 + $0x74c] ss:$400 sps:$4 sm:$0xff]   ;;  %v4732_v19 = vld [vmem:[%s6370_s1 + $0x740] ss:$400 sps:$4 sm:$0xff]  }
  0x8d   :  { %2773 = vmatprep.subr.bf16.mxu1 %v4647_v14  ;;  %v4735_v14 = vld [vmem:[%s6370_s1 + $0x748] ss:$400 sps:$4 sm:$0xff]  }
  0x8f   :  { %2733 = vmatpush1.bf16.msra.mxu0 %v4642_v20  ;;  %v4740_v20 = vld [vmem:[%s6370_s1 + $0x114] ss:$400 sps:$4 sm:$0xff]  }
  0x90   :  { %2774 = vmatpush1.bf16.msra.mxu1 %v4645_v21  ;;  %2810 = vmatprep.subr.bf16.mxu0 %v4650_v22  ;;  %v4743_v21 = vld [vmem:[%s6370_s1 + $0x11c] ss:$400 sps:$4 sm:$0xff]   ;;  %v4738_v22 = vld [vmem:[%s6370_s1 + $0x110] ss:$400 sps:$4 sm:$0xff]  }
  0x91   :  { %2851 = vmatprep.subr.bf16.mxu1 %v4653_v23  ;;  %v4741_v23 = vld [vmem:[%s6370_s1 + $0x118] ss:$400 sps:$4 sm:$0xff]  }
  0x92   :  { %4402 = vmatmul.mubr.msk.bf16.vlgmr.msra.gmra.mrb[44].mxu0 %vm1822_vm0, %v5435_v28 }
  0x93   :  { %4403 = vmatmul.mubr.msk.bf16.vlgmr.msra.gmra.mrb[44].mxu1 %vm1822_vm0, %v5435_v28  ;;  %2811 = vmatpush1.bf16.msra.mxu0 %v4648_v24  ;;  %v4746_v24 = vld [vmem:[%s6370_s1 + $0x434] ss:$400 sps:$4 sm:$0xff]  }
  0x94   :  { %2852 = vmatpush1.bf16.msra.mxu1 %v4651_v25  ;;  %2812 = vmatprep.subr.bf16.mxu0 %v4656_v26  ;;  %v4749_v25 = vld [vmem:[%s6370_s1 + $0x43c] ss:$400 sps:$4 sm:$0xff]   ;;  %v4744_v26 = vld [vmem:[%s6370_s1 + $0x430] ss:$400 sps:$4 sm:$0xff]  }
  0x95   :  { %2853 = vmatprep.subr.bf16.mxu1 %v4659_v27  ;;  %2842 = vmatprep.mubr.bf16.mxu0 %v4884_v1  ;;  %v4747_v27 = vld [vmem:[%s6370_s1 + $0x438] ss:$400 sps:$4 sm:$0xff]  }
  0x96   :  { %2883 = vmatprep.mubr.bf16.mxu1 %v4884_v1 }
  0x97   :  { %2813 = vmatpush1.bf16.msra.mxu0 %v4654_v29  ;;  %v4752_v29 = vld [vmem:[%s6370_s1 + $0x754] ss:$400 sps:$4 sm:$0xff]  }
  0x98   :  { %2854 = vmatpush1.bf16.msra.mxu1 %v4657_v30  ;;  %2814 = vmatprep.subr.bf16.mxu0 %v4662_v31  ;;  %v4755_v30 = vld [vmem:[%s6370_s1 + $0x75c] ss:$400 sps:$4 sm:$0xff]   ;;  %v4750_v31 = vld [vmem:[%s6370_s1 + $0x750] ss:$400 sps:$4 sm:$0xff]  }
  0x99   :  { %2855 = vmatprep.subr.bf16.mxu1 %v4665_v32  ;;  %v4753_v32 = vld [vmem:[%s6370_s1 + $0x758] ss:$400 sps:$4 sm:$0xff]  }
  0x9b   :  { %2815 = vmatpush1.bf16.msra.mxu0 %v4660_v33  ;;  %v4758_v33 = vld [vmem:[%s6370_s1 + $0x124] ss:$400 sps:$4 sm:$0xff]  }
  0x9c   :  { %2856 = vmatpush1.bf16.msra.mxu1 %v4663_v34  ;;  %2892 = vmatprep.subr.bf16.mxu0 %v4668_v35  ;;  %v4761_v34 = vld [vmem:[%s6370_s1 + $0x12c] ss:$400 sps:$4 sm:$0xff]   ;;  %v4756_v35 = vld [vmem:[%s6370_s1 + $0x120] ss:$400 sps:$4 sm:$0xff]  }
  0x9d   :  { %2933 = vmatprep.subr.bf16.mxu1 %v4671_v36  ;;  %v4759_v36 = vld [vmem:[%s6370_s1 + $0x128] ss:$400 sps:$4 sm:$0xff]  }
  0x9e   :  { %4404 = vmatmul.mubr.msk.bf16.vlgmr.msra.gmra.mrb[48].mxu0 %vm1822_vm0, %v5435_v28 }
  0x9f   :  { %4405 = vmatmul.mubr.msk.bf16.vlgmr.msra.gmra.mrb[48].mxu1 %vm1822_vm0, %v5435_v28  ;;  %2893 = vmatpush1.bf16.msra.mxu0 %v4666_v37  ;;  %v4764_v37 = vld [vmem:[%s6370_s1 + $0x444] ss:$400 sps:$4 sm:$0xff]  }
  0xa0   :  { %2934 = vmatpush1.bf16.msra.mxu1 %v4669_v38  ;;  %2894 = vmatprep.subr.bf16.mxu0 %v4674_v39  ;;  %v4767_v38 = vld [vmem:[%s6370_s1 + $0x44c] ss:$400 sps:$4 sm:$0xff]   ;;  %v4762_v39 = vld [vmem:[%s6370_s1 + $0x440] ss:$400 sps:$4 sm:$0xff]  }
  0xa1   :  { %2935 = vmatprep.subr.bf16.mxu1 %v4677_v40  ;;  %2924 = vmatprep.mubr.bf16.mxu0 %v4884_v1  ;;  %v4765_v40 = vld [vmem:[%s6370_s1 + $0x448] ss:$400 sps:$4 sm:$0xff]  }
  0xa2   :  { %2965 = vmatprep.mubr.bf16.mxu1 %v4884_v1 }
  0xa3   :  { %2895 = vmatpush1.bf16.msra.mxu0 %v4672_v41  ;;  %v4770_v41 = vld [vmem:[%s6370_s1 + $0x764] ss:$400 sps:$4 sm:$0xff]  }
  0xa4   :  { %2936 = vmatpush1.bf16.msra.mxu1 %v4675_v42  ;;  %2896 = vmatprep.subr.bf16.mxu0 %v4680_v43  ;;  %v4773_v42 = vld [vmem:[%s6370_s1 + $0x76c] ss:$400 sps:$4 sm:$0xff]   ;;  %v5707_v43 = vpop.permute.xlu0 %319 }
  0xa5   :  { %2937 = vmatprep.subr.bf16.mxu1 %v4683_v44  ;;  %v4768_v44 = vld [vmem:[%s6370_s1 + $0x760] ss:$400 sps:$4 sm:$0xff]  }
  0xa7   :  { %2897 = vmatpush1.bf16.msra.mxu0 %v4678_v45  ;;  %v4771_v45 = vld [vmem:[%s6370_s1 + $0x768] ss:$400 sps:$4 sm:$0xff]  }
  0xa8   :  { %2938 = vmatpush1.bf16.msra.mxu1 %v4681_v46  ;;  %2974 = vmatprep.subr.bf16.mxu0 %v4686_v47  ;;  %v4776_v46 = vld [vmem:[%s6370_s1 + $0x134] ss:$400 sps:$4 sm:$0xff]   ;;  %v4779_v47 = vld [vmem:[%s6370_s1 + $0x13c] ss:$400 sps:$4 sm:$0xff]  }
  0xa9   :  { %3015 = vmatprep.subr.bf16.mxu1 %v4689_v48 }
  0xaa   :  { %4406 = vmatmul.mubr.msk.bf16.vlgmr.msra.gmra.mrb[52].mxu0 %vm1822_vm0, %v5435_v28 }
  0xab   :  { %4407 = vmatmul.mubr.msk.bf16.vlgmr.msra.gmra.mrb[52].mxu1 %vm1822_vm0, %v5435_v28  ;;  %2975 = vmatpush1.bf16.msra.mxu0 %v4684_v49 }
  0xac   :  { %3016 = vmatpush1.bf16.msra.mxu1 %v4687_v50  ;;  %2976 = vmatprep.subr.bf16.mxu0 %v4692_v51 }
  0xad   :  { %3017 = vmatprep.subr.bf16.mxu1 %v4695_v52  ;;  %3006 = vmatprep.mubr.bf16.mxu0 %v4884_v1 }
  0xae   :  { %3047 = vmatprep.mubr.bf16.mxu1 %v4884_v1 }
  0xaf   :  { %2977 = vmatpush1.bf16.msra.mxu0 %v4690_v53 }
  0xb0   :  { %3018 = vmatpush1.bf16.msra.mxu1 %v4693_v54  ;;  %2978 = vmatprep.subr.bf16.mxu0 %v4698_v55  ;;  %v4774_v54 = vld [vmem:[%s6370_s1 + $0x130] ss:$400 sps:$4 sm:$0xff]  }
  0xb1   :  { %3019 = vmatprep.subr.bf16.mxu1 %v4701_v56 }
  0xb3   :  { %2979 = vmatpush1.bf16.msra.mxu0 %v4696_v57 }
  0xb4   :  { %3020 = vmatpush1.bf16.msra.mxu1 %v4699_v58  ;;  %3056 = vmatprep.subr.bf16.mxu0 %v4704_v59  ;;  %v4777_v59 = vld [vmem:[%s6370_s1 + $0x138] ss:$400 sps:$4 sm:$0xff]  }
  0xb5   :  { %3097 = vmatprep.subr.bf16.mxu1 %v4707_v60  ;;  %v4782_v60 = vld [vmem:[%s6370_s1 + $0x454] ss:$400 sps:$4 sm:$0xff]  }
  0xb6   :  { %4408 = vmatmul.mubr.msk.bf16.vlgmr.msra.gmra.mrb[56].mxu0 %vm1822_vm0, %v5435_v28 }
  0xb7   :  { %4409 = vmatmul.mubr.msk.bf16.vlgmr.msra.gmra.mrb[56].mxu1 %vm1822_vm0, %v5435_v28  ;;  %3057 = vmatpush1.bf16.msra.mxu0 %v4702_v61 }
  0xb8   :  { %3098 = vmatpush1.bf16.msra.mxu1 %v4705_v62  ;;  %3058 = vmatprep.subr.bf16.mxu0 %v4710_v63 }
  0xb9   :  { %3099 = vmatprep.subr.bf16.mxu1 %v4713_v0  ;;  %3088 = vmatprep.mubr.bf16.mxu0 %v4884_v1 }
  0xba   :  { %3129 = vmatprep.mubr.bf16.mxu1 %v4884_v1 }
  0xbb   :  { %3059 = vmatpush1.bf16.msra.mxu0 %v4708_v2  ;;  %v4785_v2 = vld [vmem:[%s6370_s1 + $0x45c] ss:$400 sps:$4 sm:$0xff]  }
  0xbc   :  { %3100 = vmatpush1.bf16.msra.mxu1 %v4711_v3  ;;  %3060 = vmatprep.subr.bf16.mxu0 %v4716_v4 }
  0xbd   :  { %3101 = vmatprep.subr.bf16.mxu1 %v4719_v5  ;;  %v4780_v5 = vld [vmem:[%s6370_s1 + $0x450] ss:$400 sps:$4 sm:$0xff]  }
  0xbf   :  { %3061 = vmatpush1.bf16.msra.mxu0 %v4714_v6  ;;  %v4783_v6 = vld [vmem:[%s6370_s1 + $0x458] ss:$400 sps:$4 sm:$0xff]  }
  0xc0   :  { %3102 = vmatpush1.bf16.msra.mxu1 %v4717_v7  ;;  %3138 = vmatprep.subr.bf16.mxu0 %v4722_v8  ;;  %v4788_v7 = vld [vmem:[%s6370_s1 + $0x774] ss:$400 sps:$4 sm:$0xff]   ;;  %v4791_v8 = vld [vmem:[%s6370_s1 + $0x77c] ss:$400 sps:$4 sm:$0xff]  }
  0xc1   :  { %3179 = vmatprep.subr.bf16.mxu1 %v4725_v9  ;;  %v4786_v9 = vld [vmem:[%s6370_s1 + $0x770] ss:$400 sps:$4 sm:$0xff]  }
  0xc2   :  { %4410 = vmatmul.mubr.msk.bf16.vlgmr.msra.gmra.mrb[60].mxu0 %vm1822_vm0, %v5435_v28 }
  0xc3   :  { %4411 = vmatmul.mubr.msk.bf16.vlgmr.msra.gmra.mrb[60].mxu1 %vm1822_vm0, %v5435_v28  ;;  %3139 = vmatpush1.bf16.msra.mxu0 %v4720_v10  ;;  %v4789_v10 = vld [vmem:[%s6370_s1 + $0x778] ss:$400 sps:$4 sm:$0xff]  }
  0xc4   :  { %3180 = vmatpush1.bf16.msra.mxu1 %v4723_v11  ;;  %3140 = vmatprep.subr.bf16.mxu0 %v4728_v12  ;;  %v4794_v11 = vld [vmem:[%s6370_s1 + $0x144] ss:$400 sps:$4 sm:$0xff]   ;;  %v4797_v12 = vld [vmem:[%s6370_s1 + $0x14c] ss:$400 sps:$4 sm:$0xff]  }
  0xc5   :  { %3181 = vmatprep.subr.bf16.mxu1 %v4731_v13  ;;  %3170 = vmatprep.mubr.bf16.mxu0 %v4884_v1 }
  0xc6   :  { %3211 = vmatprep.mubr.bf16.mxu1 %v4884_v1 }
  0xc7   :  { %3141 = vmatpush1.bf16.msra.mxu0 %v4726_v15 }
  0xc8   :  { %3182 = vmatpush1.bf16.msra.mxu1 %v4729_v16  ;;  %3142 = vmatprep.subr.bf16.mxu0 %v4734_v17 }
  0xc9   :  { %3183 = vmatprep.subr.bf16.mxu1 %v4737_v18 }
  0xcb   :  { %3143 = vmatpush1.bf16.msra.mxu0 %v4732_v19 }
  0xcc   :  { %3184 = vmatpush1.bf16.msra.mxu1 %v4735_v14  ;;  %3220 = vmatprep.subr.bf16.mxu0 %v4740_v20  ;;  %v4792_v14 = vld [vmem:[%s6370_s1 + $0x140] ss:$400 sps:$4 sm:$0xff]  }
  0xcd   :  { %3261 = vmatprep.subr.bf16.mxu1 %v4743_v21 }
  0xce   :  { %4412 = vmatmul.mubr.msk.bf16.vlgmr.msra.gmra.mrb[64].mxu0 %vm1822_vm0, %v5435_v28 }
  0xcf   :  { %4413 = vmatmul.mubr.msk.bf16.vlgmr.msra.gmra.mrb[64].mxu1 %vm1822_vm0, %v5435_v28  ;;  %3221 = vmatpush1.bf16.msra.mxu0 %v4738_v22 }
  0xd0   :  { %3262 = vmatpush1.bf16.msra.mxu1 %v4741_v23  ;;  %3222 = vmatprep.subr.bf16.mxu0 %v4746_v24  ;;  %v4795_v24 = vld [vmem:[%s6370_s1 + $0x148] ss:$400 sps:$4 sm:$0xff]  }
  0xd1   :  { %3263 = vmatprep.subr.bf16.mxu1 %v4749_v25  ;;  %3252 = vmatprep.mubr.bf16.mxu0 %v4884_v1  ;;  %v4800_v25 = vld [vmem:[%s6370_s1 + $0x464] ss:$400 sps:$4 sm:$0xff]  }
  0xd2   :  { %3293 = vmatprep.mubr.bf16.mxu1 %v4884_v1 }
  0xd3   :  { %3223 = vmatpush1.bf16.msra.mxu0 %v4744_v26 }
  0xd4   :  { %3264 = vmatpush1.bf16.msra.mxu1 %v4747_v27  ;;  %3224 = vmatprep.subr.bf16.mxu0 %v4752_v29 }
  0xd5   :  { %3265 = vmatprep.subr.bf16.mxu1 %v4755_v30 }
  0xd7   :  { %3225 = vmatpush1.bf16.msra.mxu0 %v4750_v31  ;;  %v4803_v31 = vld [vmem:[%s6370_s1 + $0x46c] ss:$400 sps:$4 sm:$0xff]  }
  0xd8   :  { %3266 = vmatpush1.bf16.msra.mxu1 %v4753_v32  ;;  %3302 = vmatprep.subr.bf16.mxu0 %v4758_v33 }
  0xd9   :  { %3343 = vmatprep.subr.bf16.mxu1 %v4761_v34  ;;  %v4798_v34 = vld [vmem:[%s6370_s1 + $0x460] ss:$400 sps:$4 sm:$0xff]  }
  0xda   :  { %4414 = vmatmul.mubr.msk.bf16.vlgmr.msra.gmra.mrb[68].mxu0 %vm1822_vm0, %v5435_v28 }
  0xdb   :  { %4415 = vmatmul.mubr.msk.bf16.vlgmr.msra.gmra.mrb[68].mxu1 %vm1822_vm0, %v5435_v28  ;;  %3303 = vmatpush1.bf16.msra.mxu0 %v4756_v35  ;;  %v4801_v35 = vld [vmem:[%s6370_s1 + $0x468] ss:$400 sps:$4 sm:$0xff]  }
  0xdc   :  { %3344 = vmatpush1.bf16.msra.mxu1 %v4759_v36  ;;  %3304 = vmatprep.subr.bf16.mxu0 %v4764_v37  ;;  %v4806_v36 = vld [vmem:[%s6370_s1 + $0x784] ss:$400 sps:$4 sm:$0xff]   ;;  %v4809_v37 = vld [vmem:[%s6370_s1 + $0x78c] ss:$400 sps:$4 sm:$0xff]  }
  0xdd   :  { %3345 = vmatprep.subr.bf16.mxu1 %v4767_v38  ;;  %3334 = vmatprep.mubr.bf16.mxu0 %v4884_v1  ;;  %v4804_v38 = vld [vmem:[%s6370_s1 + $0x780] ss:$400 sps:$4 sm:$0xff]  }
  0xde   :  { %3375 = vmatprep.mubr.bf16.mxu1 %v4884_v1 }
  0xdf   :  { %3305 = vmatpush1.bf16.msra.mxu0 %v4762_v39  ;;  %v4807_v39 = vld [vmem:[%s6370_s1 + $0x788] ss:$400 sps:$4 sm:$0xff]  }
  0xe0   :  { %3346 = vmatpush1.bf16.msra.mxu1 %v4765_v40  ;;  %3306 = vmatprep.subr.bf16.mxu0 %v4770_v41  ;;  %v4812_v40 = vld [vmem:[%s6370_s1 + $0x154] ss:$400 sps:$4 sm:$0xff]   ;;  %v4815_v41 = vld [vmem:[%s6370_s1 + $0x15c] ss:$400 sps:$4 sm:$0xff]  }
  0xe1   :  { %3347 = vmatprep.subr.bf16.mxu1 %v4773_v42  ;;  %v1860_v48 = vpop.f32.mrb[0].mxu0 }
  0xe2   :  { %v1901_v49 = vpop.f32.mrb[0].mxu1  ;;  %v1861_v50 = vadd.f32 %v1860_v48, %v5707_v43  ;;  %v1862_v52 = vpop.f32.mrb[1].mxu0 }
  0xe3   :  { %v1902_v51 = vadd.f32 %v1901_v49, %v5707_v43  ;;  %v1903_v53 = vpop.f32.mrb[1].mxu1  ;;  %v1863_v55 = vadd.f32 %v1862_v52, %v5707_v43  ;;  %v1864_v57 = vpop.f32.mrb[2].mxu0  ;;  %3307 = vmatpush1.bf16.msra.mxu0 %v4768_v44  ;;  %v4810_v49 = vld [vmem:[%s6370_s1 + $0x150] ss:$400 sps:$4 sm:$0xff]  }
  0xe4   :  { %v1904_v56 = vadd.f32 %v1903_v53, %v5707_v43  ;;  %v1905_v58 = vpop.f32.mrb[2].mxu1  ;;  %3348 = vmatpush1.bf16.msra.mxu1 %v4771_v45  ;;  %v3876_v61 = vmax.f32 %v1861_v50, 0.0  ;;  %v1865_v63 = vpop.f32.mrb[3].mxu0  ;;  %3384 = vmatprep.subr.bf16.mxu0 %v4776_v46 }
  0xe5   :  { %v3878_v62 = vmax.f32 %v1902_v51, 0.0  ;;  %v1906_v0 = vpop.f32.mrb[3].mxu1  ;;  %3425 = vmatprep.subr.bf16.mxu1 %v4779_v47  ;;  %v3877_v3 = vmax.f32 %v1863_v55, 0.0  ;;  %v4818_v55 = vld [vmem:[%s6370_s1 + $0x474] ss:$400 sps:$4 sm:$0xff]  }
  0xe6   :  { %v3879_v4 = vmax.f32 %v1904_v56, 0.0  ;;  %3976 = vst [vmem:[%s6373_s3] sm:$0xff] %v3876_v61  ;;  %4416 = vmatmul.mubr.msk.bf16.vlgmr.msra.gmra.mrb[72].mxu0 %vm1822_vm0, %v5435_v28  ;;  %v4816_v63 = vld [vmem:[%s6370_s1 + $0x470] ss:$400 sps:$4 sm:$0xff]   ;;  %v4819_v0 = vld [vmem:[%s6370_s1 + $0x478] ss:$400 sps:$4 sm:$0xff]  }
  0xe7   :  { %3978 = vst [vmem:[%s6373_s3 + $0x10] sm:$0xff] %v3878_v62  ;;  %4417 = vmatmul.mubr.msk.bf16.vlgmr.msra.gmra.mrb[72].mxu1 %vm1822_vm0, %v5435_v28  ;;  %3977 = vst [vmem:[%s6373_s3 + $0x8] sm:$0xff] %v3877_v3  ;;  %3385 = vmatpush1.bf16.msra.mxu0 %v4774_v54  ;;  %v4813_v54 = vld [vmem:[%s6370_s1 + $0x158] ss:$400 sps:$4 sm:$0xff]   ;;  %v4827_v3 = vld [vmem:[%s6370_s1 + $0x79c] ss:$400 sps:$4 sm:$0xff]  }
  0xe8   :  { %3979 = vst [vmem:[%s6373_s3 + $0x18] sm:$0xff] %v3879_v4  ;;  %3426 = vmatpush1.bf16.msra.mxu1 %v4777_v59  ;;  %3386 = vmatprep.subr.bf16.mxu0 %v4782_v60  ;;  %v4821_v60 = vld [vmem:[%s6370_s1 + $0x47c] ss:$400 sps:$4 sm:$0xff]   ;;  %v4822_v4 = vld [vmem:[%s6370_s1 + $0x790] ss:$400 sps:$4 sm:$0xff]  }
  0xe9   :  { %3427 = vmatprep.subr.bf16.mxu1 %v4785_v2  ;;  %3416 = vmatprep.mubr.bf16.mxu0 %v4884_v1  ;;  %v4824_v2 = vld [vmem:[%s6370_s1 + $0x794] ss:$400 sps:$4 sm:$0xff]  }
  0xea   :  { %3457 = vmatprep.mubr.bf16.mxu1 %v4884_v1 }
  0xeb   :  { %3387 = vmatpush1.bf16.msra.mxu0 %v4780_v5  ;;  %v4825_v5 = vld [vmem:[%s6370_s1 + $0x798] ss:$400 sps:$4 sm:$0xff]  }
  0xec   :  { %3428 = vmatpush1.bf16.msra.mxu1 %v4783_v6  ;;  %3388 = vmatprep.subr.bf16.mxu0 %v4788_v7  ;;  %v4830_v6 = vld [vmem:[%s6370_s1 + $0x164] ss:$400 sps:$4 sm:$0xff]   ;;  %v4833_v7 = vld [vmem:[%s6370_s1 + $0x16c] ss:$400 sps:$4 sm:$0xff]  }
  0xed   :  { %3429 = vmatprep.subr.bf16.mxu1 %v4791_v8  ;;  %v1942_v13 = vpop.f32.mrb[4].mxu0 }
  0xee   :  { %v1983_v15 = vpop.f32.mrb[4].mxu1  ;;  %v1943_v16 = vadd.f32 %v1942_v13, %v5707_v43  ;;  %v1944_v18 = vpop.f32.mrb[5].mxu0 }
  0xef   :  { %v1984_v17 = vadd.f32 %v1983_v15, %v5707_v43  ;;  %v1985_v19 = vpop.f32.mrb[5].mxu1  ;;  %v1945_v20 = vadd.f32 %v1944_v18, %v5707_v43  ;;  %v1946_v22 = vpop.f32.mrb[6].mxu0  ;;  %3389 = vmatpush1.bf16.msra.mxu0 %v4786_v9  ;;  %v4828_v15 = vld [vmem:[%s6370_s1 + $0x160] ss:$400 sps:$4 sm:$0xff]  }
  0xf0   :  { %v1986_v21 = vadd.f32 %v1985_v19, %v5707_v43  ;;  %v1987_v23 = vpop.f32.mrb[6].mxu1  ;;  %3430 = vmatpush1.bf16.msra.mxu1 %v4789_v10  ;;  %v3880_v26 = vmax.f32 %v1943_v16, 0.0  ;;  %v1947_v29 = vpop.f32.mrb[7].mxu0  ;;  %3466 = vmatprep.subr.bf16.mxu0 %v4794_v11 }
  0xf1   :  { %v3882_v27 = vmax.f32 %v1984_v17, 0.0  ;;  %v1988_v30 = vpop.f32.mrb[7].mxu1  ;;  %3507 = vmatprep.subr.bf16.mxu1 %v4797_v12  ;;  %v3881_v32 = vmax.f32 %v1945_v20, 0.0  ;;  %v4836_v20 = vld [vmem:[%s6370_s1 + $0x484] ss:$400 sps:$4 sm:$0xff]  }
  0xf2   :  { %v3883_v33 = vmax.f32 %v1986_v21, 0.0  ;;  %3980 = vst [vmem:[%s6373_s3 + $0x20] sm:$0xff] %v3880_v26  ;;  %4418 = vmatmul.mubr.msk.bf16.vlgmr.msra.gmra.mrb[76].mxu0 %vm1822_vm0, %v5435_v28  ;;  %v4834_v29 = vld [vmem:[%s6370_s1 + $0x480] ss:$400 sps:$4 sm:$0xff]   ;;  %v4837_v30 = vld [vmem:[%s6370_s1 + $0x488] ss:$400 sps:$4 sm:$0xff]  }
  0xf3   :  { %3982 = vst [vmem:[%s6373_s3 + $0x30] sm:$0xff] %v3882_v27  ;;  %4419 = vmatmul.mubr.msk.bf16.vlgmr.msra.gmra.mrb[76].mxu1 %vm1822_vm0, %v5435_v28  ;;  %3981 = vst [vmem:[%s6373_s3 + $0x28] sm:$0xff] %v3881_v32  ;;  %3467 = vmatpush1.bf16.msra.mxu0 %v4792_v14  ;;  %v4831_v14 = vld [vmem:[%s6370_s1 + $0x168] ss:$400 sps:$4 sm:$0xff]   ;;  %v4845_v32 = vld [vmem:[%s6370_s1 + $0x7ac] ss:$400 sps:$4 sm:$0xff]  }
  0xf4   :  { %3983 = vst [vmem:[%s6373_s3 + $0x38] sm:$0xff] %v3883_v33  ;;  %3508 = vmatpush1.bf16.msra.mxu1 %v4795_v24  ;;  %3468 = vmatprep.subr.bf16.mxu0 %v4800_v25  ;;  %v4839_v25 = vld [vmem:[%s6370_s1 + $0x48c] ss:$400 sps:$4 sm:$0xff]   ;;  %v4840_v33 = vld [vmem:[%s6370_s1 + $0x7a0] ss:$400 sps:$4 sm:$0xff]  }
  0xf5   :  { %3509 = vmatprep.subr.bf16.mxu1 %v4803_v31  ;;  %3498 = vmatprep.mubr.bf16.mxu0 %v4884_v1  ;;  %v4842_v31 = vld [vmem:[%s6370_s1 + $0x7a4] ss:$400 sps:$4 sm:$0xff]  }
  0xf6   :  { %3539 = vmatprep.mubr.bf16.mxu1 %v4884_v1 }
  0xf7   :  { %3469 = vmatpush1.bf16.msra.mxu0 %v4798_v34  ;;  %v4843_v34 = vld [vmem:[%s6370_s1 + $0x7a8] ss:$400 sps:$4 sm:$0xff]  }
  0xf8   :  { %3510 = vmatpush1.bf16.msra.mxu1 %v4801_v35  ;;  %3470 = vmatprep.subr.bf16.mxu0 %v4806_v36  ;;  %v4848_v35 = vld [vmem:[%s6370_s1 + $0x174] ss:$400 sps:$4 sm:$0xff]   ;;  %v4851_v36 = vld [vmem:[%s6370_s1 + $0x17c] ss:$400 sps:$4 sm:$0xff]  }
  0xf9   :  { %3511 = vmatprep.subr.bf16.mxu1 %v4809_v37  ;;  %v2024_v42 = vpop.f32.mrb[8].mxu0 }
  0xfa   :  { %v2065_v44 = vpop.f32.mrb[8].mxu1  ;;  %v2025_v45 = vadd.f32 %v2024_v42, %v5707_v43  ;;  %v2026_v47 = vpop.f32.mrb[9].mxu0 }
  0xfb   :  { %v2066_v46 = vadd.f32 %v2065_v44, %v5707_v43  ;;  %v2067_v48 = vpop.f32.mrb[9].mxu1  ;;  %v2027_v50 = vadd.f32 %v2026_v47, %v5707_v43  ;;  %v2028_v52 = vpop.f32.mrb[10].mxu0  ;;  %3471 = vmatpush1.bf16.msra.mxu0 %v4804_v38  ;;  %v4846_v44 = vld [vmem:[%s6370_s1 + $0x170] ss:$400 sps:$4 sm:$0xff]  }
  0xfc   :  { %v2068_v51 = vadd.f32 %v2067_v48, %v5707_v43  ;;  %v2069_v53 = vpop.f32.mrb[10].mxu1  ;;  %3512 = vmatpush1.bf16.msra.mxu1 %v4807_v39  ;;  %v3884_v56 = vmax.f32 %v2025_v45, 0.0  ;;  %v2029_v58 = vpop.f32.mrb[11].mxu0  ;;  %3548 = vmatprep.subr.bf16.mxu0 %v4812_v40 }
  0xfd   :  { %v3886_v57 = vmax.f32 %v2066_v46, 0.0  ;;  %v2070_v59 = vpop.f32.mrb[11].mxu1  ;;  %3589 = vmatprep.subr.bf16.mxu1 %v4815_v41  ;;  %v3885_v61 = vmax.f32 %v2027_v50, 0.0  ;;  %v4854_v50 = vld [vmem:[%s6370_s1 + $0x494] ss:$400 sps:$4 sm:$0xff]  }
  0xfe   :  { %v3887_v62 = vmax.f32 %v2068_v51, 0.0  ;;  %3984 = vst [vmem:[%s6373_s3 + $0x40] sm:$0xff] %v3884_v56  ;;  %4420 = vmatmul.mubr.msk.bf16.vlgmr.msra.gmra.mrb[80].mxu0 %vm1822_vm0, %v5435_v28  ;;  %v4852_v58 = vld [vmem:[%s6370_s1 + $0x490] ss:$400 sps:$4 sm:$0xff]   ;;  %v4855_v59 = vld [vmem:[%s6370_s1 + $0x498] ss:$400 sps:$4 sm:$0xff]  }
  0xff   :  { %3986 = vst [vmem:[%s6373_s3 + $0x50] sm:$0xff] %v3886_v57  ;;  %4421 = vmatmul.mubr.msk.bf16.vlgmr.msra.gmra.mrb[80].mxu1 %vm1822_vm0, %v5435_v28  ;;  %3985 = vst [vmem:[%s6373_s3 + $0x48] sm:$0xff] %v3885_v61  ;;  %3549 = vmatpush1.bf16.msra.mxu0 %v4810_v49  ;;  %v4849_v49 = vld [vmem:[%s6370_s1 + $0x178] ss:$400 sps:$4 sm:$0xff]   ;;  %v4858_v61 = vld [vmem:[%s6370_s1 + $0x7b0] ss:$400 sps:$4 sm:$0xff]  }
 0x100   :  { %3987 = vst [vmem:[%s6373_s3 + $0x58] sm:$0xff] %v3887_v62  ;;  %3590 = vmatpush1.bf16.msra.mxu1 %v4813_v54  ;;  %3550 = vmatprep.subr.bf16.mxu0 %v4818_v55  ;;  %v4857_v55 = vld [vmem:[%s6370_s1 + $0x49c] ss:$400 sps:$4 sm:$0xff]   ;;  %v4861_v62 = vld [vmem:[%s6370_s1 + $0x7b8] ss:$400 sps:$4 sm:$0xff]  }
 0x101   :  { %3591 = vmatprep.subr.bf16.mxu1 %v4821_v60  ;;  %3580 = vmatprep.mubr.bf16.mxu0 %v4884_v1  ;;  %v4863_v60 = vld [vmem:[%s6370_s1 + $0x7bc] ss:$400 sps:$4 sm:$0xff]  }
 0x102   :  { %3621 = vmatprep.mubr.bf16.mxu1 %v4884_v1 }
 0x103   :  { %3551 = vmatpush1.bf16.msra.mxu0 %v4816_v63  ;;  %v4866_v63 = vld [vmem:[%s6370_s1 + $0x184] ss:$400 sps:$4 sm:$0xff]  }
 0x104   :  { %3592 = vmatpush1.bf16.msra.mxu1 %v4819_v0  ;;  %3552 = vmatprep.subr.bf16.mxu0 %v4824_v2  ;;  %v4869_v0 = vld [vmem:[%s6370_s1 + $0x18c] ss:$400 sps:$4 sm:$0xff]  }
 0x105   :  { %3593 = vmatprep.subr.bf16.mxu1 %v4827_v3  ;;  %v2106_v8 = vpop.f32.mrb[12].mxu0 }
 0x106   :  { %v2147_v9 = vpop.f32.mrb[12].mxu1  ;;  %v2107_v10 = vadd.f32 %v2106_v8, %v5707_v43  ;;  %v2108_v12 = vpop.f32.mrb[13].mxu0  ;;  %v4864_v8 = vld [vmem:[%s6370_s1 + $0x180] ss:$400 sps:$4 sm:$0xff]  }
 0x107   :  { %v2148_v11 = vadd.f32 %v2147_v9, %v5707_v43  ;;  %v2149_v13 = vpop.f32.mrb[13].mxu1  ;;  %v2109_v16 = vadd.f32 %v2108_v12, %v5707_v43  ;;  %v2110_v18 = vpop.f32.mrb[14].mxu0  ;;  %3553 = vmatpush1.bf16.msra.mxu0 %v4822_v4 }
 0x108   :  { %v2150_v17 = vadd.f32 %v2149_v13, %v5707_v43  ;;  %v2151_v19 = vpop.f32.mrb[14].mxu1  ;;  %3594 = vmatpush1.bf16.msra.mxu1 %v4825_v5  ;;  %v3888_v21 = vmax.f32 %v2107_v10, 0.0  ;;  %v2111_v23 = vpop.f32.mrb[15].mxu0  ;;  %3630 = vmatprep.subr.bf16.mxu0 %v4830_v6  ;;  %v4867_v13 = vld [vmem:[%s6370_s1 + $0x188] ss:$400 sps:$4 sm:$0xff]  }
 0x109   :  { %v3890_v22 = vmax.f32 %v2148_v11, 0.0  ;;  %v2152_v24 = vpop.f32.mrb[15].mxu1  ;;  %3671 = vmatprep.subr.bf16.mxu1 %v4833_v7  ;;  %v3889_v26 = vmax.f32 %v2109_v16, 0.0  ;;  %v4870_v23 = vld [vmem:[%s6370_s1 + $0x4a0] ss:$400 sps:$4 sm:$0xff]  }
 0x10a   :  { %v3891_v27 = vmax.f32 %v2150_v17, 0.0  ;;  %3988 = vst [vmem:[%s6373_s3 + $0x60] sm:$0xff] %v3888_v21  ;;  %4422 = vmatmul.mubr.msk.bf16.vlgmr.msra.gmra.mrb[84].mxu0 %vm1822_vm0, %v5435_v28  ;;  %v4873_v24 = vld [vmem:[%s6370_s1 + $0x4a8] ss:$400 sps:$4 sm:$0xff]  }
 0x10b   :  { %3990 = vst [vmem:[%s6373_s3 + $0x70] sm:$0xff] %v3890_v22  ;;  %4423 = vmatmul.mubr.msk.bf16.vlgmr.msra.gmra.mrb[84].mxu1 %vm1822_vm0, %v5435_v28  ;;  %3989 = vst [vmem:[%s6373_s3 + $0x68] sm:$0xff] %v3889_v26  ;;  %3631 = vmatpush1.bf16.msra.mxu0 %v4828_v15  ;;  %v4872_v15 = vld [vmem:[%s6370_s1 + $0x4a4] ss:$400 sps:$4 sm:$0xff]   ;;  %v4883_v22 = vld [vmem:[%s6371_s0] sm:$0xf] }
 0x10c   :  { %3991 = vst [vmem:[%s6373_s3 + $0x78] sm:$0xff] %v3891_v27  ;;  %3672 = vmatpush1.bf16.msra.mxu1 %v4831_v14  ;;  %3632 = vmatprep.subr.bf16.mxu0 %v4836_v20  ;;  %v4875_v14 = vld [vmem:[%s6370_s1 + $0x4ac] ss:$400 sps:$4 sm:$0xff]   ;;  %v4876_v27 = vld [vmem:[%s6370_s1 + $0x7c0] ss:$400 sps:$4 sm:$0xff]  }
 0x10d   :  { %3673 = vmatprep.subr.bf16.mxu1 %v4839_v25  ;;  %3662 = vmatprep.mubr.bf16.mxu0 %v4884_v1  ;;  %v4878_v25 = vld [vmem:[%s6370_s1 + $0x7c4] ss:$400 sps:$4 sm:$0xff]   ;;  %v4881_v26 = vld [vmem:[%s6370_s1 + $0x7cc] ss:$400 sps:$4 sm:$0xff]  }
 0x10e   :  { %3703 = vmatprep.mubr.bf16.mxu1 %v4884_v1 }
 0x10f   :  { %3633 = vmatpush1.bf16.msra.mxu0 %v4834_v29  ;;  %v4879_v29 = vld [vmem:[%s6370_s1 + $0x7c8] ss:$400 sps:$4 sm:$0xff]  }
 0x110   :  { %3674 = vmatpush1.bf16.msra.mxu1 %v4837_v30  ;;  %3634 = vmatprep.subr.bf16.mxu0 %v4842_v31 }
 0x111   :  { %3675 = vmatprep.subr.bf16.mxu1 %v4845_v32  ;;  %v2188_v37 = vpop.f32.mrb[16].mxu0 }
 0x112   :  { %v2229_v38 = vpop.f32.mrb[16].mxu1  ;;  %v2189_v39 = vadd.f32 %v2188_v37, %v5707_v43  ;;  %v2190_v41 = vpop.f32.mrb[17].mxu0 }
 0x113   :  { %v2230_v40 = vadd.f32 %v2229_v38, %v5707_v43  ;;  %v2231_v42 = vpop.f32.mrb[17].mxu1  ;;  %v2191_v45 = vadd.f32 %v2190_v41, %v5707_v43  ;;  %v2192_v47 = vpop.f32.mrb[18].mxu0  ;;  %3635 = vmatpush1.bf16.msra.mxu0 %v4840_v33 }
 0x114   :  { %v2232_v46 = vadd.f32 %v2231_v42, %v5707_v43  ;;  %v2233_v48 = vpop.f32.mrb[18].mxu1  ;;  %3676 = vmatpush1.bf16.msra.mxu1 %v4843_v34  ;;  %v3892_v51 = vmax.f32 %v2189_v39, 0.0  ;;  %v2193_v53 = vpop.f32.mrb[19].mxu0  ;;  %3712 = vmatprep.subr.bf16.mxu0 %v4848_v35 }
 0x115   :  { %v3894_v52 = vmax.f32 %v2230_v40, 0.0  ;;  %v2234_v54 = vpop.f32.mrb[19].mxu1  ;;  %3753 = vmatprep.subr.bf16.mxu1 %v4851_v36  ;;  %v3893_v56 = vmax.f32 %v2191_v45, 0.0 }
 0x116   :  { %v3895_v57 = vmax.f32 %v2232_v46, 0.0  ;;  %3992 = vst [vmem:[%s6373_s3 + $0x80] sm:$0xff] %v3892_v51  ;;  %4424 = vmatmul.mubr.msk.bf16.vlgmr.msra.gmra.mrb[88].mxu0 %vm1822_vm0, %v5435_v28 }
 0x117   :  { %3994 = vst [vmem:[%s6373_s3 + $0x90] sm:$0xff] %v3894_v52  ;;  %4425 = vmatmul.mubr.msk.bf16.vlgmr.msra.gmra.mrb[88].mxu1 %vm1822_vm0, %v5435_v28  ;;  %3993 = vst [vmem:[%s6373_s3 + $0x88] sm:$0xff] %v3893_v56  ;;  %3713 = vmatpush1.bf16.msra.mxu0 %v4846_v44  ;;  %v4860_v28 = vld [vmem:[%s6370_s1 + $0x7b4] ss:$400 sps:$4 sm:$0xff]  }
 0x118   :  { %3995 = vst [vmem:[%s6373_s3 + $0x98] sm:$0xff] %v3895_v57  ;;  %3754 = vmatpush1.bf16.msra.mxu1 %v4849_v49  ;;  %3714 = vmatprep.subr.bf16.mxu0 %v4854_v50 }
 0x119   :  { %3755 = vmatprep.subr.bf16.mxu1 %v4857_v55  ;;  %3744 = vmatprep.mubr.bf16.mxu0 %v4884_v1 }
 0x11a   :  { %3785 = vmatprep.mubr.bf16.mxu1 %v4884_v1 }
 0x11b   :  { %3715 = vmatpush1.bf16.msra.mxu0 %v4852_v58 }
 0x11c   :  { %3756 = vmatpush1.bf16.msra.mxu1 %v4855_v59  ;;  %3716 = vmatprep.subr.bf16.mxu0 %v4860_v28 }
 0x11d   :  { %3757 = vmatprep.subr.bf16.mxu1 %v4863_v60  ;;  %v2270_v2 = vpop.f32.mrb[20].mxu0 }
 0x11e   :  { %v2311_v3 = vpop.f32.mrb[20].mxu1  ;;  %v2271_v4 = vadd.f32 %v2270_v2, %v5707_v43  ;;  %v2272_v6 = vpop.f32.mrb[21].mxu0 }
 0x11f   :  { %v2312_v5 = vadd.f32 %v2311_v3, %v5707_v43  ;;  %v2313_v7 = vpop.f32.mrb[21].mxu1  ;;  %v2273_v9 = vadd.f32 %v2272_v6, %v5707_v43  ;;  %v2274_v11 = vpop.f32.mrb[22].mxu0  ;;  %3717 = vmatpush1.bf16.msra.mxu0 %v4858_v61 }
 0x120   :  { %v2314_v10 = vadd.f32 %v2313_v7, %v5707_v43  ;;  %v2315_v12 = vpop.f32.mrb[22].mxu1  ;;  %3758 = vmatpush1.bf16.msra.mxu1 %v4861_v62  ;;  %v3896_v16 = vmax.f32 %v2271_v4, 0.0  ;;  %v2275_v18 = vpop.f32.mrb[23].mxu0  ;;  %3794 = vmatprep.subr.bf16.mxu0 %v4866_v63 }
 0x121   :  { %v3898_v17 = vmax.f32 %v2312_v5, 0.0  ;;  %v2316_v19 = vpop.f32.mrb[23].mxu1  ;;  %3835 = vmatprep.subr.bf16.mxu1 %v4869_v0  ;;  %v3897_v20 = vmax.f32 %v2273_v9, 0.0 }
 0x122   :  { %v3899_v21 = vmax.f32 %v2314_v10, 0.0  ;;  %3996 = vst [vmem:[%s6373_s3 + $0xa0] sm:$0xff] %v3896_v16  ;;  %4426 = vmatmul.mubr.msk.bf16.vlgmr.msra.gmra.mrb[92].mxu0 %vm1822_vm0, %v4883_v22 }
 0x123   :  { %3998 = vst [vmem:[%s6373_s3 + $0xb0] sm:$0xff] %v3898_v17  ;;  %4427 = vmatmul.mubr.msk.bf16.vlgmr.msra.gmra.mrb[92].mxu1 %vm1822_vm0, %v4883_v22  ;;  %3997 = vst [vmem:[%s6373_s3 + $0xa8] sm:$0xff] %v3897_v20  ;;  %3795 = vmatpush1.bf16.msra.mxu0 %v4864_v8 }
 0x124   :  { %3999 = vst [vmem:[%s6373_s3 + $0xb8] sm:$0xff] %v3899_v21  ;;  %3836 = vmatpush1.bf16.msra.mxu1 %v4867_v13  ;;  %3796 = vmatprep.subr.bf16.mxu0 %v4872_v15 }
 0x125   :  { %3837 = vmatprep.subr.bf16.mxu1 %v4875_v14  ;;  %3826 = vmatprep.mubr.bf16.mxu0 %v4884_v1 }
 0x126   :  { %3867 = vmatprep.mubr.bf16.mxu1 %v4884_v1 }
 0x127   :  { %3797 = vmatpush1.bf16.msra.mxu0 %v4870_v23 }
 0x128   :  { %3838 = vmatpush1.bf16.msra.mxu1 %v4873_v24  ;;  %3798 = vmatprep.subr.bf16.mxu0 %v4878_v25 }
 0x129   :  { %3839 = vmatprep.subr.bf16.mxu1 %v4881_v26  ;;  %v2352_v30 = vpop.f32.mrb[24].mxu0 }
 0x12a   :  { %v2393_v31 = vpop.f32.mrb[24].mxu1  ;;  %v2353_v32 = vadd.f32 %v2352_v30, %v5707_v43  ;;  %v2354_v34 = vpop.f32.mrb[25].mxu0 }
 0x12b   :  { %v2394_v33 = vadd.f32 %v2393_v31, %v5707_v43  ;;  %v2395_v1 = vpop.f32.mrb[25].mxu1  ;;  %v2355_v35 = vadd.f32 %v2354_v34, %v5707_v43  ;;  %v2356_v37 = vpop.f32.mrb[26].mxu0  ;;  %3799 = vmatpush1.bf16.msra.mxu0 %v4876_v27 }
 0x12c   :  { %v2396_v36 = vadd.f32 %v2395_v1, %v5707_v43  ;;  %v2397_v38 = vpop.f32.mrb[26].mxu1  ;;  %3840 = vmatpush1.bf16.msra.mxu1 %v4879_v29  ;;  %v3900_v39 = vmax.f32 %v2353_v32, 0.0  ;;  %v2357_v41 = vpop.f32.mrb[27].mxu0 }
 0x12d   :  { %v3902_v40 = vmax.f32 %v2394_v33, 0.0  ;;  %v2398_v42 = vpop.f32.mrb[27].mxu1  ;;  %v3901_v44 = vmax.f32 %v2355_v35, 0.0 }
 0x12e   :  { %v3903_v45 = vmax.f32 %v2396_v36, 0.0  ;;  %4000 = vst [vmem:[%s6373_s3 + $0xc0] sm:$0xff] %v3900_v39  ;;  %4428 = vmatmul.mubr.msk.bf16.vlgmr.msra.gmra.mrb[96].mxu0 %vm1822_vm0, %v4883_v22 }
 0x12f   :  { %4002 = vst [vmem:[%s6373_s3 + $0xd0] sm:$0xff] %v3902_v40  ;;  %4429 = vmatmul.mubr.msk.bf16.vlgmr.msra.gmra.mrb[96].mxu1 %vm1822_vm0, %v4883_v22  ;;  %4001 = vst [vmem:[%s6373_s3 + $0xc8] sm:$0xff] %v3901_v44 }
 0x130   :  { %4003 = vst [vmem:[%s6373_s3 + $0xd8] sm:$0xff] %v3903_v45 }
 0x135   :  { %v2434_v46 = vpop.f32.mrb[28].mxu0 }
 0x136   :  { %v2475_v47 = vpop.f32.mrb[28].mxu1  ;;  %v2435_v48 = vadd.f32 %v2434_v46, %v5707_v43  ;;  %v2436_v50 = vpop.f32.mrb[29].mxu0 }
 0x137   :  { %v2476_v49 = vadd.f32 %v2475_v47, %v5707_v43  ;;  %v2477_v51 = vpop.f32.mrb[29].mxu1  ;;  %v2437_v52 = vadd.f32 %v2436_v50, %v5707_v43  ;;  %v2438_v54 = vpop.f32.mrb[30].mxu0 }
 0x138   :  { %v2478_v53 = vadd.f32 %v2477_v51, %v5707_v43  ;;  %v2479_v55 = vpop.f32.mrb[30].mxu1  ;;  %v3904_v56 = vmax.f32 %v2435_v48, 0.0  ;;  %v2439_v58 = vpop.f32.mrb[31].mxu0 }
 0x139   :  { %v3906_v57 = vmax.f32 %v2476_v49, 0.0  ;;  %v2480_v59 = vpop.f32.mrb[31].mxu1  ;;  %v3905_v28 = vmax.f32 %v2437_v52, 0.0 }
 0x13a   :  { %v3907_v60 = vmax.f32 %v2478_v53, 0.0  ;;  %4004 = vst [vmem:[%s6373_s3 + $0xe0] sm:$0xff] %v3904_v56 }
 0x13b   :  { %4006 = vst [vmem:[%s6373_s3 + $0xf0] sm:$0xff] %v3906_v57  ;;  %4005 = vst [vmem:[%s6373_s3 + $0xe8] sm:$0xff] %v3905_v28 }
 0x13c   :  { %4007 = vst [vmem:[%s6373_s3 + $0xf8] sm:$0xff] %v3907_v60 }
 0x141   :  { %v2516_v61 = vpop.f32.mrb[32].mxu0 }
 0x142   :  { %v2557_v62 = vpop.f32.mrb[32].mxu1  ;;  %v2517_v63 = vadd.f32 %v2516_v61, %v5707_v43  ;;  %v2518_v2 = vpop.f32.mrb[33].mxu0 }
 0x143   :  { %v2558_v0 = vadd.f32 %v2557_v62, %v5707_v43  ;;  %v2559_v3 = vpop.f32.mrb[33].mxu1  ;;  %v2519_v4 = vadd.f32 %v2518_v2, %v5707_v43  ;;  %v2520_v6 = vpop.f32.mrb[34].mxu0 }
 0x144   :  { %v2560_v5 = vadd.f32 %v2559_v3, %v5707_v43  ;;  %v2561_v7 = vpop.f32.mrb[34].mxu1  ;;  %v3908_v8 = vmax.f32 %v2517_v63, 0.0  ;;  %v2521_v10 = vpop.f32.mrb[35].mxu0 }
 0x145   :  { %v3910_v9 = vmax.f32 %v2558_v0, 0.0  ;;  %v2562_v11 = vpop.f32.mrb[35].mxu1  ;;  %v3909_v12 = vmax.f32 %v2519_v4, 0.0 }
 0x146   :  { %v3911_v13 = vmax.f32 %v2560_v5, 0.0  ;;  %4008 = vst [vmem:[%s6373_s3 + $0x100] sm:$0xff] %v3908_v8 }
 0x147   :  { %4010 = vst [vmem:[%s6373_s3 + $0x110] sm:$0xff] %v3910_v9  ;;  %4009 = vst [vmem:[%s6373_s3 + $0x108] sm:$0xff] %v3909_v12 }
 0x148   :  { %4011 = vst [vmem:[%s6373_s3 + $0x118] sm:$0xff] %v3911_v13 }
 0x14d   :  { %v2598_v15 = vpop.f32.mrb[36].mxu0 }
 0x14e   :  { %v2639_v16 = vpop.f32.mrb[36].mxu1  ;;  %v2599_v17 = vadd.f32 %v2598_v15, %v5707_v43  ;;  %v2600_v19 = vpop.f32.mrb[37].mxu0 }
 0x14f   :  { %v2640_v18 = vadd.f32 %v2639_v16, %v5707_v43  ;;  %v2641_v14 = vpop.f32.mrb[37].mxu1  ;;  %v2601_v20 = vadd.f32 %v2600_v19, %v5707_v43  ;;  %v2602_v22 = vpop.f32.mrb[38].mxu0 }
 0x150   :  { %v2642_v21 = vadd.f32 %v2641_v14, %v5707_v43  ;;  %v2643_v23 = vpop.f32.mrb[38].mxu1  ;;  %v3912_v24 = vmax.f32 %v2599_v17, 0.0  ;;  %v2603_v26 = vpop.f32.mrb[39].mxu0 }
 0x151   :  { %v3914_v25 = vmax.f32 %v2640_v18, 0.0  ;;  %v2644_v27 = vpop.f32.mrb[39].mxu1  ;;  %v3913_v29 = vmax.f32 %v2601_v20, 0.0 }
 0x152   :  { %v3915_v30 = vmax.f32 %v2642_v21, 0.0  ;;  %4012 = vst [vmem:[%s6373_s3 + $0x120] sm:$0xff] %v3912_v24 }
 0x153   :  { %4014 = vst [vmem:[%s6373_s3 + $0x130] sm:$0xff] %v3914_v25  ;;  %4013 = vst [vmem:[%s6373_s3 + $0x128] sm:$0xff] %v3913_v29 }
 0x154   :  { %4015 = vst [vmem:[%s6373_s3 + $0x138] sm:$0xff] %v3915_v30 }
 0x159   :  { %v2680_v31 = vpop.f32.mrb[40].mxu0 }
 0x15a   :  { %v2721_v32 = vpop.f32.mrb[40].mxu1  ;;  %v2681_v33 = vadd.f32 %v2680_v31, %v5707_v43  ;;  %v2682_v1 = vpop.f32.mrb[41].mxu0 }
 0x15b   :  { %v2722_v34 = vadd.f32 %v2721_v32, %v5707_v43  ;;  %v2723_v35 = vpop.f32.mrb[41].mxu1  ;;  %v2683_v36 = vadd.f32 %v2682_v1, %v5707_v43  ;;  %v2684_v38 = vpop.f32.mrb[42].mxu0 }
 0x15c   :  { %v2724_v37 = vadd.f32 %v2723_v35, %v5707_v43  ;;  %v2725_v39 = vpop.f32.mrb[42].mxu1  ;;  %v3916_v40 = vmax.f32 %v2681_v33, 0.0  ;;  %v2685_v42 = vpop.f32.mrb[43].mxu0 }
 0x15d   :  { %v3918_v41 = vmax.f32 %v2722_v34, 0.0  ;;  %v2726_v44 = vpop.f32.mrb[43].mxu1  ;;  %v3917_v45 = vmax.f32 %v2683_v36, 0.0 }
 0x15e   :  { %v3919_v46 = vmax.f32 %v2724_v37, 0.0  ;;  %4016 = vst [vmem:[%s6373_s3 + $0x140] sm:$0xff] %v3916_v40 }
 0x15f   :  { %4018 = vst [vmem:[%s6373_s3 + $0x150] sm:$0xff] %v3918_v41  ;;  %4017 = vst [vmem:[%s6373_s3 + $0x148] sm:$0xff] %v3917_v45 }
 0x160   :  { %4019 = vst [vmem:[%s6373_s3 + $0x158] sm:$0xff] %v3919_v46 }
 0x165   :  { %v2762_v47 = vpop.f32.mrb[44].mxu0 }
 0x166   :  { %v2803_v48 = vpop.f32.mrb[44].mxu1  ;;  %v2763_v49 = vadd.f32 %v2762_v47, %v5707_v43  ;;  %v2764_v51 = vpop.f32.mrb[45].mxu0 }
 0x167   :  { %v2804_v50 = vadd.f32 %v2803_v48, %v5707_v43  ;;  %v2805_v52 = vpop.f32.mrb[45].mxu1  ;;  %v2765_v53 = vadd.f32 %v2764_v51, %v5707_v43  ;;  %v2766_v55 = vpop.f32.mrb[46].mxu0 }
 0x168   :  { %v2806_v54 = vadd.f32 %v2805_v52, %v5707_v43  ;;  %v2807_v56 = vpop.f32.mrb[46].mxu1  ;;  %v3920_v57 = vmax.f32 %v2763_v49, 0.0  ;;  %v2767_v59 = vpop.f32.mrb[47].mxu0 }
 0x169   :  { %v3922_v58 = vmax.f32 %v2804_v50, 0.0  ;;  %v2808_v28 = vpop.f32.mrb[47].mxu1  ;;  %v3921_v60 = vmax.f32 %v2765_v53, 0.0 }
 0x16a   :  { %v3923_v61 = vmax.f32 %v2806_v54, 0.0  ;;  %4020 = vst [vmem:[%s6373_s3 + $0x160] sm:$0xff] %v3920_v57 }
 0x16b   :  { %4022 = vst [vmem:[%s6373_s3 + $0x170] sm:$0xff] %v3922_v58  ;;  %4021 = vst [vmem:[%s6373_s3 + $0x168] sm:$0xff] %v3921_v60 }
 0x16c   :  { %4023 = vst [vmem:[%s6373_s3 + $0x178] sm:$0xff] %v3923_v61 }
 0x171   :  { %v2844_v62 = vpop.f32.mrb[48].mxu0 }
 0x172   :  { %v2885_v63 = vpop.f32.mrb[48].mxu1  ;;  %v2845_v0 = vadd.f32 %v2844_v62, %v5707_v43  ;;  %v2846_v3 = vpop.f32.mrb[49].mxu0 }
 0x173   :  { %v2886_v2 = vadd.f32 %v2885_v63, %v5707_v43  ;;  %v2887_v4 = vpop.f32.mrb[49].mxu1  ;;  %v2847_v5 = vadd.f32 %v2846_v3, %v5707_v43  ;;  %v2848_v7 = vpop.f32.mrb[50].mxu0 }
 0x174   :  { %v2888_v6 = vadd.f32 %v2887_v4, %v5707_v43  ;;  %v2889_v8 = vpop.f32.mrb[50].mxu1  ;;  %v3924_v9 = vmax.f32 %v2845_v0, 0.0  ;;  %v2849_v11 = vpop.f32.mrb[51].mxu0 }
 0x175   :  { %v3926_v10 = vmax.f32 %v2886_v2, 0.0  ;;  %v2890_v12 = vpop.f32.mrb[51].mxu1  ;;  %v3925_v13 = vmax.f32 %v2847_v5, 0.0 }
 0x176   :  { %v3927_v15 = vmax.f32 %v2888_v6, 0.0  ;;  %4024 = vst [vmem:[%s6373_s3 + $0x180] sm:$0xff] %v3924_v9 }
 0x177   :  { %4026 = vst [vmem:[%s6373_s3 + $0x190] sm:$0xff] %v3926_v10  ;;  %4025 = vst [vmem:[%s6373_s3 + $0x188] sm:$0xff] %v3925_v13 }
 0x178   :  { %4027 = vst [vmem:[%s6373_s3 + $0x198] sm:$0xff] %v3927_v15 }
 0x17d   :  { %v2926_v16 = vpop.f32.mrb[52].mxu0 }
 0x17e   :  { %v2967_v17 = vpop.f32.mrb[52].mxu1  ;;  %v2927_v18 = vadd.f32 %v2926_v16, %v5707_v43  ;;  %v2928_v14 = vpop.f32.mrb[53].mxu0 }
 0x17f   :  { %v2968_v19 = vadd.f32 %v2967_v17, %v5707_v43  ;;  %v2969_v20 = vpop.f32.mrb[53].mxu1  ;;  %v2929_v21 = vadd.f32 %v2928_v14, %v5707_v43  ;;  %v2930_v23 = vpop.f32.mrb[54].mxu0 }
 0x180   :  { %v2970_v22 = vadd.f32 %v2969_v20, %v5707_v43  ;;  %v2971_v24 = vpop.f32.mrb[54].mxu1  ;;  %v3928_v25 = vmax.f32 %v2927_v18, 0.0  ;;  %v2931_v27 = vpop.f32.mrb[55].mxu0 }
 0x181   :  { %v3930_v26 = vmax.f32 %v2968_v19, 0.0  ;;  %v2972_v29 = vpop.f32.mrb[55].mxu1  ;;  %v3929_v30 = vmax.f32 %v2929_v21, 0.0 }
 0x182   :  { %v3931_v31 = vmax.f32 %v2970_v22, 0.0  ;;  %4028 = vst [vmem:[%s6373_s3 + $0x1a0] sm:$0xff] %v3928_v25 }
 0x183   :  { %4030 = vst [vmem:[%s6373_s3 + $0x1b0] sm:$0xff] %v3930_v26  ;;  %4029 = vst [vmem:[%s6373_s3 + $0x1a8] sm:$0xff] %v3929_v30 }
 0x184   :  { %4031 = vst [vmem:[%s6373_s3 + $0x1b8] sm:$0xff] %v3931_v31 }
 0x189   :  { %v3008_v32 = vpop.f32.mrb[56].mxu0 }
 0x18a   :  { %v3049_v33 = vpop.f32.mrb[56].mxu1  ;;  %v3009_v34 = vadd.f32 %v3008_v32, %v5707_v43  ;;  %v3010_v35 = vpop.f32.mrb[57].mxu0 }
 0x18b   :  { %v3050_v1 = vadd.f32 %v3049_v33, %v5707_v43  ;;  %v3051_v36 = vpop.f32.mrb[57].mxu1  ;;  %v3011_v37 = vadd.f32 %v3010_v35, %v5707_v43  ;;  %v3012_v39 = vpop.f32.mrb[58].mxu0 }
 0x18c   :  { %v3052_v38 = vadd.f32 %v3051_v36, %v5707_v43  ;;  %v3053_v40 = vpop.f32.mrb[58].mxu1  ;;  %v3932_v41 = vmax.f32 %v3009_v34, 0.0  ;;  %v3013_v44 = vpop.f32.mrb[59].mxu0 }
 0x18d   :  { %v3934_v42 = vmax.f32 %v3050_v1, 0.0  ;;  %v3054_v45 = vpop.f32.mrb[59].mxu1  ;;  %v3933_v46 = vmax.f32 %v3011_v37, 0.0 }
 0x18e   :  { %v3935_v47 = vmax.f32 %v3052_v38, 0.0  ;;  %4032 = vst [vmem:[%s6373_s3 + $0x1c0] sm:$0xff] %v3932_v41 }
 0x18f   :  { %4034 = vst [vmem:[%s6373_s3 + $0x1d0] sm:$0xff] %v3934_v42  ;;  %4033 = vst [vmem:[%s6373_s3 + $0x1c8] sm:$0xff] %v3933_v46 }
 0x190   :  { %4035 = vst [vmem:[%s6373_s3 + $0x1d8] sm:$0xff] %v3935_v47 }
 0x195   :  { %v3090_v48 = vpop.f32.mrb[60].mxu0 }
 0x196   :  { %v3131_v49 = vpop.f32.mrb[60].mxu1  ;;  %v3091_v50 = vadd.f32 %v3090_v48, %v5707_v43  ;;  %v3092_v52 = vpop.f32.mrb[61].mxu0 }
 0x197   :  { %v3132_v51 = vadd.f32 %v3131_v49, %v5707_v43  ;;  %v3133_v53 = vpop.f32.mrb[61].mxu1  ;;  %v3093_v54 = vadd.f32 %v3092_v52, %v5707_v43  ;;  %v3094_v56 = vpop.f32.mrb[62].mxu0 }
 0x198   :  { %v3134_v55 = vadd.f32 %v3133_v53, %v5707_v43  ;;  %v3135_v57 = vpop.f32.mrb[62].mxu1  ;;  %v3936_v58 = vmax.f32 %v3091_v50, 0.0  ;;  %v3095_v28 = vpop.f32.mrb[63].mxu0 }
 0x199   :  { %v3938_v59 = vmax.f32 %v3132_v51, 0.0  ;;  %v3136_v60 = vpop.f32.mrb[63].mxu1  ;;  %v3937_v61 = vmax.f32 %v3093_v54, 0.0 }
 0x19a   :  { %v3939_v62 = vmax.f32 %v3134_v55, 0.0  ;;  %4036 = vst [vmem:[%s6373_s3 + $0x1e0] sm:$0xff] %v3936_v58 }
 0x19b   :  { %4038 = vst [vmem:[%s6373_s3 + $0x1f0] sm:$0xff] %v3938_v59  ;;  %4037 = vst [vmem:[%s6373_s3 + $0x1e8] sm:$0xff] %v3937_v61 }
 0x19c   :  { %4039 = vst [vmem:[%s6373_s3 + $0x1f8] sm:$0xff] %v3939_v62 }
 0x1a1   :  { %v3172_v63 = vpop.f32.mrb[64].mxu0 }
 0x1a2   :  { %v3213_v0 = vpop.f32.mrb[64].mxu1  ;;  %v3173_v2 = vadd.f32 %v3172_v63, %v5707_v43  ;;  %v3174_v4 = vpop.f32.mrb[65].mxu0 }
 0x1a3   :  { %v3214_v3 = vadd.f32 %v3213_v0, %v5707_v43  ;;  %v3215_v5 = vpop.f32.mrb[65].mxu1  ;;  %v3175_v6 = vadd.f32 %v3174_v4, %v5707_v43  ;;  %v3176_v8 = vpop.f32.mrb[66].mxu0 }
 0x1a4   :  { %v3216_v7 = vadd.f32 %v3215_v5, %v5707_v43  ;;  %v3217_v9 = vpop.f32.mrb[66].mxu1  ;;  %v3940_v10 = vmax.f32 %v3173_v2, 0.0  ;;  %v3177_v12 = vpop.f32.mrb[67].mxu0 }
 0x1a5   :  { %v3942_v11 = vmax.f32 %v3214_v3, 0.0  ;;  %v3218_v13 = vpop.f32.mrb[67].mxu1  ;;  %v3941_v15 = vmax.f32 %v3175_v6, 0.0 }
 0x1a6   :  { %v3943_v16 = vmax.f32 %v3216_v7, 0.0  ;;  %4040 = vst [vmem:[%s6373_s3 + $0x200] sm:$0xff] %v3940_v10 }
 0x1a7   :  { %4042 = vst [vmem:[%s6373_s3 + $0x210] sm:$0xff] %v3942_v11  ;;  %4041 = vst [vmem:[%s6373_s3 + $0x208] sm:$0xff] %v3941_v15 }
 0x1a8   :  { %4043 = vst [vmem:[%s6373_s3 + $0x218] sm:$0xff] %v3943_v16 }
 0x1ad   :  { %v3254_v17 = vpop.f32.mrb[68].mxu0 }
 0x1ae   :  { %v3295_v18 = vpop.f32.mrb[68].mxu1  ;;  %v3255_v19 = vadd.f32 %v3254_v17, %v5707_v43  ;;  %v3256_v20 = vpop.f32.mrb[69].mxu0 }
 0x1af   :  { %v3296_v14 = vadd.f32 %v3295_v18, %v5707_v43  ;;  %v3297_v21 = vpop.f32.mrb[69].mxu1  ;;  %v3257_v22 = vadd.f32 %v3256_v20, %v5707_v43  ;;  %v3258_v24 = vpop.f32.mrb[70].mxu0 }
 0x1b0   :  { %v3298_v23 = vadd.f32 %v3297_v21, %v5707_v43  ;;  %v3299_v25 = vpop.f32.mrb[70].mxu1  ;;  %v3944_v26 = vmax.f32 %v3255_v19, 0.0  ;;  %v3259_v29 = vpop.f32.mrb[71].mxu0 }
 0x1b1   :  { %v3946_v27 = vmax.f32 %v3296_v14, 0.0  ;;  %v3300_v30 = vpop.f32.mrb[71].mxu1  ;;  %v3945_v31 = vmax.f32 %v3257_v22, 0.0 }
 0x1b2   :  { %v3947_v32 = vmax.f32 %v3298_v23, 0.0  ;;  %4044 = vst [vmem:[%s6373_s3 + $0x220] sm:$0xff] %v3944_v26 }
 0x1b3   :  { %4046 = vst [vmem:[%s6373_s3 + $0x230] sm:$0xff] %v3946_v27  ;;  %4045 = vst [vmem:[%s6373_s3 + $0x228] sm:$0xff] %v3945_v31 }
 0x1b4   :  { %4047 = vst [vmem:[%s6373_s3 + $0x238] sm:$0xff] %v3947_v32 }
 0x1b9   :  { %v3336_v33 = vpop.f32.mrb[72].mxu0 }
 0x1ba   :  { %v3377_v34 = vpop.f32.mrb[72].mxu1  ;;  %v3337_v1 = vadd.f32 %v3336_v33, %v5707_v43  ;;  %v3338_v36 = vpop.f32.mrb[73].mxu0 }
 0x1bb   :  { %v3378_v35 = vadd.f32 %v3377_v34, %v5707_v43  ;;  %v3379_v37 = vpop.f32.mrb[73].mxu1  ;;  %v3339_v38 = vadd.f32 %v3338_v36, %v5707_v43  ;;  %v3340_v40 = vpop.f32.mrb[74].mxu0 }
 0x1bc   :  { %v3380_v39 = vadd.f32 %v3379_v37, %v5707_v43  ;;  %v3381_v41 = vpop.f32.mrb[74].mxu1  ;;  %v3948_v42 = vmax.f32 %v3337_v1, 0.0  ;;  %v3341_v45 = vpop.f32.mrb[75].mxu0 }
 0x1bd   :  { %v3950_v44 = vmax.f32 %v3378_v35, 0.0  ;;  %v3382_v46 = vpop.f32.mrb[75].mxu1  ;;  %v3949_v47 = vmax.f32 %v3339_v38, 0.0 }
 0x1be   :  { %v3951_v48 = vmax.f32 %v3380_v39, 0.0  ;;  %4048 = vst [vmem:[%s6373_s3 + $0x240] sm:$0xff] %v3948_v42 }
 0x1bf   :  { %4050 = vst [vmem:[%s6373_s3 + $0x250] sm:$0xff] %v3950_v44  ;;  %4049 = vst [vmem:[%s6373_s3 + $0x248] sm:$0xff] %v3949_v47 }
 0x1c0   :  { %4051 = vst [vmem:[%s6373_s3 + $0x258] sm:$0xff] %v3951_v48 }
 0x1c5   :  { %v3418_v49 = vpop.f32.mrb[76].mxu0 }
 0x1c6   :  { %v3459_v50 = vpop.f32.mrb[76].mxu1  ;;  %v3419_v51 = vadd.f32 %v3418_v49, %v5707_v43  ;;  %v3420_v53 = vpop.f32.mrb[77].mxu0 }
 0x1c7   :  { %v3460_v52 = vadd.f32 %v3459_v50, %v5707_v43  ;;  %v3461_v54 = vpop.f32.mrb[77].mxu1  ;;  %v3421_v55 = vadd.f32 %v3420_v53, %v5707_v43  ;;  %v3422_v57 = vpop.f32.mrb[78].mxu0 }
 0x1c8   :  { %v3462_v56 = vadd.f32 %v3461_v54, %v5707_v43  ;;  %v3463_v58 = vpop.f32.mrb[78].mxu1  ;;  %v3952_v59 = vmax.f32 %v3419_v51, 0.0  ;;  %v3423_v60 = vpop.f32.mrb[79].mxu0 }
 0x1c9   :  { %v3954_v28 = vmax.f32 %v3460_v52, 0.0  ;;  %v3464_v61 = vpop.f32.mrb[79].mxu1  ;;  %v3953_v62 = vmax.f32 %v3421_v55, 0.0 }
 0x1ca   :  { %v3955_v63 = vmax.f32 %v3462_v56, 0.0  ;;  %4052 = vst [vmem:[%s6373_s3 + $0x260] sm:$0xff] %v3952_v59 }
 0x1cb   :  { %4054 = vst [vmem:[%s6373_s3 + $0x270] sm:$0xff] %v3954_v28  ;;  %4053 = vst [vmem:[%s6373_s3 + $0x268] sm:$0xff] %v3953_v62 }
 0x1cc   :  { %4055 = vst [vmem:[%s6373_s3 + $0x278] sm:$0xff] %v3955_v63 }
 0x1d1   :  { %v3500_v0 = vpop.f32.mrb[80].mxu0 }
 0x1d2   :  { %v3541_v2 = vpop.f32.mrb[80].mxu1  ;;  %v3501_v3 = vadd.f32 %v3500_v0, %v5707_v43  ;;  %v3502_v5 = vpop.f32.mrb[81].mxu0 }
 0x1d3   :  { %v3542_v4 = vadd.f32 %v3541_v2, %v5707_v43  ;;  %v3543_v6 = vpop.f32.mrb[81].mxu1  ;;  %v3503_v7 = vadd.f32 %v3502_v5, %v5707_v43  ;;  %v3504_v9 = vpop.f32.mrb[82].mxu0 }
 0x1d4   :  { %v3544_v8 = vadd.f32 %v3543_v6, %v5707_v43  ;;  %v3545_v10 = vpop.f32.mrb[82].mxu1  ;;  %v3956_v11 = vmax.f32 %v3501_v3, 0.0  ;;  %v3505_v13 = vpop.f32.mrb[83].mxu0 }
 0x1d5   :  { %v3958_v12 = vmax.f32 %v3542_v4, 0.0  ;;  %v3546_v15 = vpop.f32.mrb[83].mxu1  ;;  %v3957_v16 = vmax.f32 %v3503_v7, 0.0 }
 0x1d6   :  { %v3959_v17 = vmax.f32 %v3544_v8, 0.0  ;;  %4056 = vst [vmem:[%s6373_s3 + $0x280] sm:$0xff] %v3956_v11 }
 0x1d7   :  { %4058 = vst [vmem:[%s6373_s3 + $0x290] sm:$0xff] %v3958_v12  ;;  %4057 = vst [vmem:[%s6373_s3 + $0x288] sm:$0xff] %v3957_v16 }
 0x1d8   :  { %4059 = vst [vmem:[%s6373_s3 + $0x298] sm:$0xff] %v3959_v17 }
 0x1dd   :  { %v3582_v18 = vpop.f32.mrb[84].mxu0 }
 0x1de   :  { %v3623_v19 = vpop.f32.mrb[84].mxu1  ;;  %v3583_v14 = vadd.f32 %v3582_v18, %v5707_v43  ;;  %v3584_v21 = vpop.f32.mrb[85].mxu0 }
 0x1df   :  { %v3624_v20 = vadd.f32 %v3623_v19, %v5707_v43  ;;  %v3625_v22 = vpop.f32.mrb[85].mxu1  ;;  %v3585_v23 = vadd.f32 %v3584_v21, %v5707_v43  ;;  %v3586_v25 = vpop.f32.mrb[86].mxu0 }
 0x1e0   :  { %v3626_v24 = vadd.f32 %v3625_v22, %v5707_v43  ;;  %v3627_v26 = vpop.f32.mrb[86].mxu1  ;;  %v3960_v27 = vmax.f32 %v3583_v14, 0.0  ;;  %v3587_v30 = vpop.f32.mrb[87].mxu0 }
 0x1e1   :  { %v3962_v29 = vmax.f32 %v3624_v20, 0.0  ;;  %v3628_v31 = vpop.f32.mrb[87].mxu1  ;;  %v3961_v32 = vmax.f32 %v3585_v23, 0.0 }
 0x1e2   :  { %v3963_v33 = vmax.f32 %v3626_v24, 0.0  ;;  %4060 = vst [vmem:[%s6373_s3 + $0x2a0] sm:$0xff] %v3960_v27 }
 0x1e3   :  { %4062 = vst [vmem:[%s6373_s3 + $0x2b0] sm:$0xff] %v3962_v29  ;;  %4061 = vst [vmem:[%s6373_s3 + $0x2a8] sm:$0xff] %v3961_v32 }
 0x1e4   :  { %4063 = vst [vmem:[%s6373_s3 + $0x2b8] sm:$0xff] %v3963_v33 }
 0x1e9   :  { %v3664_v34 = vpop.f32.mrb[88].mxu0 }
 0x1ea   :  { %v3705_v1 = vpop.f32.mrb[88].mxu1  ;;  %v3665_v35 = vadd.f32 %v3664_v34, %v5707_v43  ;;  %v3666_v37 = vpop.f32.mrb[89].mxu0 }
 0x1eb   :  { %v3706_v36 = vadd.f32 %v3705_v1, %v5707_v43  ;;  %v3707_v38 = vpop.f32.mrb[89].mxu1  ;;  %v3667_v39 = vadd.f32 %v3666_v37, %v5707_v43  ;;  %v3668_v41 = vpop.f32.mrb[90].mxu0 }
 0x1ec   :  { %v3708_v40 = vadd.f32 %v3707_v38, %v5707_v43  ;;  %v3709_v42 = vpop.f32.mrb[90].mxu1  ;;  %v3964_v44 = vmax.f32 %v3665_v35, 0.0  ;;  %v3669_v46 = vpop.f32.mrb[91].mxu0 }
 0x1ed   :  { %v3966_v45 = vmax.f32 %v3706_v36, 0.0  ;;  %v3710_v47 = vpop.f32.mrb[91].mxu1  ;;  %v3965_v48 = vmax.f32 %v3667_v39, 0.0 }
 0x1ee   :  { %v3967_v49 = vmax.f32 %v3708_v40, 0.0  ;;  %4064 = vst [vmem:[%s6373_s3 + $0x2c0] sm:$0xff] %v3964_v44 }
 0x1ef   :  { %4066 = vst [vmem:[%s6373_s3 + $0x2d0] sm:$0xff] %v3966_v45  ;;  %4065 = vst [vmem:[%s6373_s3 + $0x2c8] sm:$0xff] %v3965_v48 }
 0x1f0   :  { %4067 = vst [vmem:[%s6373_s3 + $0x2d8] sm:$0xff] %v3967_v49 }
 0x1f5   :  { %v3746_v50 = vpop.f32.mrb[92].mxu0 }
 0x1f6   :  { %v3787_v51 = vpop.f32.mrb[92].mxu1  ;;  %v3747_v52 = vadd.f32 %v3746_v50, %v5707_v43  ;;  %v3748_v54 = vpop.f32.mrb[93].mxu0 }
 0x1f7   :  { %v3788_v53 = vadd.f32 %v3787_v51, %v5707_v43  ;;  %v3789_v55 = vpop.f32.mrb[93].mxu1  ;;  %v3749_v56 = vadd.f32 %v3748_v54, %v5707_v43  ;;  %v3750_v58 = vpop.f32.mrb[94].mxu0 }
 0x1f8   :  { %v3790_v57 = vadd.f32 %v3789_v55, %v5707_v43  ;;  %v3791_v59 = vpop.f32.mrb[94].mxu1  ;;  %v3968_v28 = vmax.f32 %v3747_v52, 0.0  ;;  %v3751_v61 = vpop.f32.mrb[95].mxu0 }
 0x1f9   :  { %v3970_v60 = vmax.f32 %v3788_v53, 0.0  ;;  %v3792_v62 = vpop.f32.mrb[95].mxu1  ;;  %v3969_v63 = vmax.f32 %v3749_v56, 0.0 }
 0x1fa   :  { %v3971_v0 = vmax.f32 %v3790_v57, 0.0  ;;  %4068 = vst [vmem:[%s6373_s3 + $0x2e0] sm:$0xff] %v3968_v28 }
 0x1fb   :  { %4070 = vst [vmem:[%s6373_s3 + $0x2f0] sm:$0xff] %v3970_v60  ;;  %4069 = vst [vmem:[%s6373_s3 + $0x2e8] sm:$0xff] %v3969_v63 }
 0x1fc   :  { %4071 = vst [vmem:[%s6373_s3 + $0x2f8] sm:$0xff] %v3971_v0 }
 0x201   :  { %v3828_v2 = vpop.f32.mrb[96].mxu0 }
 0x202   :  { %v3869_v3 = vpop.f32.mrb[96].mxu1  ;;  %v3829_v4 = vadd.f32 %v3828_v2, %v5707_v43  ;;  %v3830_v6 = vpop.f32.mrb[97].mxu0 }
 0x203   :  { %v3870_v5 = vadd.f32 %v3869_v3, %v5707_v43  ;;  %v3871_v7 = vpop.f32.mrb[97].mxu1  ;;  %v3831_v8 = vadd.f32 %v3830_v6, %v5707_v43  ;;  %v3832_v10 = vpop.f32.mrb[98].mxu0 }
 0x204   :  { %v3872_v9 = vadd.f32 %v3871_v7, %v5707_v43  ;;  %v3873_v11 = vpop.f32.mrb[98].mxu1  ;;  %v3972_v12 = vmax.f32 %v3829_v4, 0.0  ;;  %v3833_v15 = vpop.f32.mrb[99].mxu0 }
 0x205   :  { %v3974_v13 = vmax.f32 %v3870_v5, 0.0  ;;  %v3874_v16 = vpop.f32.mrb[99].mxu1  ;;  %v3973_v17 = vmax.f32 %v3831_v8, 0.0 }
 0x206   :  { %v3975_v18 = vmax.f32 %v3872_v9, 0.0  ;;  %4072 = vst [vmem:[%s6373_s3 + $0x300] sm:$0xff] %v3972_v12 }
 0x207   :  { %4074 = vst [vmem:[%s6373_s3 + $0x310] sm:$0xff] %v3974_v13  ;;  %4073 = vst [vmem:[%s6373_s3 + $0x308] sm:$0xff] %v3973_v17 }
 0x208   :  { %4075 = vst [vmem:[%s6373_s3 + $0x318] sm:$0xff] %v3975_v18 }

// kernel: _lambda_.5
= control target key start
LH: loop header
LB: loop body
LE: loop exit
PB: predicated region body
PF: predicated region fallthrough
CT: control target
= control target key end

     0   :  { %v761_v1 = vmov 0   ;;  %v762_v37 = vmov 0.0   ;;  %vm763_vm0 = vmmov 0   ;;  %vm577_vm1 = vcmask 261120   ;;  %s1015_s1 = inlined_call_operand.vmem [shape: bf16[128,800], index: 1, kind: input, shape index: {}]   ;;  %s1016_s0 = inlined_call_operand.vmem [shape: bf16[16,128], index: 0, kind: input, shape index: {}]   ;;  %s1017_s2 = inlined_call_operand.vmem [shape: f32[16,1], index: 2, kind: input, shape index: {}]   ;;  %s1018_s3 = inlined_call_operand.vmem [shape: f32[16,800], index: 3, kind: output, shape index: {}]  }
   0x1   :  { %v680_v0 = vld [vmem:[%s1015_s1 + $0x4] ss:$28 sps:$4 sm:$0xff]   ;;  %419 = vmatprep.mubr.bf16.mxu0 %v761_v1  ;;  %462 = vmatprep.mubr.bf16.mxu1 %v761_v1  ;;  %v682_v2 = vld [vmem:[%s1015_s1 + $0xc] ss:$28 sps:$4 sm:$0xff]   ;;  %v686_v5 = vld [vmem:[%s1015_s1 + $0x3c] ss:$28 sps:$4 sm:$0xff]  }
   0x2   :  { %679 = vset.pattern.permute.xlu0 %v761_v1  ;;  %387 = vmatprep.subr.bf16.mxu0 %v680_v0  ;;  %v684_v3 = vld [vmem:[%s1015_s1] ss:$28 sps:$4 sm:$0xff]   ;;  %v685_v4 = vld [vmem:[%s1015_s1 + $0x8] ss:$28 sps:$4 sm:$0xff]   ;;  %v690_v7 = vld [vmem:[%s1015_s1 + $0x38] ss:$28 sps:$4 sm:$0xff]  }
   0x3   :  { %430 = vmatprep.subr.bf16.mxu1 %v682_v2  ;;  %388 = vmatpush1.bf16.msra.mxu0 %v684_v3  ;;  %v688_v6 = vld [vmem:[%s1015_s1 + $0x44] ss:$28 sps:$4 sm:$0xff]   ;;  %v692_v9 = vld [vmem:[%s1015_s1 + $0x74] ss:$28 sps:$4 sm:$0xff]   ;;  %v694_v10 = vld [vmem:[%s1015_s1 + $0x7c] ss:$28 sps:$4 sm:$0xff]  }
   0x4   :  { %431 = vmatpush1.bf16.msra.mxu1 %v685_v4  ;;  %389 = vmatprep.subr.bf16.mxu0 %v686_v5  ;;  %v691_v8 = vld [vmem:[%s1015_s1 + $0x40] ss:$28 sps:$4 sm:$0xff]   ;;  %v696_v11 = vld [vmem:[%s1015_s1 + $0x70] ss:$28 sps:$4 sm:$0xff]   ;;  %v697_v12 = vld [vmem:[%s1015_s1 + $0x78] ss:$28 sps:$4 sm:$0xff]  }
   0x5   :  { %432 = vmatprep.subr.bf16.mxu1 %v688_v6  ;;  %v698_v13 = vld [vmem:[%s1015_s1 + $0xac] ss:$28 sps:$4 sm:$0xff]   ;;  %v700_v14 = vld [vmem:[%s1015_s1 + $0xb4] ss:$28 sps:$4 sm:$0xff]   ;;  %v704_v17 = vld [vmem:[%s1015_s1 + $0xe4] ss:$28 sps:$4 sm:$0xff]  }
   0x6   :  { %v702_v15 = vld [vmem:[%s1015_s1 + $0xa8] ss:$28 sps:$4 sm:$0xff]   ;;  %v703_v16 = vld [vmem:[%s1015_s1 + $0xb0] ss:$28 sps:$4 sm:$0xff]   ;;  %v708_v19 = vld [vmem:[%s1015_s1 + $0xe0] ss:$28 sps:$4 sm:$0xff]  }
   0x7   :  { %390 = vmatpush1.bf16.msra.mxu0 %v690_v7  ;;  %v706_v18 = vld [vmem:[%s1015_s1 + $0xec] ss:$28 sps:$4 sm:$0xff]   ;;  %v710_v21 = vld [vmem:[%s1015_s1 + $0x11c] ss:$28 sps:$4 sm:$0xff]   ;;  %v712_v22 = vld [vmem:[%s1015_s1 + $0x124] ss:$28 sps:$4 sm:$0xff]  }
   0x8   :  { %433 = vmatpush1.bf16.msra.mxu1 %v691_v8  ;;  %391 = vmatprep.subr.bf16.mxu0 %v692_v9  ;;  %v709_v20 = vld [vmem:[%s1015_s1 + $0xe8] ss:$28 sps:$4 sm:$0xff]   ;;  %v714_v23 = vld [vmem:[%s1015_s1 + $0x118] ss:$28 sps:$4 sm:$0xff]   ;;  %v715_v24 = vld [vmem:[%s1015_s1 + $0x120] ss:$28 sps:$4 sm:$0xff]  }
   0x9   :  { %434 = vmatprep.subr.bf16.mxu1 %v694_v10  ;;  %v716_v25 = vld [vmem:[%s1015_s1 + $0x154] ss:$28 sps:$4 sm:$0xff]   ;;  %v718_v26 = vld [vmem:[%s1015_s1 + $0x15c] ss:$28 sps:$4 sm:$0xff]   ;;  %v722_v29 = vld [vmem:[%s1015_s1 + $0x18c] ss:$28 sps:$4 sm:$0xff]  }
   0xa   :  { %v720_v27 = vld [vmem:[%s1015_s1 + $0x150] ss:$28 sps:$4 sm:$0xff]   ;;  %v721_v28 = vld [vmem:[%s1015_s1 + $0x158] ss:$28 sps:$4 sm:$0xff]   ;;  %v726_v31 = vld [vmem:[%s1015_s1 + $0x188] ss:$28 sps:$4 sm:$0xff]  }
   0xb   :  { %392 = vmatpush1.bf16.msra.mxu0 %v696_v11  ;;  %v724_v30 = vld [vmem:[%s1015_s1 + $0x194] ss:$28 sps:$4 sm:$0xff]   ;;  %v889_v34 = vld [vmem:[%s1016_s0] sm:$0xff]   ;;  %v735_v38 = vld [vmem:[%s1015_s1 + $0x4c] ss:$28 sps:$4 sm:$0xff]  }
   0xc   :  { %435 = vmatpush1.bf16.msra.mxu1 %v697_v12  ;;  %393 = vmatprep.subr.bf16.mxu0 %v698_v13  ;;  %v727_v32 = vld [vmem:[%s1015_s1 + $0x190] ss:$28 sps:$4 sm:$0xff]   ;;  %v732_v36 = vld [vmem:[%s1015_s1 + $0x18] ss:$28 sps:$4 sm:$0xff]   ;;  %v733_v39 = vld [vmem:[%s1015_s1 + $0x48] ss:$28 sps:$4 sm:$0xff]  }
   0xd   :  { %436 = vmatprep.subr.bf16.mxu1 %v700_v14  ;;  %v731_v33 = vld [vmem:[%s1015_s1 + $0x14] ss:$28 sps:$4 sm:$0xff]   ;;  %v739_v41 = vld [vmem:[%s1015_s1 + $0x84] ss:$28 sps:$4 sm:$0xff]   ;;  %v743_v44 = vld [vmem:[%s1015_s1 + $0xbc] ss:$28 sps:$4 sm:$0xff]  }
   0xe   :  { %v729_v35 = vld [vmem:[%s1015_s1 + $0x10] ss:$28 sps:$4 sm:$0xff]   ;;  %v737_v42 = vld [vmem:[%s1015_s1 + $0x80] ss:$28 sps:$4 sm:$0xff]   ;;  %v740_v43 = vld [vmem:[%s1015_s1 + $0x88] ss:$28 sps:$4 sm:$0xff]  }
   0xf   :  { %394 = vmatpush1.bf16.msra.mxu0 %v702_v15  ;;  %v736_v40 = vld [vmem:[%s1015_s1 + $0x50] ss:$28 sps:$4 sm:$0xff]   ;;  %v81_v45 = vld [vmem:[%s1017_s2] sm:$0xff]  ;;  %v741_v47 = vld [vmem:[%s1015_s1 + $0xb8] ss:$28 sps:$4 sm:$0xff]  }
  0x10   :  { %437 = vmatpush1.bf16.msra.mxu1 %v703_v16  ;;  %395 = vmatprep.subr.bf16.mxu0 %v704_v17  ;;  %v82_v46 = vld [vmem:[%s1017_s2 + $0x8] sm:$0xff]  ;;  %v744_v48 = vld [vmem:[%s1015_s1 + $0xc0] ss:$28 sps:$4 sm:$0xff]   ;;  %v747_v49 = vld [vmem:[%s1015_s1 + $0xf4] ss:$28 sps:$4 sm:$0xff]  }
  0x11   :  { %438 = vmatprep.subr.bf16.mxu1 %v706_v18  ;;  %85 = vperm.xlu0 %679, %v81_v45   ;;  %v745_v50 = vld [vmem:[%s1015_s1 + $0xf0] ss:$28 sps:$4 sm:$0xff]   ;;  %v748_v51 = vld [vmem:[%s1015_s1 + $0xf8] ss:$28 sps:$4 sm:$0xff]   ;;  %v749_v53 = vld [vmem:[%s1015_s1 + $0x128] ss:$28 sps:$4 sm:$0xff]  }
  0x12   :  { %v751_v52 = vld [vmem:[%s1015_s1 + $0x12c] ss:$28 sps:$4 sm:$0xff]   ;;  %v755_v55 = vld [vmem:[%s1015_s1 + $0x164] ss:$28 sps:$4 sm:$0xff]   ;;  %v759_v58 = vld [vmem:[%s1015_s1 + $0x19c] ss:$28 sps:$4 sm:$0xff]  }
  0x13   :  { %396 = vmatpush1.bf16.msra.mxu0 %v708_v19  ;;  %v752_v54 = vld [vmem:[%s1015_s1 + $0x130] ss:$28 sps:$4 sm:$0xff]   ;;  %v753_v56 = vld [vmem:[%s1015_s1 + $0x160] ss:$28 sps:$4 sm:$0xff]   ;;  %v756_v57 = vld [vmem:[%s1015_s1 + $0x168] ss:$28 sps:$4 sm:$0xff]  }
  0x14   :  { %439 = vmatpush1.bf16.msra.mxu1 %v709_v20  ;;  %397 = vmatprep.subr.bf16.mxu0 %v710_v21  ;;  %v757_v59 = vld [vmem:[%s1015_s1 + $0x198] ss:$28 sps:$4 sm:$0xff]   ;;  %v760_v60 = vld [vmem:[%s1015_s1 + $0x1a0] ss:$28 sps:$4 sm:$0xff]  }
  0x15   :  { %440 = vmatprep.subr.bf16.mxu1 %v712_v22  ;;  %90 = vperm.xlu0 %679, %v82_v46  }
  0x17   :  { %398 = vmatpush1.bf16.msra.mxu0 %v714_v23 }
  0x18   :  { %441 = vmatpush1.bf16.msra.mxu1 %v715_v24  ;;  %399 = vmatprep.subr.bf16.mxu0 %v716_v25 }
  0x19   :  { %442 = vmatprep.subr.bf16.mxu1 %v718_v26 }
  0x1b   :  { %400 = vmatpush1.bf16.msra.mxu0 %v720_v27 }
  0x1c   :  { %443 = vmatpush1.bf16.msra.mxu1 %v721_v28  ;;  %401 = vmatprep.subr.bf16.mxu0 %v722_v29 }
  0x1d   :  { %444 = vmatprep.subr.bf16.mxu1 %v724_v30 }
  0x1f   :  { %402 = vmatpush1.bf16.msra.mxu0 %v726_v31 }
  0x20   :  { %445 = vmatpush1.bf16.msra.mxu1 %v727_v32  ;;  %473 = vmatprep.subr.bf16.mxu0 %v731_v33 }
  0x21   :  { %656 = vmatprep.subr.bf16.mxu1 %v762_v37 }
  0x22   :  { %420 = vmatmul.mubr.bf16.vlgmr.msra.gmra.mrb[0].mxu0 %v889_v34 }
  0x23   :  { %463 = vmatmul.mubr.bf16.vlgmr.msra.gmra.mrb[0].mxu1 %v889_v34  ;;  %474 = vmatpush1.bf16.msra.mxu0 %v729_v35 }
  0x24   :  { %657 = vmatpush3.bf16.msra.mxu1 %v732_v36  ;;  %475 = vmatprep.subr.bf16.mxu0 %v735_v38 }
  0x25   :  { %658 = vmatprep.subr.bf16.mxu1 %v762_v37  ;;  %505 = vmatprep.mubr.bf16.mxu0 %v761_v1 }
  0x26   :  { %672 = vmatprep.mubr.msk.bf16.mxu1 %vm763_vm0, %v762_v37 }
  0x27   :  { %476 = vmatpush1.bf16.msra.mxu0 %v733_v39 }
  0x28   :  { %659 = vmatpush3.bf16.msra.mxu1 %v736_v40  ;;  %477 = vmatprep.subr.bf16.mxu0 %v739_v41 }
  0x29   :  { %660 = vmatprep.subr.bf16.mxu1 %v762_v37 }
  0x2b   :  { %478 = vmatpush1.bf16.msra.mxu0 %v737_v42 }
  0x2c   :  { %661 = vmatpush3.bf16.msra.mxu1 %v740_v43  ;;  %479 = vmatprep.subr.bf16.mxu0 %v743_v44 }
  0x2d   :  { %662 = vmatprep.subr.bf16.mxu1 %v762_v37 }
  0x2f   :  { %480 = vmatpush1.bf16.msra.mxu0 %v741_v47 }
  0x30   :  { %663 = vmatpush3.bf16.msra.mxu1 %v744_v48  ;;  %481 = vmatprep.subr.bf16.mxu0 %v747_v49 }
  0x31   :  { %664 = vmatprep.subr.bf16.mxu1 %v762_v37 }
  0x33   :  { %482 = vmatpush1.bf16.msra.mxu0 %v745_v50 }
  0x34   :  { %665 = vmatpush3.bf16.msra.mxu1 %v748_v51  ;;  %483 = vmatprep.subr.bf16.mxu0 %v751_v52 }
  0x35   :  { %666 = vmatprep.subr.bf16.mxu1 %v762_v37 }
  0x37   :  { %484 = vmatpush1.bf16.msra.mxu0 %v749_v53 }
  0x38   :  { %667 = vmatpush3.bf16.msra.mxu1 %v752_v54  ;;  %485 = vmatprep.subr.bf16.mxu0 %v755_v55 }
  0x39   :  { %668 = vmatprep.subr.bf16.mxu1 %v762_v37 }
  0x3b   :  { %486 = vmatpush1.bf16.msra.mxu0 %v753_v56 }
  0x3c   :  { %669 = vmatpush3.bf16.msra.mxu1 %v756_v57  ;;  %487 = vmatprep.subr.bf16.mxu0 %v759_v58 }
  0x3d   :  { %670 = vmatprep.subr.bf16.mxu1 %v762_v37 }
  0x3f   :  { %488 = vmatpush1.bf16.msra.mxu0 %v757_v59 }
  0x40   :  { %671 = vmatpush3.bf16.msra.mxu1 %v760_v60 }
  0x42   :  { %506 = vmatmul.mubr.bf16.vlgmr.msra.gmra.mrb[4].mxu0 %v889_v34 }
  0x43   :  { %673 = vmatmul.mubr.bf16.vlgmr.msra.gmra.mrb[4].mxu1 %v889_v34 }
  0x90   :  { %v86_v61 = vpop.permute.xlu0 %85 }
  0x94   :  { %v91_v62 = vpop.permute.xlu0 %90 }
  0xf5   :  { %v421_v63 = vpop.f32.mrb[0].mxu0 }
  0xf6   :  { %v464_v0 = vpop.f32.mrb[0].mxu1  ;;  %v422_v1 = vadd.f32 %v421_v63, %v86_v61  ;;  %v423_v3 = vpop.f32.mrb[1].mxu0 }
  0xf7   :  { %v465_v2 = vadd.f32 %v464_v0, %v86_v61  ;;  %v466_v4 = vpop.f32.mrb[1].mxu1  ;;  %v424_v5 = vadd.f32 %v423_v3, %v86_v61  ;;  %v425_v7 = vpop.f32.mrb[2].mxu0 }
  0xf8   :  { %v467_v6 = vadd.f32 %v466_v4, %v86_v61  ;;  %v468_v8 = vpop.f32.mrb[2].mxu1  ;;  %v557_v9 = vmax.f32 %v422_v1, 0.0  ;;  %v426_v11 = vadd.f32 %v425_v7, %v91_v62  ;;  %v427_v13 = vpop.f32.mrb[3].mxu0 }
  0xf9   :  { %v559_v10 = vmax.f32 %v465_v2, 0.0  ;;  %v469_v12 = vadd.f32 %v468_v8, %v91_v62  ;;  %v470_v14 = vpop.f32.mrb[3].mxu1  ;;  %v558_v15 = vmax.f32 %v424_v5, 0.0  ;;  %v428_v17 = vadd.f32 %v427_v13, %v91_v62 }
  0xfa   :  { %v560_v16 = vmax.f32 %v467_v6, 0.0  ;;  %v471_v18 = vadd.f32 %v470_v14, %v91_v62  ;;  %571 = vst [vmem:[%s1018_s3] sm:$0xff] %v557_v9  ;;  %v564_v19 = vmax.f32 %v426_v11, 0.0 }
  0xfb   :  { %573 = vst [vmem:[%s1018_s3 + $0x10] sm:$0xff] %v559_v10  ;;  %v566_v20 = vmax.f32 %v469_v12, 0.0  ;;  %572 = vst [vmem:[%s1018_s3 + $0x8] sm:$0xff] %v558_v15  ;;  %v565_v21 = vmax.f32 %v428_v17, 0.0 }
  0xfc   :  { %574 = vst [vmem:[%s1018_s3 + $0x18] sm:$0xff] %v560_v16  ;;  %v567_v22 = vmax.f32 %v471_v18, 0.0  ;;  %579 = vst [vmem:[%s1018_s3 + $0x38] sm:$0xff] %v564_v19 }
  0xfd   :  { %581 = vst [vmem:[%s1018_s3 + $0x48] sm:$0xff] %v566_v20  ;;  %580 = vst [vmem:[%s1018_s3 + $0x40] sm:$0xff] %v565_v21 }
  0xfe   :  { %582 = vst [vmem:[%s1018_s3 + $0x50] sm:$0xff] %v567_v22 }
 0x115   :  { %v507_v23 = vpop.f32.mrb[4].mxu0 }
 0x116   :  { %v550_v24 = vpop.f32.mrb[4].mxu1  ;;  %v508_v25 = vadd.f32 %v507_v23, %v86_v61  ;;  %v509_v27 = vpop.f32.mrb[5].mxu0 }
 0x117   :  { %v551_v26 = vadd.f32 %v550_v24, %v86_v61  ;;  %v674_v28 = vpop.f32.mrb[5].mxu1  ;;  %v510_v29 = vadd.f32 %v509_v27, %v86_v61  ;;  %v511_v30 = vpop.f32.mrb[6].mxu0 }
 0x118   :  { %v553_v31 = vpop.f32.mrb[6].mxu1  ;;  %v561_v32 = vmax.f32 %v508_v25, 0.0  ;;  %v512_v34 = vadd.f32 %v511_v30, %v91_v62  ;;  %v513_v36 = vpop.f32.mrb[7].mxu0 }
 0x119   :  { %v563_v33 = vmax.f32 %v551_v26, 0.0  ;;  %v554_v35 = vadd.f32 %v553_v31, %v91_v62  ;;  %v675_v37 = vpop.f32.mrb[7].mxu1  ;;  %v562_v38 = vmax.f32 %v510_v29, 0.0  ;;  %v514_v39 = vadd.f32 %v513_v36, %v91_v62 }
 0x11a   :  { %575 = vst [vmem:[%s1018_s3 + $0x20] sm:$0xff] %v561_v32  ;;  %v568_v40 = vmax.f32 %v512_v34, 0.0 }
 0x11b   :  { %578 = vst.msk [vmem:[%s1018_s3 + $0x30] sm:$0xff] %vm577_vm1, %v563_v33  ;;  %v570_v41 = vmax.f32 %v554_v35, 0.0  ;;  %576 = vst [vmem:[%s1018_s3 + $0x28] sm:$0xff] %v562_v38  ;;  %v569_v42 = vmax.f32 %v514_v39, 0.0 }
 0x11c   :  { %583 = vst [vmem:[%s1018_s3 + $0x58] sm:$0xff] %v568_v40 }
 0x11d   :  { %585 = vst.msk [vmem:[%s1018_s3 + $0x68] sm:$0xff] %vm577_vm1, %v570_v41  ;;  %584 = vst [vmem:[%s1018_s3 + $0x60] sm:$0xff] %v569_v42 }

// kernel: _lambda_.6
= control target key start
LH: loop header
LB: loop body
LE: loop exit
PB: predicated region body
PF: predicated region fallthrough
CT: control target
= control target key end

     0   :  { %v341_v1 = vmov 0   ;;  %s446_s1 = inlined_call_operand.vmem [shape: bf16[256,128], index: 1, kind: input, shape index: {}]   ;;  %s447_s0 = inlined_call_operand.vmem [shape: bf16[32,256], index: 0, kind: input, shape index: {}]   ;;  %s448_s2 = inlined_call_operand.vmem [shape: f32[32,1], index: 2, kind: input, shape index: {}]   ;;  %s449_s3 = inlined_call_operand.vmem [shape: f32[32,128], index: 3, kind: output, shape index: {}]  }
   0x1   :  { %v319_v0 = vld [vmem:[%s446_s1 + $0x40] sm:$0xff]   ;;  %318 = vset.pattern.permute.xlu1 %v341_v1  ;;  %317 = vset.pattern.permute.xlu0 %v341_v1  ;;  %v321_v3 = vld [vmem:[%s446_s1 + $0x48] sm:$0xff]   ;;  %v323_v5 = vld [vmem:[%s446_s1 + $0x50] sm:$0xff]  }
   0x2   :  { %v320_v2 = vld [vmem:[%s446_s1] sm:$0xff]   ;;  %272 = vmatprep.subr.bf16.mxu0 %v319_v0  ;;  %300 = vmatprep.subr.bf16.mxu1 %v319_v0  ;;  %v322_v4 = vld [vmem:[%s446_s1 + $0x8] sm:$0xff]   ;;  %v324_v6 = vld [vmem:[%s446_s1 + $0x10] sm:$0xff]  }
   0x3   :  { %273 = vmatpush3.bf16.msra.mxu0 %v320_v2  ;;  %308 = vmatpush3.bf16.msra.mxu1 %v320_v2  ;;  %v325_v7 = vld [vmem:[%s446_s1 + $0x58] sm:$0xff]   ;;  %v327_v9 = vld [vmem:[%s446_s1 + $0x60] sm:$0xff]   ;;  %v329_v11 = vld [vmem:[%s446_s1 + $0x68] sm:$0xff]  }
   0x4   :  { %274 = vmatprep.subr.bf16.mxu0 %v321_v3  ;;  %301 = vmatprep.subr.bf16.mxu1 %v321_v3  ;;  %v326_v8 = vld [vmem:[%s446_s1 + $0x18] sm:$0xff]   ;;  %v328_v10 = vld [vmem:[%s446_s1 + $0x20] sm:$0xff]   ;;  %v330_v14 = vld [vmem:[%s446_s1 + $0x28] sm:$0xff]  }
   0x5   :  { %v337_v12 = vld [vmem:[%s447_s0 + $0x4] ss:$8 sps:$4 sm:$0xff]   ;;  %v340_v13 = vld [vmem:[%s447_s0 + $0x14] ss:$8 sps:$4 sm:$0xff]   ;;  %v335_v23 = vld [vmem:[%s447_s0] ss:$8 sps:$4 sm:$0xff]  }
   0x6   :  { %v53_v15 = vld [vmem:[%s448_s2 + $0x10] sm:$0xff]  ;;  %v51_v16 = vld [vmem:[%s448_s2] sm:$0xff]  ;;  %223 = vmatprep.mubr.bf16.mxu0 %v337_v12  ;;  %231 = vmatprep.mubr.bf16.mxu1 %v340_v13  ;;  %v54_v19 = vld [vmem:[%s448_s2 + $0x18] sm:$0xff] }
   0x7   :  { %275 = vmatpush3.bf16.msra.mxu0 %v322_v4  ;;  %309 = vmatpush3.bf16.msra.mxu1 %v322_v4  ;;  %v331_v17 = vld [vmem:[%s446_s1 + $0x70] sm:$0xff]   ;;  %v52_v20 = vld [vmem:[%s448_s2 + $0x8] sm:$0xff]  ;;  %v333_v21 = vld [vmem:[%s446_s1 + $0x78] sm:$0xff]  }
   0x8   :  { %276 = vmatprep.subr.bf16.mxu0 %v323_v5  ;;  %302 = vmatprep.subr.bf16.mxu1 %v323_v5  ;;  %v332_v18 = vld [vmem:[%s446_s1 + $0x30] sm:$0xff]   ;;  %v334_v22 = vld [vmem:[%s446_s1 + $0x38] sm:$0xff]  }
   0x9   :  { %67 = vperm.xlu1 %318, %v53_v15   ;;  %57 = vperm.xlu0 %317, %v51_v16   ;;  %v338_v24 = vld [vmem:[%s447_s0 + $0x10] ss:$8 sps:$4 sm:$0xff]  }
   0xb   :  { %277 = vmatpush3.bf16.msra.mxu0 %v324_v6  ;;  %310 = vmatpush3.bf16.msra.mxu1 %v324_v6 }
   0xc   :  { %278 = vmatprep.subr.bf16.mxu0 %v325_v7  ;;  %303 = vmatprep.subr.bf16.mxu1 %v325_v7 }
   0xd   :  { %72 = vperm.xlu1 %318, %v54_v19   ;;  %62 = vperm.xlu0 %317, %v52_v20  }
   0xf   :  { %279 = vmatpush3.bf16.msra.mxu0 %v326_v8  ;;  %311 = vmatpush3.bf16.msra.mxu1 %v326_v8 }
  0x10   :  { %280 = vmatprep.subr.bf16.mxu0 %v327_v9  ;;  %304 = vmatprep.subr.bf16.mxu1 %v327_v9 }
  0x13   :  { %281 = vmatpush3.bf16.msra.mxu0 %v328_v10  ;;  %312 = vmatpush3.bf16.msra.mxu1 %v328_v10 }
  0x14   :  { %282 = vmatprep.subr.bf16.mxu0 %v329_v11  ;;  %305 = vmatprep.subr.bf16.mxu1 %v329_v11 }
  0x17   :  { %283 = vmatpush3.bf16.msra.mxu0 %v330_v14  ;;  %313 = vmatpush3.bf16.msra.mxu1 %v330_v14 }
  0x18   :  { %284 = vmatprep.subr.bf16.mxu0 %v331_v17  ;;  %306 = vmatprep.subr.bf16.mxu1 %v331_v17 }
  0x1b   :  { %285 = vmatpush3.bf16.msra.mxu0 %v332_v18  ;;  %314 = vmatpush3.bf16.msra.mxu1 %v332_v18 }
  0x1c   :  { %286 = vmatprep.subr.bf16.mxu0 %v333_v21  ;;  %307 = vmatprep.subr.bf16.mxu1 %v333_v21 }
  0x1f   :  { %287 = vmatpush3.bf16.msra.mxu0 %v334_v22  ;;  %315 = vmatpush3.bf16.msra.mxu1 %v334_v22 }
  0x22   :  { %224 = vmatmul.mubr.bf16.vlgmr.msra.gmra.mrb[0].mxu0 %v335_v23  ;;  %232 = vmatmul.mubr.bf16.vlgmr.msra.gmra.mrb[0].mxu1 %v338_v24 }
  0x88   :  { %v68_v25 = vpop.permute.xlu1 %67  ;;  %v58_v26 = vpop.permute.xlu0 %57 }
  0x8c   :  { %v73_v41 = vpop.permute.xlu1 %72  ;;  %v63_v42 = vpop.permute.xlu0 %62 }
  0xf5   :  { %v288_v27 = vpop.f32.mrb[0].mxu0  ;;  %v294_v28 = vpop.f32.mrb[0].mxu1 }
  0xf6   :  { %v289_v29 = vpop.f32.mrb[1].mxu0  ;;  %v295_v30 = vpop.f32.mrb[1].mxu1 }
  0xf7   :  { %v290_v31 = vadd.f32 %v289_v29, %v288_v27  ;;  %v296_v32 = vadd.f32 %v295_v30, %v294_v28  ;;  %v291_v33 = vpop.f32.mrb[2].mxu0  ;;  %v297_v34 = vpop.f32.mrb[2].mxu1 }
  0xf8   :  { %v292_v35 = vpop.f32.mrb[3].mxu0  ;;  %v298_v36 = vpop.f32.mrb[3].mxu1 }
  0xf9   :  { %v226_v37 = vadd.f32 %v290_v31, %v58_v26  ;;  %v234_v38 = vadd.f32 %v296_v32, %v68_v25  ;;  %v293_v39 = vadd.f32 %v292_v35, %v291_v33  ;;  %v299_v40 = vadd.f32 %v298_v36, %v297_v34 }
  0xfb   :  { %v240_v43 = vmax.f32 %v226_v37, 0.0  ;;  %v242_v44 = vmax.f32 %v234_v38, 0.0  ;;  %v229_v45 = vadd.f32 %v293_v39, %v63_v42  ;;  %v237_v46 = vadd.f32 %v299_v40, %v73_v41 }
  0xfd   :  { %244 = vst [vmem:[%s449_s3] sm:$0xff] %v240_v43  ;;  %246 = vst [vmem:[%s449_s3 + $0x10] sm:$0xff] %v242_v44  ;;  %v241_v47 = vmax.f32 %v229_v45, 0.0  ;;  %v243_v48 = vmax.f32 %v237_v46, 0.0 }
  0xff   :  { %245 = vst [vmem:[%s449_s3 + $0x8] sm:$0xff] %v241_v47  ;;  %247 = vst [vmem:[%s449_s3 + $0x18] sm:$0xff] %v243_v48 }

// kernel: _lambda_.7
= control target key start
LH: loop header
LB: loop body
LE: loop exit
PB: predicated region body
PF: predicated region fallthrough
CT: control target
= control target key end

     0   :  { %vm3328_vm0 = vmmov 0   ;;  %vm382_vm1 = vcmask 64512   ;;  %vm301_vm4 = vcmask 261120   ;;  %s4061_s2 = inlined_call_operand.vmem [shape: f32[512,32], index: 2, kind: input, shape index: {}]   ;;  %s4062_s0 = inlined_call_operand.vmem [shape: f32[8,512], index: 0, kind: input, shape index: {}]   ;;  %s4063_s5 = inlined_call_operand.vmem [shape: f32[8,96], index: 5, kind: input, shape index: {}]   ;;  %s4064_s6 = inlined_call_operand.vmem [shape: f32[32,96], index: 6, kind: input, shape index: {}]   ;;  %s4065_s1 = inlined_call_operand.vmem [shape: f32[2,8], index: 1, kind: input, shape index: {}]   ;;  %s4066_s4 = inlined_call_operand.vmem [shape: f32[32,96], index: 4, kind: input, shape index: {}]   ;;  %s4067_s3 = inlined_call_operand.vmem [shape: f32[1,32], index: 3, kind: input, shape index: {}]   ;;  %s4068_s8 = inlined_call_operand.vmem [shape: f32[1,96], index: 8, kind: input, shape index: {}]   ;;  %s4069_s9 = inlined_call_operand.vmem [shape: f32[32,96], index: 9, kind: input, shape index: {}]   ;;  %s4070_s7 = inlined_call_operand.vmem [shape: f32[1,96], index: 7, kind: input, shape index: {}]   ;;  %s4071_s11 = inlined_call_operand.vmem [shape: f32[32,96], index: 11, kind: input, shape index: {}]   ;;  %s4072_s13 = inlined_call_operand.vmem [shape: f32[1,96], index: 13, kind: input, shape index: {}]   ;;  %s4073_s10 = inlined_call_operand.vmem [shape: f32[8,96], index: 10, kind: input, shape index: {}]   ;;  %s4074_s12 = inlined_call_operand.vmem [shape: f32[1,96], index: 12, kind: input, shape index: {}]   ;;  %s4075_s14 = inlined_call_operand.vmem [shape: f32[32,8], index: 14, kind: input, shape index: {}]   ;;  %s4076_s15 = inlined_call_operand.vmem [shape: f32[32,8], index: 15, kind: input, shape index: {}]   ;;  %s4077_s16 = inlined_call_operand.vmem [shape: f32[1,8], index: 16, kind: input, shape index: {}]   ;;  %s4078_s17 = inlined_call_operand.vmem [shape: f32[8,8], index: 17, kind: output, shape index: {}]  }
   0x1   :  { %4081 = sst [smem:[#allocation2_spill]] %s4061_s2 }
   0x2   :  { %4082 = sst [smem:[#allocation3_spill]] %s4062_s0  ;;  %s4083_s26 = sld [smem:[#allocation2_spill]] }
   0x3   :  { %s4084_s27 = sld [smem:[#allocation3_spill]] }
   0x8   :  { %v76_v0 = vld [vmem:[%s4083_s26 + $0x80] sm:$0xff]  ;;  %v77_v1 = vld [vmem:[%s4083_s26 + $0x88] sm:$0xff]  ;;  %v78_v11 = vld [vmem:[%s4083_s26 + $0x90] sm:$0xff] }
   0x9   :  { %v60_v2 = vld [vmem:[%s4083_s26] sm:$0xff]  ;;  %v3065_v3 = vpack.c.bf16 %v77_v1, %v76_v0  ;;  %v61_v4 = vld [vmem:[%s4083_s26 + $0x8] sm:$0xff]  ;;  %v79_v13 = vld [vmem:[%s4083_s26 + $0x98] sm:$0xff] }
   0xa   :  { %v108_v5 = vld [vmem:[%s4083_s26 + $0x180] sm:$0xff]  ;;  %v109_v6 = vld [vmem:[%s4083_s26 + $0x188] sm:$0xff]  ;;  %v3067_v7 = vpack.c.bf16 %v61_v4, %v60_v2  ;;  %v62_v14 = vld [vmem:[%s4083_s26 + $0x10] sm:$0xff]  ;;  %v3069_v16 = vpack.c.bf16 %v79_v13, %v78_v11 }
   0xb   :  { %v3097_v8 = vpack.c.bf16 %v109_v6, %v108_v5  ;;  %v92_v9 = vld [vmem:[%s4083_s26 + $0x100] sm:$0xff]  ;;  %v93_v10 = vld [vmem:[%s4083_s26 + $0x108] sm:$0xff]  ;;  %3066 = vmatprep.subr.bf16.mxu0 %v3065_v3  ;;  %v63_v15 = vld [vmem:[%s4083_s26 + $0x18] sm:$0xff] }
   0xc   :  { %v3099_v12 = vpack.c.bf16 %v93_v10, %v92_v9  ;;  %3068 = vmatpush3.bf16.msra.mxu0 %v3067_v7  ;;  %v3071_v17 = vpack.c.bf16 %v63_v15, %v62_v14  ;;  %v110_v18 = vld [vmem:[%s4083_s26 + $0x190] sm:$0xff]  ;;  %v111_v19 = vld [vmem:[%s4083_s26 + $0x198] sm:$0xff]  ;;  %v80_v23 = vld [vmem:[%s4083_s26 + $0xa0] sm:$0xff] }
   0xd   :  { %3098 = vmatprep.subr.bf16.mxu1 %v3097_v8  ;;  %v94_v20 = vld [vmem:[%s4083_s26 + $0x110] sm:$0xff]  ;;  %v3101_v21 = vpack.c.bf16 %v111_v19, %v110_v18  ;;  %v95_v22 = vld [vmem:[%s4083_s26 + $0x118] sm:$0xff]  ;;  %v81_v24 = vld [vmem:[%s4083_s26 + $0xa8] sm:$0xff]  ;;  %3070 = vmatprep.subr.bf16.mxu0 %v3069_v16 }
   0xe   :  { %3100 = vmatpush3.bf16.msra.mxu1 %v3099_v12  ;;  %v3103_v25 = vpack.c.bf16 %v95_v22, %v94_v20  ;;  %v3073_v26 = vpack.c.bf16 %v81_v24, %v80_v23  ;;  %v64_v27 = vld [vmem:[%s4083_s26 + $0x20] sm:$0xff]  ;;  %v65_v28 = vld [vmem:[%s4083_s26 + $0x28] sm:$0xff]  ;;  %v82_v35 = vld [vmem:[%s4083_s26 + $0xb0] sm:$0xff] }
   0xf   :  { %v112_v29 = vld [vmem:[%s4083_s26 + $0x1a0] sm:$0xff]  ;;  %3102 = vmatprep.subr.bf16.mxu1 %v3101_v21  ;;  %v113_v30 = vld [vmem:[%s4083_s26 + $0x1a8] sm:$0xff]  ;;  %v3075_v33 = vpack.c.bf16 %v65_v28, %v64_v27  ;;  %v83_v36 = vld [vmem:[%s4083_s26 + $0xb8] sm:$0xff] }
  0x10   :  { %v96_v31 = vld [vmem:[%s4083_s26 + $0x120] sm:$0xff]  ;;  %v97_v32 = vld [vmem:[%s4083_s26 + $0x128] sm:$0xff]  ;;  %3072 = vmatpush3.bf16.msra.mxu0 %v3071_v17  ;;  %v3105_v34 = vpack.c.bf16 %v113_v30, %v112_v29  ;;  %v66_v37 = vld [vmem:[%s4083_s26 + $0x30] sm:$0xff]  ;;  %v3077_v39 = vpack.c.bf16 %v83_v36, %v82_v35  ;;  %v3326_v36 = vmov 0.0|0.0  }
  0x11   :  { %3074 = vmatprep.subr.bf16.mxu0 %v3073_v26  ;;  %v3107_v38 = vpack.c.bf16 %v97_v32, %v96_v31  ;;  %v67_v40 = vld [vmem:[%s4083_s26 + $0x38] sm:$0xff]  ;;  %v114_v41 = vld [vmem:[%s4083_s26 + $0x1b0] sm:$0xff]  ;;  %v84_v46 = vld [vmem:[%s4083_s26 + $0xc0] sm:$0xff] }
  0x12   :  { %3104 = vmatpush3.bf16.msra.mxu1 %v3103_v25  ;;  %v115_v42 = vld [vmem:[%s4083_s26 + $0x1b8] sm:$0xff]  ;;  %v98_v44 = vld [vmem:[%s4083_s26 + $0x130] sm:$0xff]  ;;  %v85_v47 = vld [vmem:[%s4083_s26 + $0xc8] sm:$0xff]  ;;  %v3079_v48 = vpack.c.bf16 %v67_v40, %v66_v37  ;;  %v3327_v37 = vmov 0.0  }
  0x13   :  { %3106 = vmatprep.subr.bf16.mxu1 %v3105_v34  ;;  %v3109_v43 = vpack.c.bf16 %v115_v42, %v114_v41  ;;  %v99_v45 = vld [vmem:[%s4083_s26 + $0x138] sm:$0xff]  ;;  %v116_v49 = vld [vmem:[%s4083_s26 + $0x1c0] sm:$0xff]  ;;  %v117_v50 = vld [vmem:[%s4083_s26 + $0x1c8] sm:$0xff]  ;;  %v3081_v52 = vpack.c.bf16 %v85_v47, %v84_v46 }
  0x14   :  { %3076 = vmatpush3.bf16.msra.mxu0 %v3075_v33  ;;  %v3111_v51 = vpack.c.bf16 %v99_v45, %v98_v44  ;;  %v68_v53 = vld [vmem:[%s4083_s26 + $0x40] sm:$0xff]  ;;  %v69_v54 = vld [vmem:[%s4083_s26 + $0x48] sm:$0xff]  ;;  %v3113_v56 = vpack.c.bf16 %v117_v50, %v116_v49  ;;  %v86_v58 = vld [vmem:[%s4083_s26 + $0xd0] sm:$0xff] }
  0x15   :  { %3078 = vmatprep.subr.bf16.mxu0 %v3077_v39  ;;  %v100_v55 = vld [vmem:[%s4083_s26 + $0x140] sm:$0xff]  ;;  %v101_v57 = vld [vmem:[%s4083_s26 + $0x148] sm:$0xff]  ;;  %v87_v59 = vld [vmem:[%s4083_s26 + $0xd8] sm:$0xff]  ;;  %v3083_v62 = vpack.c.bf16 %v69_v54, %v68_v53 }
  0x16   :  { %3108 = vmatpush3.bf16.msra.mxu1 %v3107_v38  ;;  %v118_v60 = vld [vmem:[%s4083_s26 + $0x1d0] sm:$0xff]  ;;  %v119_v61 = vld [vmem:[%s4083_s26 + $0x1d8] sm:$0xff]  ;;  %v3115_v63 = vpack.c.bf16 %v101_v57, %v100_v55  ;;  %v3085_v0 = vpack.c.bf16 %v87_v59, %v86_v58  ;;  %v88_v6 = vld [vmem:[%s4083_s26 + $0xe0] sm:$0xff] }
  0x17   :  { %3110 = vmatprep.subr.bf16.mxu1 %v3109_v43  ;;  %v70_v1 = vld [vmem:[%s4083_s26 + $0x50] sm:$0xff]  ;;  %v71_v2 = vld [vmem:[%s4083_s26 + $0x58] sm:$0xff]  ;;  %v3117_v4 = vpack.c.bf16 %v119_v61, %v118_v60  ;;  %v89_v7 = vld [vmem:[%s4083_s26 + $0xe8] sm:$0xff] }
  0x18   :  { %3080 = vmatpush3.bf16.msra.mxu0 %v3079_v48  ;;  %v102_v3 = vld [vmem:[%s4083_s26 + $0x150] sm:$0xff]  ;;  %v103_v5 = vld [vmem:[%s4083_s26 + $0x158] sm:$0xff]  ;;  %v120_v8 = vld [vmem:[%s4083_s26 + $0x1e0] sm:$0xff]  ;;  %v3087_v10 = vpack.c.bf16 %v71_v2, %v70_v1  ;;  %v3089_v14 = vpack.c.bf16 %v89_v7, %v88_v6 }
  0x19   :  { %3082 = vmatprep.subr.bf16.mxu0 %v3081_v52  ;;  %v121_v9 = vld [vmem:[%s4083_s26 + $0x1e8] sm:$0xff]  ;;  %v72_v11 = vld [vmem:[%s4083_s26 + $0x60] sm:$0xff]  ;;  %v3119_v13 = vpack.c.bf16 %v103_v5, %v102_v3  ;;  %v90_v19 = vld [vmem:[%s4083_s26 + $0xf0] sm:$0xff] }
  0x1a   :  { %3112 = vmatpush3.bf16.msra.mxu1 %v3111_v51  ;;  %v73_v12 = vld [vmem:[%s4083_s26 + $0x68] sm:$0xff]  ;;  %v104_v15 = vld [vmem:[%s4083_s26 + $0x160] sm:$0xff]  ;;  %v3121_v18 = vpack.c.bf16 %v121_v9, %v120_v8  ;;  %v91_v20 = vld [vmem:[%s4083_s26 + $0xf8] sm:$0xff] }
  0x1b   :  { %3114 = vmatprep.subr.bf16.mxu1 %v3113_v56  ;;  %v105_v16 = vld [vmem:[%s4083_s26 + $0x168] sm:$0xff]  ;;  %v59_v21 = vld [vmem:[%s4084_s27 + $0x18] sm:$0xff]  ;;  %v122_v22 = vld [vmem:[%s4083_s26 + $0x1f0] sm:$0xff]  ;;  %v3091_v24 = vpack.c.bf16 %v73_v12, %v72_v11  ;;  %v3093_v26 = vpack.c.bf16 %v91_v20, %v90_v19 }
  0x1c   :  { %3084 = vmatpush3.bf16.msra.mxu0 %v3083_v62  ;;  %v57_v17 = vld [vmem:[%s4084_s27 + $0x8] sm:$0xff]  ;;  %v123_v23 = vld [vmem:[%s4083_s26 + $0x1f8] sm:$0xff]  ;;  %265 = vmatprep.mubr.f32.mxu1 %v59_v21  ;;  %v3123_v25 = vpack.c.bf16 %v105_v16, %v104_v15  ;;  %v74_v27 = vld [vmem:[%s4083_s26 + $0x70] sm:$0xff] }
  0x1d   :  { %3086 = vmatprep.subr.bf16.mxu0 %v3085_v0  ;;  %195 = vmatprep.mubr.f32.mxu0 %v57_v17  ;;  %v75_v28 = vld [vmem:[%s4083_s26 + $0x78] sm:$0xff]  ;;  %v3125_v29 = vpack.c.bf16 %v123_v23, %v122_v22  ;;  %v106_v30 = vld [vmem:[%s4083_s26 + $0x170] sm:$0xff]  ;;  %v56_v34 = vld [vmem:[%s4084_s27] sm:$0xff] }
  0x1e   :  { %3116 = vmatpush3.bf16.msra.mxu1 %v3115_v63  ;;  %v107_v31 = vld [vmem:[%s4083_s26 + $0x178] sm:$0xff]  ;;  %v3095_v32 = vpack.c.bf16 %v75_v28, %v74_v27  ;;  %v58_v35 = vld [vmem:[%s4084_s27 + $0x10] sm:$0xff]  ;;  %v283_v38 = vld [vmem:[%s4063_s5] sm:$0xff] }
  0x1f   :  { %3118 = vmatprep.subr.bf16.mxu1 %v3117_v4  ;;  %v3127_v33 = vpack.c.bf16 %v107_v31, %v106_v30  ;;  %v284_v39 = vld [vmem:[%s4064_s6] sm:$0xff]  ;;  %v285_v40 = vld [vmem:[%s4064_s6 + $0x8] sm:$0xff]  ;;  %v286_v43 = vld [vmem:[%s4064_s6 + $0x10] sm:$0xff] }
  0x20   :  { %3088 = vmatpush3.bf16.msra.mxu0 %v3087_v10  ;;  %v3643_v41 = vld [vmem:[%s4065_s1] sm:$0x3]  ;;  %v3645_v42 = vpack.c.bf16 %v285_v40, %v284_v39  ;;  %v287_v44 = vld [vmem:[%s4064_s6 + $0x18] sm:$0xff]  ;;  %v280_v47 = vld [vmem:[%s4066_s4 + $0x8] sm:$0xff] }
  0x21   :  { %3090 = vmatprep.subr.bf16.mxu0 %v3089_v14  ;;  %v3657_v45 = vpack.c.bf16 %v287_v44, %v286_v43  ;;  %v279_v46 = vld [vmem:[%s4066_s4] sm:$0xff]  ;;  %v281_v49 = vld [vmem:[%s4066_s4 + $0x10] sm:$0xff]  ;;  %v282_v50 = vld [vmem:[%s4066_s4 + $0x18] sm:$0xff] }
  0x22   :  { %3120 = vmatpush3.bf16.msra.mxu1 %v3119_v13  ;;  %v3130_v48 = vpack.c.bf16 %v280_v47, %v279_v46  ;;  %v3133_v51 = vpack.c.bf16 %v282_v50, %v281_v49  ;;  %v2559_v53 = vld [vmem:[%s4067_s3] ss:$0 sm:$0xff]  ;;  %s3329_s3 = smov 64   ;;  %v291_v10 = vld [vmem:[%s4069_s9 + $0x8] sm:$0xff]  ;;  %v292_v13 = vld [vmem:[%s4069_s9 + $0x10] sm:$0xff] }
  0x23   :  { %3122 = vmatprep.subr.bf16.mxu1 %v3121_v18  ;;  %v3693_v1 = vld [vmem:[%s4068_s8] ss:$0 sm:$0xff]  ;;  %v293_v14 = vld [vmem:[%s4069_s9 + $0x18] sm:$0xff] }
  0x24   :  { %3092 = vmatpush3.bf16.msra.mxu0 %v3091_v24  ;;  %v290_v9 = vld [vmem:[%s4069_s9] sm:$0xff]  ;;  %v3738_v15 = vpack.c.bf16 %v293_v14, %v292_v13 }
  0x25   :  { %3094 = vmatprep.subr.bf16.mxu0 %v3093_v26  ;;  %v3726_v11 = vpack.c.bf16 %v291_v10, %v290_v9  ;;  %v2561_v16 = vld [vmem:[%s4070_s7] ss:$0 sm:$0xff]  ;;  %s3330_s7 = smov 96  }
  0x26   :  { %3124 = vmatpush3.bf16.msra.mxu1 %v3123_v25 }
  0x27   :  { %3126 = vmatprep.subr.bf16.mxu1 %v3125_v29 }
  0x28   :  { %3096 = vmatpush3.bf16.msra.mxu0 %v3095_v32 }
  0x29   :  { %3129 = vmatprep.subr.bf16.mxu0 %v3326_v36 }
  0x2a   :  { %3128 = vmatpush3.bf16.msra.mxu1 %v3127_v33 }
  0x2b   :  { %2802 = vmatprep.subr.mxu1 %v3327_v37  ;;  %196 = vmatmul.mubr.f32.vlgmr.msra.gmra.mrb[0].mxu0 %v56_v34 }
  0x2c   :  { %2799 = vmatprep.mubr.msk.f32.mxu0 %vm3328_vm0, %v3327_v37  ;;  %3131 = vmatpush3.bf16.msra.mxu0 %v3130_v48 }
  0x2d   :  { %266 = vmatmul.mubr.f32.vlgmr.msra.gmra.mrb[0].mxu1 %v58_v35  ;;  %3132 = vmatprep.subr.bf16.mxu0 %v3326_v36 }
  0x2e   :  { %2803 = vmatpush3.msra.mxu1 %v283_v38  ;;  %2804 = vmatprep.mubr.msk.f32.mxu1 %vm3328_vm0, %v3327_v37 }
  0x2f   :  { %3135 = vmatprep.subr.bf16.mxu1 %v3326_v36 }
  0x30   :  { %3134 = vmatpush3.bf16.msra.mxu0 %v3133_v51 }
  0x31   :  { %2805 = vmatmul.mubr.msk.f32.vlgmr.msra.gmra.mrb[2].mxu1 %vm382_vm1, %v3643_v41  ;;  %3141 = vmatprep.subr.bf16.mxu0 %v3326_v36 }
  0x32   :  { %3137 = vmatpush3.bf16.msra.mxu1 %v3645_v42  ;;  %2815 = vmatprep.mubr.msk.f32.mxu1 %vm3328_vm0, %v3327_v37 }
  0x33   :  { %3138 = vmatprep.subr.bf16.mxu1 %v3326_v36 }
  0x36   :  { %3140 = vmatpush3.bf16.msra.mxu1 %v3657_v45 }
  0x37   :  { %3147 = vmatprep.subr.bf16.mxu1 %v3326_v36 }
  0x39   :  { %2816 = vmatmul.mubr.f32.vlgmr.msra.gmra.mrb[4].mxu1 %v3327_v37 }
  0x3a   :  { %3149 = vmatpush3.bf16.msra.mxu1 %v3645_v42  ;;  %2837 = vmatprep.mubr.msk.f32.mxu1 %vm3328_vm0, %v3327_v37 }
  0x3b   :  { %3150 = vmatprep.subr.bf16.mxu1 %v3326_v36 }
  0x3e   :  { %3152 = vmatpush3.bf16.msra.mxu1 %v3657_v45 }
  0x3f   :  { %3159 = vmatprep.subr.bf16.mxu1 %v3326_v36 }
  0xfe   :  { %v2629_v52 = vpop.f32.mrb[0].mxu0 }
  0xff   :  { %v2630_v54 = vpop.f32.mrb[1].mxu0 }
 0x100   :  { %v2664_v55 = vpop.f32.mrb[0].mxu1  ;;  %v2631_v56 = vadd.f32 %v2630_v54, %v2629_v52 }
 0x101   :  { %v2665_v57 = vpop.f32.mrb[1].mxu1 }
 0x102   :  { %v2666_v58 = vadd.f32 %v2665_v57, %v2664_v55  ;;  %v198_v59 = vadd.f32 %v2631_v56, %v2559_v53 }
 0x104   :  { %v3688_v60 = vpop.f32.mrb[2].mxu1  ;;  %v268_v61 = vadd.f32 %v2666_v58, %v198_v59 }
 0x105   :  { %v2806_v62 = vpop.f32.mrb[3].mxu1 }
 0x106   :  { %v271_v63 = vmax.f32 %v268_v61, 0.0 }
 0x108   :  { %vm272_vm2 = vcmp.ne.f32.partialorder %v271_v63, %v271_v63 }
 0x109   :  { %v273_v0 = vsel %vm272_vm2, 0.0, %v271_v63 }
 0x10a   :  { %vm274_vm3 = vcmp.gt.f32.partialorder %v273_v0, 3.4028235e+38 }
 0x10b   :  { %v275_v2 = vsel %vm274_vm3, 1.0, %v273_v0 }
 0x10c   :  { %v532_v3 = vpop.f32.mrb[4].mxu1  ;;  %vm276_vm5 = vcmp.lt.f32.partialorder %v275_v2, -3.4028235e+38 }
 0x10d   :  { %v533_v4 = vadd.f32 %v3693_v1, %v532_v3  ;;  %v2817_v5 = vpop.f32.mrb[5].mxu1  ;;  %v3696_v6 = vsel %vm276_vm5, -1.0, %v275_v2 }
 0x10e   :  { %2800 = vmatmul.mubr.msk.f32.vlgmr.msra.gmra.mrb[2].mxu0 %vm301_vm4, %v3696_v6  ;;  %v562_v7 = vrot.slane %v3696_v6, 2  ;;  %v738_v8 = vrot.slane %v3696_v6, 4  ;;  %v914_v12 = vrot.slane %v3696_v6, 6 }
 0x10f   :  { %544 = vrot.lane.b32.xlu0 %v533_v4, %s3329_s3  ;;  %3143 = vmatpush3.bf16.msra.mxu0 %v3130_v48 }
 0x110   :  { %2826 = vmatprep.mubr.msk.f32.mxu0 %vm3328_vm0, %v3327_v37  ;;  %3144 = vmatprep.subr.bf16.mxu0 %v3326_v36 }
 0x113   :  { %3146 = vmatpush3.bf16.msra.mxu0 %v3133_v51 }
 0x114   :  { %3153 = vmatprep.subr.bf16.mxu0 %v3326_v36 }
 0x116   :  { %2827 = vmatmul.mubr.msk.f32.vlgmr.msra.gmra.mrb[4].mxu0 %vm301_vm4, %v562_v7 }
 0x117   :  { %3155 = vmatpush3.bf16.msra.mxu0 %v3130_v48  ;;  %2848 = vmatprep.mubr.msk.f32.mxu0 %vm3328_vm0, %v3327_v37 }
 0x118   :  { %3156 = vmatprep.subr.bf16.mxu0 %v3326_v36 }
 0x11b   :  { %3158 = vmatpush3.bf16.msra.mxu0 %v3133_v51 }
 0x11c   :  { %3165 = vmatprep.subr.bf16.mxu0 %v3326_v36 }
 0x11e   :  { %2849 = vmatmul.mubr.msk.f32.vlgmr.msra.gmra.mrb[6].mxu0 %vm301_vm4, %v738_v8 }
 0x11f   :  { %3167 = vmatpush3.bf16.msra.mxu0 %v3130_v48  ;;  %2870 = vmatprep.mubr.msk.f32.mxu0 %vm3328_vm0, %v3327_v37 }
 0x120   :  { %3168 = vmatprep.subr.bf16.mxu0 %v3326_v36 }
 0x123   :  { %3170 = vmatpush3.bf16.msra.mxu0 %v3133_v51 }
 0x124   :  { %3177 = vmatprep.subr.bf16.mxu0 %v3326_v36 }
 0x126   :  { %2871 = vmatmul.mubr.msk.f32.vlgmr.msra.gmra.mrb[8].mxu0 %vm301_vm4, %v914_v12 }
 0x127   :  { %3179 = vmatpush3.bf16.msra.mxu0 %v3726_v11  ;;  %2892 = vmatprep.mubr.msk.f32.mxu0 %vm3328_vm0, %v3327_v37 }
 0x128   :  { %3180 = vmatprep.subr.bf16.mxu0 %v3326_v36 }
 0x12b   :  { %3182 = vmatpush3.bf16.msra.mxu0 %v3738_v15 }
 0x12c   :  { %3183 = vmatprep.subr.bf16.mxu0 %v3326_v36 }
 0x12e   :  { %2893 = vmatmul.mubr.msk.f32.vlgmr.msra.gmra.mrb[10].mxu0 %vm301_vm4, %v914_v12 }
 0x12f   :  { %2908 = vmatprep.mubr.msk.f32.mxu0 %vm3328_vm0, %v3327_v37 }
 0x181   :  { %v545_v39 = vpop.permute.xlu0 %544 }
 0x1e1   :  { %v371_v17 = vpop.f32.mrb[2].mxu0 }
 0x1e2   :  { %v381_v18 = vadd.f32 %v2561_v16, %v371_v17  ;;  %v2801_v19 = vpop.f32.mrb[3].mxu0 }
 0x1e4   :  { %v456_v20 = vadd.f32 %v3688_v60, %v381_v18 }
 0x1e6   :  { %v536_v21 = vadd.f32 %v533_v4, %v456_v20 }
 0x1e8   :  { %v2564_v22 = vmul.f32 -1.442695, %v536_v21 }
 0x1e9   :  { %v631_v23 = vpop.f32.mrb[4].mxu0 }
 0x1ea   :  { %3278 = vpow2.f32 %v2564_v22  ;;  %v635_v24 = vadd.f32 %v2561_v16, %v631_v23  ;;  %v2828_v25 = vpop.f32.mrb[5].mxu0 }
 0x1ec   :  { %v636_v26 = vadd.f32 %v635_v24, %v3688_v60 }
 0x1f1   :  { %v807_v27 = vpop.f32.mrb[6].mxu0 }
 0x1f2   :  { %v811_v28 = vadd.f32 %v2561_v16, %v807_v27  ;;  %v2850_v29 = vpop.f32.mrb[7].mxu0  ;;  %v295_v27 = vld [vmem:[%s4071_s11] sm:$0xff] }
 0x1f3   :  { %v297_v29 = vld [vmem:[%s4071_s11 + $0x10] sm:$0xff] }
 0x1f4   :  { %v3279_v30 = vpop.eup %3278  ;;  %v3754_v31 = vadd.f32 %v811_v28, %v3688_v60  ;;  %v296_v28 = vld [vmem:[%s4071_s11 + $0x8] sm:$0xff] }
 0x1f5   :  { %v540_v32 = vadd.f32 1.0, %v3279_v30  ;;  %v3804_v30 = vpack.c.bf16 %v296_v28, %v295_v27 }
 0x1f7   :  { %3280 = vrcp.f32 %v540_v32  ;;  %v298_v32 = vld [vmem:[%s4071_s11 + $0x18] sm:$0xff]  ;;  %3185 = vmatpush3.bf16.msra.mxu0 %v3804_v30 }
 0x1f8   :  { %3186 = vmatprep.subr.bf16.mxu0 %v3326_v36 }
 0x1f9   :  { %v983_v33 = vpop.f32.mrb[8].mxu0 }
 0x1fa   :  { %v987_v34 = vadd.f32 %v2561_v16, %v983_v33  ;;  %v2872_v35 = vpop.f32.mrb[9].mxu0 }
 0x1fc   :  { %v3757_v38 = vadd.f32 %v987_v34, %v3688_v60 }
 0x201   :  { %v3281_v40 = vpop.eup %3280  ;;  %v3759_v43 = vpop.f32.mrb[10].mxu0 }
 0x202   :  { %v547_v44 = vmul.f32 %v3281_v40, %v545_v39  ;;  %v2894_v46 = vpop.f32.mrb[11].mxu0  ;;  %v554_v50 = vsub.f32 1.0, %v3281_v40  ;;  %v560_v52 = vmul.f32 0.0, %v3281_v40 }
 0x203   :  { %v3831_v46 = vld [vmem:[%s4072_s13] ss:$0 sm:$0xff] }
 0x204   :  { %549 = vrot.lane.b32.xlu0 %v547_v44, %s3329_s3 }
 0x276   :  { %v550_v47 = vpop.permute.xlu0 %549 }
 0x277   :  { %v552_v48 = vadd.f32 %v550_v47, %v456_v20 }
 0x279   :  { %3282 = vtanh.f32 %v552_v48 }
 0x283   :  { %v3283_v49 = vpop.eup %3282 }
 0x284   :  { %556 = vrot.lane.b32.xlu1 %v3283_v49, %s3330_s7 }
 0x2f6   :  { %v557_v51 = vpop.permute.xlu1 %556 }
 0x2f7   :  { %v559_v53 = vmul.f32 %v557_v51, %v554_v50  ;;  %v294_v50 = vld [vmem:[%s4073_s10] sm:$0xff] }
 0x2f9   :  { %v3763_v54 = vadd.f32 %v560_v52, %v559_v53 }
 0x2fb   :  { %638 = vrot.lane.b32.xlu1 %v3763_v54, %s3330_s7  ;;  %vm1868_vm6 = vcmp.ne.f32.partialorder %v3763_v54, %v3763_v54 }
 0x36d   :  { %v639_v55 = vpop.permute.xlu1 %638 }
 0x36e   :  { %2838 = vmatmul.mubr.msk.f32.vlgmr.msra.gmra.mrb[6].mxu1 %vm301_vm4, %v639_v55 }
 0x36f   :  { %3161 = vmatpush3.bf16.msra.mxu1 %v3645_v42  ;;  %2859 = vmatprep.mubr.msk.f32.mxu1 %vm3328_vm0, %v3327_v37 }
 0x370   :  { %3162 = vmatprep.subr.bf16.mxu1 %v3326_v36 }
 0x373   :  { %3164 = vmatpush3.bf16.msra.mxu1 %v3657_v45 }
 0x374   :  { %3171 = vmatprep.subr.bf16.mxu1 %v3326_v36 }
 0x441   :  { %v708_v56 = vpop.f32.mrb[6].mxu1 }
 0x442   :  { %v709_v57 = vadd.f32 %v3693_v1, %v708_v56  ;;  %v2839_v58 = vpop.f32.mrb[7].mxu1 }
 0x444   :  { %720 = vrot.lane.b32.xlu0 %v709_v57, %s3329_s3  ;;  %v712_v59 = vadd.f32 %v709_v57, %v636_v26 }
 0x446   :  { %v2567_v60 = vmul.f32 -1.442695, %v712_v59 }
 0x448   :  { %3284 = vpow2.f32 %v2567_v60 }
 0x452   :  { %v3285_v61 = vpop.eup %3284 }
 0x453   :  { %v716_v62 = vadd.f32 1.0, %v3285_v61 }
 0x455   :  { %3286 = vrcp.f32 %v716_v62 }
 0x45f   :  { %v3287_v63 = vpop.eup %3286 }
 0x460   :  { %v730_v9 = vsub.f32 1.0, %v3287_v63  ;;  %v736_v12 = vmul.f32 %v3287_v63, %v3763_v54 }
 0x4b6   :  { %v721_v0 = vpop.permute.xlu0 %720 }
 0x4b7   :  { %v723_v2 = vmul.f32 %v3287_v63, %v721_v0 }
 0x4b9   :  { %725 = vrot.lane.b32.xlu1 %v723_v2, %s3329_s3 }
 0x52b   :  { %v726_v3 = vpop.permute.xlu1 %725 }
 0x52c   :  { %v728_v4 = vadd.f32 %v726_v3, %v636_v26 }
 0x52e   :  { %3288 = vtanh.f32 %v728_v4 }
 0x538   :  { %v3289_v5 = vpop.eup %3288 }
 0x539   :  { %732 = vrot.lane.b32.xlu0 %v3289_v5, %s3330_s7 }
 0x5ab   :  { %v733_v10 = vpop.permute.xlu0 %732 }
 0x5ac   :  { %v735_v13 = vmul.f32 %v733_v10, %v730_v9 }
 0x5ae   :  { %v3779_v14 = vadd.f32 %v736_v12, %v735_v13 }
 0x5b0   :  { %814 = vrot.lane.b32.xlu1 %v3779_v14, %s3330_s7  ;;  %vm2045_vm7 = vcmp.ne.f32.partialorder %v3779_v14, %v3779_v14 }
 0x622   :  { %v815_v16 = vpop.permute.xlu1 %814 }
 0x623   :  { %2860 = vmatmul.mubr.msk.f32.vlgmr.msra.gmra.mrb[8].mxu1 %vm301_vm4, %v815_v16 }
 0x624   :  { %3173 = vmatpush3.bf16.msra.mxu1 %v3645_v42  ;;  %2881 = vmatprep.mubr.msk.f32.mxu1 %vm3328_vm0, %v3327_v37 }
 0x625   :  { %3174 = vmatprep.subr.bf16.mxu1 %v3326_v36 }
 0x628   :  { %3176 = vmatpush3.bf16.msra.mxu1 %v3657_v45 }
 0x629   :  { %2895 = vmatprep.subr.mxu1 %v3327_v37 }
 0x6f6   :  { %v884_v17 = vpop.f32.mrb[8].mxu1 }
 0x6f7   :  { %v885_v18 = vadd.f32 %v3693_v1, %v884_v17  ;;  %v2861_v19 = vpop.f32.mrb[9].mxu1 }
 0x6f9   :  { %896 = vrot.lane.b32.xlu0 %v885_v18, %s3329_s3  ;;  %v888_v20 = vadd.f32 %v885_v18, %v3754_v31 }
 0x6fb   :  { %v2570_v21 = vmul.f32 -1.442695, %v888_v20 }
 0x6fd   :  { %3290 = vpow2.f32 %v2570_v21 }
 0x707   :  { %v3291_v42 = vpop.eup %3290 }
 0x708   :  { %v892_v22 = vadd.f32 1.0, %v3291_v42 }
 0x70a   :  { %3292 = vrcp.f32 %v892_v22 }
 0x714   :  { %v3293_v23 = vpop.eup %3292 }
 0x715   :  { %v906_v34 = vsub.f32 1.0, %v3293_v23  ;;  %v912_v39 = vmul.f32 %v3293_v23, %v3779_v14 }
 0x76b   :  { %v897_v24 = vpop.permute.xlu0 %896 }
 0x76c   :  { %v899_v25 = vmul.f32 %v3293_v23, %v897_v24 }
 0x76e   :  { %901 = vrot.lane.b32.xlu1 %v899_v25, %s3329_s3 }
 0x7e0   :  { %v902_v45 = vpop.permute.xlu1 %901 }
 0x7e1   :  { %v904_v26 = vadd.f32 %v902_v45, %v3754_v31  ;;  %v3810_v31 = vpack.c.bf16 %v298_v32, %v297_v29 }
 0x7e3   :  { %3294 = vtanh.f32 %v904_v26  ;;  %3188 = vmatpush3.bf16.msra.mxu0 %v3810_v31 }
 0x7e4   :  { %3195 = vmatprep.subr.bf16.mxu0 %v3326_v36 }
 0x7e6   :  { %2909 = vmatmul.mubr.f32.vlgmr.msra.gmra.mrb[12].mxu0 %v3327_v37 }
 0x7e7   :  { %3197 = vmatpush3.bf16.msra.mxu0 %v3804_v30  ;;  %2930 = vmatprep.mubr.msk.f32.mxu0 %vm3328_vm0, %v3327_v37 }
 0x7e8   :  { %3198 = vmatprep.subr.bf16.mxu0 %v3326_v36 }
 0x7eb   :  { %3200 = vmatpush3.bf16.msra.mxu0 %v3810_v31 }
 0x7ec   :  { %3207 = vmatprep.subr.bf16.mxu0 %v3326_v36 }
 0x7ed   :  { %v3295_v33 = vpop.eup %3294 }
 0x7ee   :  { %908 = vrot.lane.b32.xlu0 %v3295_v33, %s3330_s7 }
 0x860   :  { %v909_v35 = vpop.permute.xlu0 %908 }
 0x861   :  { %v911_v40 = vmul.f32 %v909_v35, %v906_v34 }
 0x863   :  { %v3824_v44 = vadd.f32 %v912_v39, %v911_v40 }
 0x865   :  { %990 = vrot.lane.b32.xlu1 %v3824_v44, %s3330_s7  ;;  %vm2215_vm9 = vcmp.ne.f32.partialorder %v3824_v44, %v3824_v44 }
 0x8b9   :  { %v1310_v47 = vpop.f32.mrb[12].mxu0 }
 0x8ba   :  { %v1311_v48 = vadd.f32 %v3831_v46, %v1310_v47  ;;  %v2910_v49 = vpop.f32.mrb[13].mxu0 }
 0x8bc   :  { %1322 = vrot.lane.b32.xlu0 %v1311_v48, %s3329_s3 }
 0x8d7   :  { %v991_v51 = vpop.permute.xlu1 %990 }
 0x8d8   :  { %2882 = vmatmul.mubr.msk.f32.vlgmr.msra.gmra.mrb[10].mxu1 %vm301_vm4, %v991_v51 }
 0x8d9   :  { %2896 = vmatpush3.msra.mxu1 %v294_v50  ;;  %2897 = vmatprep.mubr.msk.f32.mxu1 %vm3328_vm0, %v3327_v37 }
 0x8da   :  { %3189 = vmatprep.subr.bf16.mxu1 %v3326_v36 }
 0x8dc   :  { %2898 = vmatmul.mubr.msk.f32.vlgmr.msra.gmra.mrb[12].mxu1 %vm382_vm1, %v3643_v41  ;;  %v2575_v41 = vld [vmem:[%s4074_s12] ss:$0 sm:$0xff] }
 0x8dd   :  { %3191 = vmatpush3.bf16.msra.mxu1 %v3726_v11  ;;  %2919 = vmatprep.mubr.msk.f32.mxu1 %vm3328_vm0, %v3327_v37 }
 0x8de   :  { %3192 = vmatprep.subr.bf16.mxu1 %v3326_v36 }
 0x8e1   :  { %3194 = vmatpush3.bf16.msra.mxu1 %v3738_v15 }
 0x8e2   :  { %3201 = vmatprep.subr.bf16.mxu1 %v3326_v36 }
 0x8e4   :  { %2920 = vmatmul.mubr.msk.f32.vlgmr.msra.gmra.mrb[14].mxu1 %vm301_vm4, %v738_v8 }
 0x8e5   :  { %3203 = vmatpush3.bf16.msra.mxu1 %v3726_v11  ;;  %2941 = vmatprep.mubr.msk.f32.mxu1 %vm3328_vm0, %v3327_v37 }
 0x8e6   :  { %3204 = vmatprep.subr.bf16.mxu1 %v3326_v36 }
 0x8e9   :  { %3206 = vmatpush3.bf16.msra.mxu1 %v3738_v15 }
 0x8ea   :  { %3213 = vmatprep.subr.bf16.mxu1 %v3326_v36 }
 0x8ec   :  { %2942 = vmatmul.mubr.msk.f32.vlgmr.msra.gmra.mrb[16].mxu1 %vm301_vm4, %v562_v7 }
 0x8ed   :  { %3215 = vmatpush3.bf16.msra.mxu1 %v3726_v11  ;;  %2963 = vmatprep.mubr.msk.f32.mxu1 %vm3328_vm0, %v3327_v37  ;;  %v1166_v11 = vadd.f32 %v2575_v41, %v3759_v43 }
 0x8ee   :  { %3216 = vmatprep.subr.bf16.mxu1 %v3326_v36 }
 0x8f1   :  { %3218 = vmatpush3.bf16.msra.mxu1 %v3738_v15 }
 0x8f2   :  { %3225 = vmatprep.subr.bf16.mxu1 %v3326_v36 }
 0x8f4   :  { %2964 = vmatmul.mubr.msk.f32.vlgmr.msra.gmra.mrb[18].mxu1 %vm301_vm4, %v3696_v6 }
 0x8f5   :  { %2985 = vmatprep.mubr.msk.f32.mxu1 %vm3328_vm0, %v3327_v37 }
 0x92e   :  { %v1323_v9 = vpop.permute.xlu0 %1322 }
 0x9ab   :  { %v3875_v7 = vpop.f32.mrb[10].mxu1 }
 0x9ac   :  { %v2883_v8 = vpop.f32.mrb[11].mxu1 }
 0x9af   :  { %v1233_v52 = vpop.f32.mrb[12].mxu1 }
 0x9b0   :  { %v1237_v53 = vadd.f32 %v1233_v52, %v1166_v11  ;;  %v2899_v15 = vpop.f32.mrb[13].mxu1 }
 0x9b2   :  { %v1314_v55 = vadd.f32 %v1311_v48, %v1237_v53 }
 0x9b4   :  { %v2578_v56 = vmul.f32 -1.442695, %v1314_v55 }
 0x9b6   :  { %3296 = vpow2.f32 %v2578_v56 }
 0x9b7   :  { %v1406_v57 = vpop.f32.mrb[14].mxu1 }
 0x9b8   :  { %v1410_v6 = vadd.f32 %v2575_v41, %v1406_v57  ;;  %v2921_v58 = vpop.f32.mrb[15].mxu1 }
 0x9ba   :  { %v1411_v59 = vadd.f32 %v1410_v6, %v1233_v52 }
 0x9bf   :  { %v1579_v60 = vpop.f32.mrb[16].mxu1 }
 0x9c0   :  { %v3297_v61 = vpop.eup %3296  ;;  %v1583_v62 = vadd.f32 %v2575_v41, %v1579_v60  ;;  %v2943_v63 = vpop.f32.mrb[17].mxu1 }
 0x9c1   :  { %v1318_v0 = vadd.f32 1.0, %v3297_v61 }
 0x9c2   :  { %v3878_v2 = vadd.f32 %v1583_v62, %v1233_v52 }
 0x9c3   :  { %3298 = vrcp.f32 %v1318_v0  ;;  %v1061_v0 = vadd.f32 %v3693_v1, %v3875_v7  ;;  %v1859_v1 = vld [vmem:[%s4075_s14] sm:$0xff]  ;;  %v1860_v7 = vld [vmem:[%s4075_s14 + $0x8] sm:$0xff] }
 0x9c7   :  { %v1752_v3 = vpop.f32.mrb[18].mxu1 }
 0x9c8   :  { %v1756_v43 = vadd.f32 %v2575_v41, %v1752_v3  ;;  %v2965_v4 = vpop.f32.mrb[19].mxu1 }
 0x9ca   :  { %v3880_v5 = vadd.f32 %v1756_v43, %v1233_v52 }
 0x9cd   :  { %v3299_v10 = vpop.eup %3298 }
 0x9ce   :  { %v1325_v12 = vmul.f32 %v3299_v10, %v1323_v9  ;;  %v1332_v18 = vsub.f32 1.0, %v3299_v10  ;;  %v1338_v20 = vmul.f32 0.0, %v3299_v10 }
 0x9d0   :  { %1327 = vrot.lane.b32.xlu1 %v1325_v12, %s3329_s3 }
 0xa42   :  { %v1328_v13 = vpop.permute.xlu1 %1327 }
 0xa43   :  { %v1330_v16 = vadd.f32 %v1328_v13, %v1237_v53 }
 0xa45   :  { %3300 = vtanh.f32 %v1330_v16  ;;  %v3936_v16 = vpack.c.bf16 %v1860_v7, %v1859_v1 }
 0xa4f   :  { %v3301_v17 = vpop.eup %3300 }
 0xa50   :  { %1334 = vrot.lane.b32.xlu0 %v3301_v17, %s3330_s7  ;;  %v1861_v17 = vld [vmem:[%s4075_s14 + $0x10] sm:$0xff] }
 0xac2   :  { %v1335_v19 = vpop.permute.xlu0 %1334 }
 0xac3   :  { %v1337_v21 = vmul.f32 %v1335_v19, %v1332_v18  ;;  %v1862_v18 = vld [vmem:[%s4075_s14 + $0x18] sm:$0xff] }
 0xac5   :  { %v3884_v42 = vadd.f32 %v1338_v20, %v1337_v21  ;;  %v3235_v20 = vpack.c.bf16 %v1862_v18, %v1861_v17 }
 0xac7   :  { %1413 = vrot.lane.b32.xlu1 %v3884_v42, %s3330_s7 }
 0xb39   :  { %v1414_v22 = vpop.permute.xlu1 %1413 }
 0xb3a   :  { %2931 = vmatmul.mubr.msk.f32.vlgmr.msra.gmra.mrb[14].mxu0 %vm301_vm4, %v1414_v22  ;;  %v1869_v22 = vsel %vm1868_vm6, 0.0, %v3763_v54 }
 0xb3b   :  { %3209 = vmatpush3.bf16.msra.mxu0 %v3804_v30  ;;  %2952 = vmatprep.mubr.msk.f32.mxu0 %vm3328_vm0, %v3327_v37  ;;  %vm1870_vm8 = vcmp.gt.f32.partialorder %v1869_v22, 3.4028235e+38 }
 0xb3c   :  { %3210 = vmatprep.subr.bf16.mxu0 %v3326_v36 }
 0xb3f   :  { %3212 = vmatpush3.bf16.msra.mxu0 %v3810_v31 }
 0xb40   :  { %3219 = vmatprep.subr.bf16.mxu0 %v3326_v36 }
 0xc0d   :  { %v1483_v23 = vpop.f32.mrb[14].mxu0 }
 0xc0e   :  { %v1484_v24 = vadd.f32 %v3831_v46, %v1483_v23  ;;  %v2932_v25 = vpop.f32.mrb[15].mxu0  ;;  %v2046_v23 = vsel %vm2045_vm7, 0.0, %v3779_v14 }
 0xc0f   :  { %vm2047_vm10 = vcmp.gt.f32.partialorder %v2046_v23, 3.4028235e+38  ;;  %v2216_v25 = vsel %vm2215_vm9, 0.0, %v3824_v44  ;;  %vm2391_vm9 = vcmp.ne.f32.partialorder %v3884_v42, %v3884_v42 }
 0xc10   :  { %1495 = vrot.lane.b32.xlu0 %v1484_v24, %s3329_s3  ;;  %v1487_v45 = vadd.f32 %v1484_v24, %v1411_v59  ;;  %v1871_v24 = vsel %vm1870_vm8, 1.0, %v1869_v22  ;;  %vm2217_vm12 = vcmp.gt.f32.partialorder %v2216_v25, 3.4028235e+38 }
 0xc11   :  { %vm1872_vm11 = vcmp.lt.f32.partialorder %v1871_v24, -3.4028235e+38 }
 0xc12   :  { %v2581_v26 = vmul.f32 -1.442695, %v1487_v45  ;;  %v2048_v45 = vsel %vm2047_vm10, 1.0, %v2046_v23  ;;  %v1873_v54 = vsel %vm1872_vm11, -1.0, %v1871_v24 }
 0xc13   :  { %vm2049_vm13 = vcmp.lt.f32.partialorder %v2048_v45, -3.4028235e+38 }
 0xc14   :  { %3302 = vpow2.f32 %v2581_v26  ;;  %v2218_v26 = vsel %vm2217_vm12, 1.0, %v2216_v25 }
 0xc15   :  { %vm2219_vm14 = vcmp.lt.f32.partialorder %v2218_v26, -3.4028235e+38 }
 0xc16   :  { %v2220_v14 = vsel %vm2219_vm14, -1.0, %v2218_v26 }
 0xc1e   :  { %v3303_v27 = vpop.eup %3302 }
 0xc1f   :  { %v1491_v28 = vadd.f32 1.0, %v3303_v27  ;;  %v2050_v27 = vsel %vm2049_vm13, -1.0, %v2048_v45 }
 0xc21   :  { %3304 = vrcp.f32 %v1491_v28 }
 0xc2b   :  { %v3305_v29 = vpop.eup %3304 }
 0xc2c   :  { %v1505_v40 = vsub.f32 1.0, %v3305_v29  ;;  %v1511_v48 = vmul.f32 %v3305_v29, %v3884_v42 }
 0xc82   :  { %v1496_v32 = vpop.permute.xlu0 %1495 }
 0xc83   :  { %v1498_v33 = vmul.f32 %v3305_v29, %v1496_v32 }
 0xc85   :  { %1500 = vrot.lane.b32.xlu1 %v1498_v33, %s3329_s3 }
 0xcf7   :  { %v1501_v34 = vpop.permute.xlu1 %1500 }
 0xcf8   :  { %v1503_v35 = vadd.f32 %v1501_v34, %v1411_v59 }
 0xcfa   :  { %3306 = vtanh.f32 %v1503_v35 }
 0xd04   :  { %v3307_v39 = vpop.eup %3306 }
 0xd05   :  { %1507 = vrot.lane.b32.xlu0 %v3307_v39, %s3330_s7 }
 0xd77   :  { %v1508_v47 = vpop.permute.xlu0 %1507 }
 0xd78   :  { %v1510_v49 = vmul.f32 %v1508_v47, %v1505_v40 }
 0xd7a   :  { %v3900_v50 = vadd.f32 %v1511_v48, %v1510_v49 }
 0xd7c   :  { %1586 = vrot.lane.b32.xlu1 %v3900_v50, %s3330_s7  ;;  %vm2221_vm5 = vcmp.ne.f32.partialorder %v3900_v50, %v3900_v50 }
 0xd7d   :  { %v2222_v17 = vsel %vm2221_vm5, 0.0, %v3900_v50 }
 0xd7e   :  { %vm2223_vm11 = vcmp.gt.f32.partialorder %v2222_v17, 3.4028235e+38 }
 0xd7f   :  { %v2224_v22 = vsel %vm2223_vm11, 1.0, %v2222_v17 }
 0xd80   :  { %vm2225_vm14 = vcmp.lt.f32.partialorder %v2224_v22, -3.4028235e+38 }
 0xdee   :  { %v1587_v51 = vpop.permute.xlu1 %1586 }
 0xdef   :  { %2953 = vmatmul.mubr.msk.f32.vlgmr.msra.gmra.mrb[16].mxu0 %vm301_vm4, %v1587_v51 }
 0xdf0   :  { %3221 = vmatpush3.bf16.msra.mxu0 %v3804_v30  ;;  %2974 = vmatprep.mubr.msk.f32.mxu0 %vm3328_vm0, %v3327_v37 }
 0xdf1   :  { %3222 = vmatprep.subr.bf16.mxu0 %v3326_v36 }
 0xdf4   :  { %3224 = vmatpush3.bf16.msra.mxu0 %v3810_v31 }
 0xdf5   :  { %3231 = vmatprep.subr.bf16.mxu0 %v3326_v36 }
 0xec2   :  { %v1656_v41 = vpop.f32.mrb[16].mxu0 }
 0xec3   :  { %v1657_v8 = vadd.f32 %v3831_v46, %v1656_v41  ;;  %v2954_v11 = vpop.f32.mrb[17].mxu0 }
 0xec5   :  { %1668 = vrot.lane.b32.xlu0 %v1657_v8, %s3329_s3  ;;  %v1660_v52 = vadd.f32 %v1657_v8, %v3878_v2 }
 0xec7   :  { %v2584_v53 = vmul.f32 -1.442695, %v1660_v52 }
 0xec9   :  { %3308 = vpow2.f32 %v2584_v53 }
 0xed3   :  { %v3309_v30 = vpop.eup %3308 }
 0xed4   :  { %v1664_v15 = vadd.f32 1.0, %v3309_v30 }
 0xed6   :  { %3310 = vrcp.f32 %v1664_v15 }
 0xee0   :  { %v3311_v55 = vpop.eup %3310 }
 0xee1   :  { %v1678_v59 = vsub.f32 1.0, %v3311_v55  ;;  %v1684_v61 = vmul.f32 %v3311_v55, %v3900_v50 }
 0xf37   :  { %v1669_v56 = vpop.permute.xlu0 %1668 }
 0xf38   :  { %v1671_v57 = vmul.f32 %v3311_v55, %v1669_v56 }
 0xf3a   :  { %1673 = vrot.lane.b32.xlu1 %v1671_v57, %s3329_s3 }
 0xfac   :  { %v1674_v31 = vpop.permute.xlu1 %1673 }
 0xfad   :  { %v1676_v6 = vadd.f32 %v1674_v31, %v3878_v2  ;;  %v1064_v2 = vadd.f32 %v1061_v0, %v3757_v38 }
 0xfaf   :  { %3312 = vtanh.f32 %v1676_v6  ;;  %v2573_v3 = vmul.f32 -1.442695, %v1064_v2 }
 0xfb1   :  { %3314 = vpow2.f32 %v2573_v3 }
 0xfb9   :  { %v3313_v58 = vpop.eup %3312 }
 0xfba   :  { %1680 = vrot.lane.b32.xlu0 %v3313_v58, %s3330_s7 }
 0xfbb   :  { %v3315_v43 = vpop.eup %3314 }
 0xfbc   :  { %v1068_v4 = vadd.f32 1.0, %v3315_v43 }
 0xfbe   :  { %3316 = vrcp.f32 %v1068_v4 }
 0xfc8   :  { %v3317_v10 = vpop.eup %3316 }
 0xfc9   :  { %v1082_v33 = vsub.f32 1.0, %v3317_v10  ;;  %v1088_v35 = vmul.f32 %v3317_v10, %v3824_v44 }
0x102c   :  { %v1681_v60 = vpop.permute.xlu0 %1680 }
0x102d   :  { %v1683_v62 = vmul.f32 %v1681_v60, %v1678_v59  ;;  %v1863_v59 = vld [vmem:[%s4076_s15] sm:$0xff]  ;;  %v1864_v60 = vld [vmem:[%s4076_s15 + $0x8] sm:$0xff] }
0x102f   :  { %v3918_v63 = vadd.f32 %v1684_v61, %v1683_v62  ;;  %v1865_v61 = vld [vmem:[%s4076_s15 + $0x10] sm:$0xff]  ;;  %v1866_v62 = vld [vmem:[%s4076_s15 + $0x18] sm:$0xff] }
0x1030   :  { %v3229_v2 = vpack.c.bf16 %v1866_v62, %v1865_v61 }
0x1031   :  { %1759 = vrot.lane.b32.xlu1 %v3918_v63, %s3330_s7  ;;  %vm2051_vm3 = vcmp.ne.f32.partialorder %v3918_v63, %v3918_v63 }
0x1032   :  { %v2052_v1 = vsel %vm2051_vm3, 0.0, %v3918_v63 }
0x1033   :  { %vm2053_vm7 = vcmp.gt.f32.partialorder %v2052_v1, 3.4028235e+38 }
0x1035   :  { %1072 = vrot.lane.b32.xlu1 %v1061_v0, %s3329_s3 }
0x10a3   :  { %v1760_v9 = vpop.permute.xlu1 %1759 }
0x10a4   :  { %2975 = vmatmul.mubr.msk.f32.vlgmr.msra.gmra.mrb[18].mxu0 %vm301_vm4, %v1760_v9 }
0x10a5   :  { %2996 = vmatprep.mubr.msk.f32.mxu0 %vm3328_vm0, %v3327_v37  ;;  %3233 = vmatpush3.bf16.msra.mxu0 %v3936_v16 }
0x10a6   :  { %3234 = vmatprep.subr.bf16.mxu0 %v3326_v36 }
0x10a7   :  { %v1073_v12 = vpop.permute.xlu1 %1072 }
0x10a8   :  { %v1075_v13 = vmul.f32 %v3317_v10, %v1073_v12 }
0x10a9   :  { %3236 = vmatpush3.bf16.msra.mxu0 %v3235_v20 }
0x10aa   :  { %1077 = vrot.lane.b32.xlu1 %v1075_v13, %s3329_s3  ;;  %3243 = vmatprep.subr.bf16.mxu0 %v3326_v36 }
0x111c   :  { %v1078_v19 = vpop.permute.xlu1 %1077 }
0x111d   :  { %v1080_v21 = vadd.f32 %v1078_v19, %v3757_v38  ;;  %v2054_v19 = vsel %vm2053_vm7, 1.0, %v2052_v1 }
0x111e   :  { %vm2055_vm12 = vcmp.lt.f32.partialorder %v2054_v19, -3.4028235e+38 }
0x111f   :  { %3318 = vtanh.f32 %v1080_v21  ;;  %v2056_v50 = vsel %vm2055_vm12, -1.0, %v2054_v19 }
0x1129   :  { %v3319_v38 = vpop.eup %3318 }
0x112a   :  { %1084 = vrot.lane.b32.xlu1 %v3319_v38, %s3330_s7  ;;  %v2226_v38 = vsel %vm2225_vm14, -1.0, %v2224_v22 }
0x112e   :  { %1956 = vrot.lane.b32.xlu1 %v1873_v54, %s3330_s7 }
0x1132   :  { %2133 = vrot.lane.b32.xlu1 %v2050_v27, %s3330_s7  ;;  %v2590_v27 = vld [vmem:[%s4077_s16] ss:$0 sm:$0xff] }
0x1136   :  { %2303 = vrot.lane.b32.xlu1 %v2220_v14, %s3330_s7 }
0x1177   :  { %v1829_v28 = vpop.f32.mrb[18].mxu0 }
0x1178   :  { %v1830_v29 = vadd.f32 %v3831_v46, %v1829_v28  ;;  %v2976_v32 = vpop.f32.mrb[19].mxu0 }
0x117a   :  { %1841 = vrot.lane.b32.xlu0 %v1830_v29, %s3329_s3  ;;  %v1833_v41 = vadd.f32 %v1830_v29, %v3880_v5 }
0x117c   :  { %v2587_v8 = vmul.f32 -1.442695, %v1833_v41 }
0x117e   :  { %3320 = vpow2.f32 %v2587_v8 }
0x1188   :  { %v3321_v11 = vpop.eup %3320 }
0x1189   :  { %v1837_v52 = vadd.f32 1.0, %v3321_v11 }
0x118b   :  { %3322 = vrcp.f32 %v1837_v52 }
0x1195   :  { %v3323_v53 = vpop.eup %3322 }
0x1196   :  { %v1851_v9 = vsub.f32 1.0, %v3323_v53  ;;  %v1857_v12 = vmul.f32 %v3323_v53, %v3918_v63  ;;  %v2392_v63 = vsel %vm2391_vm9, 0.0, %v3884_v42 }
0x1197   :  { %vm2393_vm13 = vcmp.gt.f32.partialorder %v2392_v63, 3.4028235e+38 }
0x1198   :  { %v2394_v24 = vsel %vm2393_vm13, 1.0, %v2392_v63 }
0x119c   :  { %v1085_v34 = vpop.permute.xlu1 %1084 }
0x119d   :  { %v1087_v39 = vmul.f32 %v1085_v34, %v1082_v33 }
0x119f   :  { %v1089_v40 = vadd.f32 %v1088_v35, %v1087_v39 }
0x11a0   :  { %v1957_v47 = vpop.permute.xlu1 %1956 }
0x11a1   :  { %vm2385_vm15 = vcmp.ne.f32.partialorder %v1089_v40, %v1089_v40  ;;  %2997 = vmatmul.mubr.msk.f32.vlgmr.msra.gmra.mrb[20].mxu0 %vm301_vm4, %v1957_v47 }
0x11a2   :  { %3245 = vmatpush3.bf16.msra.mxu0 %v3936_v16  ;;  %v2386_v48 = vsel %vm2385_vm15, 0.0, %v1089_v40  ;;  %3018 = vmatprep.mubr.msk.f32.mxu0 %vm3328_vm0, %v3327_v37  ;;  %vm2395_vm15 = vcmp.lt.f32.partialorder %v2394_v24, -3.4028235e+38 }
0x11a3   :  { %3246 = vmatprep.subr.bf16.mxu0 %v3326_v36  ;;  %vm2387_vm1 = vcmp.gt.f32.partialorder %v2386_v48, 3.4028235e+38  ;;  %v2396_v25 = vsel %vm2395_vm15, -1.0, %v2394_v24 }
0x11a4   :  { %v2388_v46 = vsel %vm2387_vm1, 1.0, %v2386_v48  ;;  %v2134_v44 = vpop.permute.xlu1 %2133 }
0x11a5   :  { %vm2389_vm2 = vcmp.lt.f32.partialorder %v2388_v46, -3.4028235e+38 }
0x11a6   :  { %3248 = vmatpush3.bf16.msra.mxu0 %v3235_v20  ;;  %v2390_v49 = vsel %vm2389_vm2, -1.0, %v2388_v46 }
0x11a7   :  { %2473 = vrot.lane.b32.xlu1 %v2390_v49, %s3330_s7  ;;  %3255 = vmatprep.subr.bf16.mxu0 %v3326_v36 }
0x11a8   :  { %v2304_v51 = vpop.permute.xlu1 %2303 }
0x11a9   :  { %3019 = vmatmul.mubr.msk.f32.vlgmr.msra.gmra.mrb[22].mxu0 %vm301_vm4, %v2134_v44 }
0x11aa   :  { %3257 = vmatpush3.bf16.msra.mxu0 %v3936_v16  ;;  %3040 = vmatprep.mubr.msk.f32.mxu0 %vm3328_vm0, %v3327_v37 }
0x11ab   :  { %3258 = vmatprep.subr.bf16.mxu0 %v3326_v36 }
0x11ae   :  { %3260 = vmatpush3.bf16.msra.mxu0 %v3235_v20 }
0x11af   :  { %3267 = vmatprep.subr.bf16.mxu0 %v3326_v36 }
0x11b1   :  { %3041 = vmatmul.mubr.msk.f32.vlgmr.msra.gmra.mrb[24].mxu0 %vm301_vm4, %v2304_v51 }
0x11b2   :  { %3269 = vmatpush3.bf16.msra.mxu0 %v3936_v16  ;;  %3062 = vmatprep.mubr.msk.f32.mxu0 %vm3328_vm0, %v3327_v37 }
0x11b3   :  { %3270 = vmatprep.subr.bf16.mxu0 %v3326_v36 }
0x11b6   :  { %3272 = vmatpush3.bf16.msra.mxu0 %v3235_v20 }
0x11ec   :  { %v1842_v30 = vpop.permute.xlu0 %1841 }
0x11ed   :  { %v1844_v15 = vmul.f32 %v3323_v53, %v1842_v30 }
0x11ef   :  { %1846 = vrot.lane.b32.xlu0 %v1844_v15, %s3329_s3 }
0x1219   :  { %v2474_v55 = vpop.permute.xlu1 %2473 }
0x121a   :  { %3063 = vmatmul.mubr.msk.f32.vlgmr.msra.gmra.mrb[26].mxu0 %vm301_vm4, %v2474_v55 }
0x1261   :  { %v1847_v56 = vpop.permute.xlu0 %1846 }
0x1262   :  { %v1849_v57 = vadd.f32 %v1847_v56, %v3880_v5  ;;  %v3226_v5 = vpack.c.bf16 %v1864_v60, %v1863_v59 }
0x1264   :  { %3324 = vtanh.f32 %v1849_v57  ;;  %3227 = vmatpush3.bf16.msra.mxu1 %v3226_v5 }
0x1265   :  { %3228 = vmatprep.subr.bf16.mxu1 %v3326_v36 }
0x1268   :  { %3230 = vmatpush3.bf16.msra.mxu1 %v3229_v2 }
0x1269   :  { %3237 = vmatprep.subr.bf16.mxu1 %v3326_v36 }
0x126e   :  { %v3325_v31 = vpop.eup %3324 }
0x126f   :  { %1853 = vrot.lane.b32.xlu0 %v3325_v31, %s3330_s7 }
0x1274   :  { %v3987_v6 = vpop.f32.mrb[20].mxu0 }
0x1275   :  { %v2998_v58 = vpop.f32.mrb[21].mxu0 }
0x127c   :  { %v4001_v0 = vpop.f32.mrb[22].mxu0 }
0x127d   :  { %v3020_v3 = vpop.f32.mrb[23].mxu0 }
0x1284   :  { %v4005_v43 = vpop.f32.mrb[24].mxu0 }
0x1285   :  { %v3042_v4 = vpop.f32.mrb[25].mxu0 }
0x12e1   :  { %v1854_v10 = vpop.permute.xlu0 %1853 }
0x12e2   :  { %v1856_v13 = vmul.f32 %v1854_v10, %v1851_v9 }
0x12e4   :  { %v1858_v7 = vadd.f32 %v1857_v12, %v1856_v13 }
0x12e6   :  { %vm1874_vm6 = vcmp.ne.f32.partialorder %v1858_v7, %v1858_v7 }
0x12e7   :  { %v1875_v16 = vsel %vm1874_vm6, 0.0, %v1858_v7 }
0x12e8   :  { %vm1876_vm8 = vcmp.gt.f32.partialorder %v1875_v16, 3.4028235e+38 }
0x12e9   :  { %v1877_v18 = vsel %vm1876_vm8, 1.0, %v1875_v16 }
0x12ea   :  { %vm1878_vm10 = vcmp.lt.f32.partialorder %v1877_v18, -3.4028235e+38 }
0x12eb   :  { %v1879_v20 = vsel %vm1878_vm10, -1.0, %v1877_v18 }
0x12ec   :  { %1881 = vrot.lane.b32.xlu0 %v1879_v20, %s3330_s7 }
0x12ed   :  { %v4018_v21 = vpop.f32.mrb[26].mxu0 }
0x12ee   :  { %v3064_v23 = vpop.f32.mrb[27].mxu0 }
0x12f0   :  { %2058 = vrot.lane.b32.xlu0 %v2056_v50, %s3330_s7 }
0x12f4   :  { %2228 = vrot.lane.b32.xlu0 %v2226_v38, %s3330_s7 }
0x12f8   :  { %2398 = vrot.lane.b32.xlu0 %v2396_v25, %s3330_s7 }
0x135e   :  { %v1882_v42 = vpop.permute.xlu0 %1881 }
0x135f   :  { %2986 = vmatmul.mubr.msk.f32.vlgmr.msra.gmra.mrb[20].mxu1 %vm301_vm4, %v1882_v42 }
0x1360   :  { %3239 = vmatpush3.bf16.msra.mxu1 %v3226_v5  ;;  %3007 = vmatprep.mubr.msk.f32.mxu1 %vm3328_vm0, %v3327_v37 }
0x1361   :  { %3240 = vmatprep.subr.bf16.mxu1 %v3326_v36 }
0x1362   :  { %v2059_v45 = vpop.permute.xlu0 %2058 }
0x1364   :  { %3242 = vmatpush3.bf16.msra.mxu1 %v3229_v2 }
0x1365   :  { %3249 = vmatprep.subr.bf16.mxu1 %v3326_v36 }
0x1366   :  { %v2229_v54 = vpop.permute.xlu0 %2228 }
0x1367   :  { %3008 = vmatmul.mubr.msk.f32.vlgmr.msra.gmra.mrb[22].mxu1 %vm301_vm4, %v2059_v45 }
0x1368   :  { %3251 = vmatpush3.bf16.msra.mxu1 %v3226_v5  ;;  %3029 = vmatprep.mubr.msk.f32.mxu1 %vm3328_vm0, %v3327_v37 }
0x1369   :  { %3252 = vmatprep.subr.bf16.mxu1 %v3326_v36 }
0x136a   :  { %v2399_v26 = vpop.permute.xlu0 %2398 }
0x136c   :  { %3254 = vmatpush3.bf16.msra.mxu1 %v3229_v2 }
0x136d   :  { %3261 = vmatprep.subr.bf16.mxu1 %v3326_v36 }
0x136f   :  { %3030 = vmatmul.mubr.msk.f32.vlgmr.msra.gmra.mrb[24].mxu1 %vm301_vm4, %v2229_v54 }
0x1370   :  { %3263 = vmatpush3.bf16.msra.mxu1 %v3226_v5  ;;  %3051 = vmatprep.mubr.msk.f32.mxu1 %vm3328_vm0, %v3327_v37  ;;  %vm2043_vm0 = vcmask 58368  }
0x1371   :  { %3264 = vmatprep.subr.bf16.mxu1 %v3326_v36 }
0x1374   :  { %3266 = vmatpush3.bf16.msra.mxu1 %v3229_v2 }
0x1377   :  { %3052 = vmatmul.mubr.msk.f32.vlgmr.msra.gmra.mrb[26].mxu1 %vm301_vm4, %v2399_v26 }
0x1432   :  { %v1951_v14 = vpop.f32.mrb[20].mxu1 }
0x1433   :  { %v2027_v28 = vadd.f32 %v3987_v6, %v1951_v14  ;;  %v2987_v29 = vpop.f32.mrb[21].mxu1 }
0x1435   :  { %v2036_v32 = vadd.f32 %v2590_v27, %v2027_v28 }
0x1437   :  { %vm2037_vm1 = vcmp.ne.f32.partialorder %v2036_v32, %v2036_v32 }
0x1438   :  { %v2038_v33 = vsel %vm2037_vm1, 0.0, %v2036_v32 }
0x1439   :  { %vm2039_vm2 = vcmp.gt.f32.partialorder %v2038_v33, 3.4028235e+38 }
0x143a   :  { %v2040_v34 = vsel %vm2039_vm2, 1.0, %v2038_v33  ;;  %v2128_v37 = vpop.f32.mrb[22].mxu1 }
0x143b   :  { %vm2041_vm3 = vcmp.lt.f32.partialorder %v2040_v34, -3.4028235e+38  ;;  %v2204_v36 = vadd.f32 %v4001_v0, %v2128_v37  ;;  %v3009_v35 = vpop.f32.mrb[23].mxu1 }
0x143c   :  { %v2042_v39 = vsel %vm2041_vm3, -1.0, %v2040_v34 }
0x143d   :  { %2044 = vst.msk [vmem:[%s4078_s17] sm:$0x3] %vm2043_vm0, %v2042_v39  ;;  %v2207_v40 = vadd.f32 %v2590_v27, %v2204_v36 }
0x143f   :  { %vm2208_vm4 = vcmp.ne.f32.partialorder %v2207_v40, %v2207_v40 }
0x1440   :  { %v2209_v47 = vsel %vm2208_vm4, 0.0, %v2207_v40 }
0x1441   :  { %vm2210_vm5 = vcmp.gt.f32.partialorder %v2209_v47, 3.4028235e+38 }
0x1442   :  { %v2211_v48 = vsel %vm2210_vm5, 1.0, %v2209_v47  ;;  %v2298_v46 = vpop.f32.mrb[24].mxu1 }
0x1443   :  { %vm2212_vm6 = vcmp.lt.f32.partialorder %v2211_v48, -3.4028235e+38  ;;  %v2374_v49 = vadd.f32 %v4005_v43, %v2298_v46  ;;  %v3031_v44 = vpop.f32.mrb[25].mxu1 }
0x1444   :  { %v2213_v51 = vsel %vm2212_vm6, -1.0, %v2211_v48 }
0x1445   :  { %2214 = vst.msk [vmem:[%s4078_s17 + $0x2] sm:$0x3] %vm2043_vm0, %v2213_v51  ;;  %v2377_v41 = vadd.f32 %v2590_v27, %v2374_v49 }
0x1447   :  { %vm2378_vm7 = vcmp.ne.f32.partialorder %v2377_v41, %v2377_v41 }
0x1448   :  { %v2379_v8 = vsel %vm2378_vm7, 0.0, %v2377_v41 }
0x1449   :  { %vm2380_vm8 = vcmp.gt.f32.partialorder %v2379_v8, 3.4028235e+38 }
0x144a   :  { %v2381_v11 = vsel %vm2380_vm8, 1.0, %v2379_v8  ;;  %v2468_v52 = vpop.f32.mrb[26].mxu1 }
0x144b   :  { %vm2382_vm9 = vcmp.lt.f32.partialorder %v2381_v11, -3.4028235e+38  ;;  %v2544_v53 = vadd.f32 %v4018_v21, %v2468_v52  ;;  %v3053_v30 = vpop.f32.mrb[27].mxu1 }
0x144c   :  { %v2383_v15 = vsel %vm2382_vm9, -1.0, %v2381_v11 }
0x144d   :  { %2384 = vst.msk [vmem:[%s4078_s17 + $0x4] sm:$0x3] %vm2043_vm0, %v2383_v15  ;;  %v2547_v55 = vadd.f32 %v2590_v27, %v2544_v53 }
0x144f   :  { %vm2548_vm10 = vcmp.ne.f32.partialorder %v2547_v55, %v2547_v55 }
0x1450   :  { %v2549_v56 = vsel %vm2548_vm10, 0.0, %v2547_v55 }
0x1451   :  { %vm2550_vm11 = vcmp.gt.f32.partialorder %v2549_v56, 3.4028235e+38 }
0x1452   :  { %v2551_v57 = vsel %vm2550_vm11, 1.0, %v2549_v56 }
0x1453   :  { %vm2552_vm12 = vcmp.lt.f32.partialorder %v2551_v57, -3.4028235e+38 }
0x1454   :  { %v2553_v31 = vsel %vm2552_vm12, -1.0, %v2551_v57 }
0x1455   :  { %2554 = vst.msk [vmem:[%s4078_s17 + $0x6] sm:$0x3] %vm2043_vm0, %v2553_v31 }

</bundles_post_ra>
